<compile_context>
chip_gen: v5e
topology: v5e:2x2
jax: 0.10.0
libtpu: 0.0.40
codegen_flags: <defaults>
</compile_context>

<pallas_src>
import jax
import jax.numpy as jnp
from jax import lax
from jax.experimental import pallas as pl
from jax.experimental.pallas import tpu as pltpu


def _round_up(x, m):
    return ((x + m - 1) // m) * m


# ---------------------------------------------------------------------------
# Dense kernel:  y = x @ w + b   (used for both hoisted projections; all
# timesteps are batched into the row dim so the MXU is fed dense tiles).
# ---------------------------------------------------------------------------
def _dense_kernel(x_ref, w_ref, b_ref, o_ref):
    o_ref[...] = (jnp.dot(x_ref[...], w_ref[...],
                          preferred_element_type=jnp.float32)
                  + b_ref[...]).astype(o_ref.dtype)


def dense(x, w, b):
    """x: (M, K), w: (K, N), b: (1, N) -> (M, N) float32.

    Shapes here fit entirely in VMEM, so a single grid step with full-array
    blocks is used (no per-tile pipeline overhead).  For production sizes,
    tile M/N with a parallel grid.
    """
    M, K = x.shape
    N = w.shape[1]
    return pl.pallas_call(
        _dense_kernel,
        out_shape=jax.ShapeDtypeStruct((M, N), jnp.float32),
        grid=(1,),
        in_specs=[
            pl.BlockSpec((M, K), lambda i: (0, 0)),
            pl.BlockSpec((K, N), lambda i: (0, 0)),
            pl.BlockSpec((1, N), lambda i: (0, 0)),
        ],
        out_specs=pl.BlockSpec((M, N), lambda i: (0, 0)),
        compiler_params=pltpu.CompilerParams(
            dimension_semantics=("arbitrary",)),
    )(x, w, b)


# ---------------------------------------------------------------------------
# LSTM recurrence kernel: only h_{t-1} @ W_hh remains on the serial path; the
# input contribution (gates_x) is precomputed.  Single grid invocation, time
# loop fully unrolled in-kernel, h/c carried in vector registers.
# ---------------------------------------------------------------------------
def _lstm_kernel(gx_ref, whh_ref, h_out_ref):
    T, B, _ = gx_ref.shape
    Hp = whh_ref.shape[0]
    whh = whh_ref[...]                                   # (Hp, 4Hp)

    def step(t, carry):
        h_prev, c_prev = carry
        gates = gx_ref[t] + jnp.dot(h_prev, whh,
                                    preferred_element_type=jnp.float32)  # (B,4Hp)
        # Hp is a multiple of 128 -> every gate slice is lane-aligned.
        i_g = jax.nn.sigmoid(gates[:, 0 * Hp:1 * Hp])
        f_g = jax.nn.sigmoid(gates[:, 1 * Hp:2 * Hp])
        g_g = jnp.tanh(gates[:, 2 * Hp:3 * Hp])
        o_g = jax.nn.sigmoid(gates[:, 3 * Hp:4 * Hp])
        c_new = f_g * c_prev + i_g * g_g
        h_new = o_g * jnp.tanh(c_new)
        h_out_ref[t] = h_new
        return h_new, c_new

    h0 = jnp.zeros((B, Hp), jnp.float32)                 # init_hidden -> zeros
    c0 = jnp.zeros((B, Hp), jnp.float32)
    lax.fori_loop(0, T, step, (h0, c0), unroll=True)


def lstm_recurrence(gates_x_tm, w_hh_p):
    T, B, G = gates_x_tm.shape
    Hp = w_hh_p.shape[0]
    return pl.pallas_call(
        _lstm_kernel,
        out_shape=jax.ShapeDtypeStruct((T, B, Hp), jnp.float32),
        grid=(1,),
        in_specs=[
            pl.BlockSpec((T, B, G), lambda i: (0, 0, 0)),
            pl.BlockSpec((Hp, G), lambda i: (0, 0)),
        ],
        out_specs=pl.BlockSpec((T, B, Hp), lambda i: (0, 0, 0)),
        compiler_params=pltpu.CompilerParams(
            dimension_semantics=("arbitrary",)),         # recurrence is serial
    )(gates_x_tm, w_hh_p)


# ---------------------------------------------------------------------------
# Wrapper: padding + glue + the three stages.
# ---------------------------------------------------------------------------
def _pad_gate_cols(w, H, Hp):
    """(R, 4H) -> (R, 4Hp): zero-pad each PyTorch gate block (i,f,g,o)
    independently so each gate starts on a 128-lane boundary."""
    R = w.shape[0]
    w4 = w.reshape(R, 4, H)
    w4 = jnp.pad(w4, ((0, 0), (0, 0), (0, Hp - H)))
    return w4.reshape(R, 4 * Hp)


def decoder_forward(features, captions, params):
    """features: (B, E) f32, captions: (B, S) int32 -> (B, S, V) f32."""
    emb = params["embedding"]          # (V, E)
    w_ih = params["w_ih"]              # (E, 4H)  (W_ih^T)
    w_hh = params["w_hh"]              # (H, 4H)  (W_hh^T)
    b = params["b"]                    # (1, 4H)  (b_ih + b_hh)
    w_fc = params["w_fc"]              # (H, V)   (W_fc^T)
    b_fc = params["b_fc"]              # (1, V)

    B, E = features.shape
    H = w_hh.shape[0]
    V = w_fc.shape[1]
    Hp = _round_up(H, 128)             # lane-aligned hidden width
    Vp = _round_up(V, 128)             # lane-dense logits width

    # Zero-padding: padded hidden/vocab units stay exactly 0 through the
    # recurrence and projection, so the math is unchanged.
    w_ih_p = _pad_gate_cols(w_ih, H, Hp)                                  # (E, 4Hp)
    w_hh_p = _pad_gate_cols(jnp.pad(w_hh, ((0, Hp - H), (0, 0))), H, Hp)  # (Hp,4Hp)
    b_p = _pad_gate_cols(b, H, Hp)                                        # (1, 4Hp)
    w_fc_p = jnp.pad(w_fc, ((0, Hp - H), (0, Vp - V)))                    # (Hp, Vp)
    b_fc_p = jnp.pad(b_fc, ((0, 0), (0, Vp - V)))                         # (1, Vp)

    # Glue: embedding gather straight into time-major order (only the tiny
    # int32 index matrix is transposed -> no HBM relayout of activations).
    caps_tm = captions[:, :-1].T                          # (S-1, B)
    embeds_tm = jnp.take(emb, caps_tm, axis=0)            # (S-1, B, E)
    inp_tm = jnp.concatenate([features[None, :, :], embeds_tm], axis=0)  # (T,B,E)
    T = inp_tm.shape[0]

    # Stage 1: hoisted input projection, one MXU-dense matmul over all steps.
    # TODO(synk): cast matmul operands to bfloat16 on v6e/v7x (keep f32
    # accumulation) for higher MXU throughput; kept f32 for exact parity.
    gates_x = dense(inp_tm.reshape(T * B, E), w_ih_p, b_p)        # (T*B, 4Hp)
    gates_x_tm = gates_x.reshape(T, B, 4 * Hp)

    # Stage 2: serial LSTM recurrence (only h @ W_hh on the critical path).
    h_tm = lstm_recurrence(gates_x_tm, w_hh_p)                    # (T, B, Hp)

    # Dropout: eval-mode identity.
    # TODO(synk): training-mode stochastic dropout (pltpu.prng_random_bits)
    # not reproduced (PyTorch RNG stream differs anyway).

    # Stage 3: hoisted vocab projection, written batch-first (only the small
    # hidden tensor is transposed, never the logits).
    h_bf = jnp.transpose(h_tm, (1, 0, 2)).reshape(B * T, Hp)
    logits = dense(h_bf, w_fc_p, b_fc_p)                          # (B*T, Vp)
    return logits.reshape(B, T, Vp)[:, :, :V]                     # (B, T, V)


# ---------------------------------------------------------------------------
# Pure-JAX reference (same math, no Pallas) for a correctness sanity check.
# ---------------------------------------------------------------------------
def decoder_forward_ref(features, captions, params):
    emb, w_ih, w_hh = params["embedding"], params["w_ih"], params["w_hh"]
    b, w_fc, b_fc = params["b"], params["w_fc"], params["b_fc"]
    B, _ = features.shape
    H = w_hh.shape[0]
    caps = captions[:, :-1]
    embeds = jnp.take(emb, caps, axis=0)                       # (B, S-1, E)
    inp = jnp.concatenate([features[:, None, :], embeds], axis=1)  # (B, T, E)

    def step(carry, x_t):
        h, c = carry
        g = x_t @ w_ih + h @ w_hh + b
        i = jax.nn.sigmoid(g[:, 0 * H:1 * H])
        f = jax.nn.sigmoid(g[:, 1 * H:2 * H])
        gg = jnp.tanh(g[:, 2 * H:3 * H])
        o = jax.nn.sigmoid(g[:, 3 * H:4 * H])
        c = f * c + i * gg
        h = o * jnp.tanh(c)
        return (h, c), h

    h0 = jnp.zeros((B, H), jnp.float32)
    c0 = jnp.zeros((B, H), jnp.float32)
    _, hs = lax.scan(step, (h0, c0), jnp.transpose(inp, (1, 0, 2)))
    hs = jnp.transpose(hs, (1, 0, 2))                          # (B, T, H)
    return hs @ w_fc + b_fc


def init_params(key, embed_size, hidden_size, vocab_size):
    ks = jax.random.split(key, 7)
    s = 1.0 / jnp.sqrt(hidden_size)
    return {
        "embedding": jax.random.normal(ks[0], (vocab_size, embed_size), jnp.float32),
        "w_ih": jax.random.uniform(ks[1], (embed_size, 4 * hidden_size),
                                   jnp.float32, -s, s),
        "w_hh": jax.random.uniform(ks[2], (hidden_size, 4 * hidden_size),
                                   jnp.float32, -s, s),
        "b": (jax.random.uniform(ks[3], (1, 4 * hidden_size), jnp.float32, -s, s)
              + jax.random.uniform(ks[4], (1, 4 * hidden_size), jnp.float32, -s, s)),
        "w_fc": jax.random.uniform(ks[5], (hidden_size, vocab_size),
                                   jnp.float32, -s, s),
        "b_fc": jax.random.uniform(ks[6], (1, vocab_size), jnp.float32, -s, s),
    }


if __name__ == "__main__":
    batch = 8
    embed_size = 32
    hidden_size = 32
    vocab_size = 128
    seq_len = 8          # caption length S; LSTM sees T = S (1 feature + S-1 embeds)

    key = jax.random.PRNGKey(0)
    k_feat, k_cap, k_param = jax.random.split(key, 3)

    features = jax.random.normal(k_feat, (batch, embed_size), jnp.float32)
    captions = jax.random.randint(k_cap, (batch, seq_len), 0, vocab_size, jnp.int32)
    params = init_params(k_param, embed_size, hidden_size, vocab_size)

    out = jax.block_until_ready(jax.jit(decoder_forward)(features, captions, params))
    assert out.shape == (batch, seq_len, vocab_size)

    ref = jax.block_until_ready(jax.jit(decoder_forward_ref)(features, captions, params))
    err = float(jnp.max(jnp.abs(out - ref)))
    assert err < 5e-2, f"max abs error vs reference: {err}"
    print("KERNEL_OK")
</pallas_src>

<mosaic_0001>
module attributes {stable_mosaic.version = 11 : i64} {
  func.func @_dense_kernel(%arg0: i32, %arg1: memref<64x32xf32, #tpu.memory_space<vmem>>, %arg2: memref<32x512xf32, #tpu.memory_space<vmem>>, %arg3: memref<1x512xf32, #tpu.memory_space<vmem>>, %arg4: memref<64x512xf32, #tpu.memory_space<vmem>>) attributes {dimension_semantics = [#tpu.dimension_semantics<arbitrary>], iteration_bounds = array<i64: 1>, scalar_prefetch = 0 : i64, scratch_operands = 0 : i64, tpu.core_type = #tpu.core_type<tc>, window_params = [{pipeline_mode = #tpu.pipeline_mode<synchronous>, transform_indices = @transform_0, window_bounds = array<i64: 64, 32>}, {pipeline_mode = #tpu.pipeline_mode<synchronous>, transform_indices = @transform_1, window_bounds = array<i64: 32, 512>}, {pipeline_mode = #tpu.pipeline_mode<synchronous>, transform_indices = @transform_2, window_bounds = array<i64: 1, 512>}, {pipeline_mode = #tpu.pipeline_mode<synchronous>, transform_indices = @transform_3, window_bounds = array<i64: 64, 512>}]} {
    %c0 = arith.constant 0 : index
    %c0_0 = arith.constant 0 : index
    %0 = vector.load %arg1[%c0, %c0_0] : memref<64x32xf32, #tpu.memory_space<vmem>>, vector<64x32xf32>
    %c0_1 = arith.constant 0 : index
    %c0_2 = arith.constant 0 : index
    %1 = vector.load %arg2[%c0_1, %c0_2] : memref<32x512xf32, #tpu.memory_space<vmem>>, vector<32x512xf32>
    %cst = arith.constant dense<0.000000e+00> : vector<64x512xf32>
    %2 = tpu.matmul %0, %1, %cst {dimension_numbers = #tpu.dot_dimension_numbers<[1], [0], [0], [1], [0, 0, 1, 1], [], []>} : vector<64x32xf32>, vector<32x512xf32>, vector<64x512xf32> -> vector<64x512xf32>
    %c0_3 = arith.constant 0 : index
    %c0_4 = arith.constant 0 : index
    %3 = vector.load %arg3[%c0_3, %c0_4] : memref<1x512xf32, #tpu.memory_space<vmem>>, vector<1x512xf32>
    %4 = vector.broadcast %3 : vector<1x512xf32> to vector<64x512xf32>
    %5 = arith.addf %2, %4 : vector<64x512xf32>
    %c0_5 = arith.constant 0 : index
    %c0_6 = arith.constant 0 : index
    %6 = vector.load %arg4[%c0_5, %c0_6] : memref<64x512xf32, #tpu.memory_space<vmem>>, vector<64x512xf32>
    tpu.vector_store %arg4[%c0_5, %c0_6], %5 {strides = array<i32>} : memref<64x512xf32, #tpu.memory_space<vmem>>, vector<64x512xf32>,
    return
  }
  func.func @transform_0(%arg0: i32) -> (i32, i32) {
    %c0_i32 = arith.constant 0 : i32
    %c0_i32_0 = arith.constant 0 : i32
    %c0_i32_1 = arith.constant 0 : i32
    return %c0_i32, %c0_i32_0 : i32, i32
  }
  func.func @transform_1(%arg0: i32) -> (i32, i32) {
    %c0_i32 = arith.constant 0 : i32
    %c0_i32_0 = arith.constant 0 : i32
    %c0_i32_1 = arith.constant 0 : i32
    return %c0_i32, %c0_i32_0 : i32, i32
  }
  func.func @transform_2(%arg0: i32) -> (i32, i32) {
    %c0_i32 = arith.constant 0 : i32
    %c0_i32_0 = arith.constant 0 : i32
    %c0_i32_1 = arith.constant 0 : i32
    return %c0_i32, %c0_i32_0 : i32, i32
  }
  func.func @transform_3(%arg0: i32) -> (i32, i32) {
    %c0_i32 = arith.constant 0 : i32
    %c0_i32_0 = arith.constant 0 : i32
    %c0_i32_1 = arith.constant 0 : i32
    return %c0_i32, %c0_i32_0 : i32, i32
  }
}

module attributes {stable_mosaic.version = 11 : i64} {
  func.func @_lstm_kernel(%arg0: i32, %arg1: memref<8x8x512xf32, #tpu.memory_space<vmem>>, %arg2: memref<128x512xf32, #tpu.memory_space<vmem>>, %arg3: memref<8x8x128xf32, #tpu.memory_space<vmem>>) attributes {dimension_semantics = [#tpu.dimension_semantics<arbitrary>], iteration_bounds = array<i64: 1>, scalar_prefetch = 0 : i64, scratch_operands = 0 : i64, tpu.core_type = #tpu.core_type<tc>, window_params = [{pipeline_mode = #tpu.pipeline_mode<synchronous>, transform_indices = @transform_0, window_bounds = array<i64: 8, 8, 512>}, {pipeline_mode = #tpu.pipeline_mode<synchronous>, transform_indices = @transform_1, window_bounds = array<i64: 128, 512>}, {pipeline_mode = #tpu.pipeline_mode<synchronous>, transform_indices = @transform_2, window_bounds = array<i64: 8, 8, 128>}]} {
    %c0 = arith.constant 0 : index
    %c0_0 = arith.constant 0 : index
    %0 = vector.load %arg2[%c0, %c0_0] : memref<128x512xf32, #tpu.memory_space<vmem>>, vector<128x512xf32>
    %cst = arith.constant 0.000000e+00 : f32
    %1 = vector.broadcast %cst : f32 to vector<8x128xf32>
    %cst_1 = arith.constant 0.000000e+00 : f32
    %2 = vector.broadcast %cst_1 : f32 to vector<8x128xf32>
    %c0_i32 = arith.constant 0 : i32
    %3 = arith.index_cast %c0_i32 : i32 to index
    %c0_2 = arith.constant 0 : index
    %c0_3 = arith.constant 0 : index
    %4 = vector.load %arg1[%3, %c0_2, %c0_3] : memref<8x8x512xf32, #tpu.memory_space<vmem>>, vector<1x8x512xf32>
    %5 = vector.shape_cast %4 : vector<1x8x512xf32> to vector<8x512xf32>
    %cst_4 = arith.constant dense<0.000000e+00> : vector<8x512xf32>
    %6 = tpu.matmul %1, %0, %cst_4 {dimension_numbers = #tpu.dot_dimension_numbers<[1], [0], [0], [1], [0, 0, 1, 1], [], []>} : vector<8x128xf32>, vector<128x512xf32>, vector<8x512xf32> -> vector<8x512xf32>
    %7 = arith.addf %5, %6 : vector<8x512xf32>
    %8 = vector.extract_strided_slice %7 {offsets = [0, 0], sizes = [8, 128], strides = [1, 1]} : vector<8x512xf32> to vector<8x128xf32>
    %9 = arith.negf %8 : vector<8x128xf32>
    %10 = math.exp %9 : vector<8x128xf32>
    %cst_5 = arith.constant 1.000000e+00 : f32
    %11 = vector.broadcast %cst_5 : f32 to vector<8x128xf32>
    %12 = arith.addf %11, %10 : vector<8x128xf32>
    %13 = arith.divf %11, %12 : vector<8x128xf32>
    %14 = vector.extract_strided_slice %7 {offsets = [0, 128], sizes = [8, 128], strides = [1, 1]} : vector<8x512xf32> to vector<8x128xf32>
    %15 = arith.negf %14 : vector<8x128xf32>
    %16 = math.exp %15 : vector<8x128xf32>
    %cst_6 = arith.constant 1.000000e+00 : f32
    %17 = vector.broadcast %cst_6 : f32 to vector<8x128xf32>
    %18 = arith.addf %17, %16 : vector<8x128xf32>
    %19 = arith.divf %17, %18 : vector<8x128xf32>
    %20 = vector.extract_strided_slice %7 {offsets = [0, 256], sizes = [8, 128], strides = [1, 1]} : vector<8x512xf32> to vector<8x128xf32>
    %21 = math.tanh %20 : vector<8x128xf32>
    %22 = vector.extract_strided_slice %7 {offsets = [0, 384], sizes = [8, 128], strides = [1, 1]} : vector<8x512xf32> to vector<8x128xf32>
    %23 = arith.negf %22 : vector<8x128xf32>
    %24 = math.exp %23 : vector<8x128xf32>
    %cst_7 = arith.constant 1.000000e+00 : f32
    %25 = vector.broadcast %cst_7 : f32 to vector<8x128xf32>
    %26 = arith.addf %25, %24 : vector<8x128xf32>
    %27 = arith.divf %25, %26 : vector<8x128xf32>
    %28 = arith.mulf %19, %2 : vector<8x128xf32>
    %29 = arith.mulf %13, %21 : vector<8x128xf32>
    %30 = arith.addf %28, %29 : vector<8x128xf32>
    %31 = math.tanh %30 : vector<8x128xf32>
    %32 = arith.mulf %27, %31 : vector<8x128xf32>
    %33 = arith.index_cast %c0_i32 : i32 to index
    %c0_8 = arith.constant 0 : index
    %c0_9 = arith.constant 0 : index
    %34 = vector.load %arg3[%33, %c0_8, %c0_9] : memref<8x8x128xf32, #tpu.memory_space<vmem>>, vector<1x8x128xf32>
    %35 = vector.shape_cast %34 : vector<1x8x128xf32> to vector<8x128xf32>
    %36 = vector.shape_cast %32 : vector<8x128xf32> to vector<1x8x128xf32>
    tpu.vector_store %arg3[%33, %c0_8, %c0_9], %36 {strides = array<i32>} : memref<8x8x128xf32, #tpu.memory_space<vmem>>, vector<1x8x128xf32>,
    %c1_i32 = arith.constant 1 : i32
    %37 = arith.index_cast %c1_i32 : i32 to index
    %c0_10 = arith.constant 0 : index
    %c0_11 = arith.constant 0 : index
    %38 = vector.load %arg1[%37, %c0_10, %c0_11] : memref<8x8x512xf32, #tpu.memory_space<vmem>>, vector<1x8x512xf32>
    %39 = vector.shape_cast %38 : vector<1x8x512xf32> to vector<8x512xf32>
    %cst_12 = arith.constant dense<0.000000e+00> : vector<8x512xf32>
    %40 = tpu.matmul %32, %0, %cst_12 {dimension_numbers = #tpu.dot_dimension_numbers<[1], [0], [0], [1], [0, 0, 1, 1], [], []>} : vector<8x128xf32>, vector<128x512xf32>, vector<8x512xf32> -> vector<8x512xf32>
    %41 = arith.addf %39, %40 : vector<8x512xf32>
    %42 = vector.extract_strided_slice %41 {offsets = [0, 0], sizes = [8, 128], strides = [1, 1]} : vector<8x512xf32> to vector<8x128xf32>
    %43 = arith.negf %42 : vector<8x128xf32>
    %44 = math.exp %43 : vector<8x128xf32>
    %cst_13 = arith.constant 1.000000e+00 : f32
    %45 = vector.broadcast %cst_13 : f32 to vector<8x128xf32>
    %46 = arith.addf %45, %44 : vector<8x128xf32>
    %47 = arith.divf %45, %46 : vector<8x128xf32>
    %48 = vector.extract_strided_slice %41 {offsets = [0, 128], sizes = [8, 128], strides = [1, 1]} : vector<8x512xf32> to vector<8x128xf32>
    %49 = arith.negf %48 : vector<8x128xf32>
    %50 = math.exp %49 : vector<8x128xf32>
    %cst_14 = arith.constant 1.000000e+00 : f32
    %51 = vector.broadcast %cst_14 : f32 to vector<8x128xf32>
    %52 = arith.addf %51, %50 : vector<8x128xf32>
    %53 = arith.divf %51, %52 : vector<8x128xf32>
    %54 = vector.extract_strided_slice %41 {offsets = [0, 256], sizes = [8, 128], strides = [1, 1]} : vector<8x512xf32> to vector<8x128xf32>
    %55 = math.tanh %54 : vector<8x128xf32>
    %56 = vector.extract_strided_slice %41 {offsets = [0, 384], sizes = [8, 128], strides = [1, 1]} : vector<8x512xf32> to vector<8x128xf32>
    %57 = arith.negf %56 : vector<8x128xf32>
    %58 = math.exp %57 : vector<8x128xf32>
    %cst_15 = arith.constant 1.000000e+00 : f32
    %59 = vector.broadcast %cst_15 : f32 to vector<8x128xf32>
    %60 = arith.addf %59, %58 : vector<8x128xf32>
    %61 = arith.divf %59, %60 : vector<8x128xf32>
    %62 = arith.mulf %53, %30 : vector<8x128xf32>
    %63 = arith.mulf %47, %55 : vector<8x128xf32>
    %64 = arith.addf %62, %63 : vector<8x128xf32>
    %65 = math.tanh %64 : vector<8x128xf32>
    %66 = arith.mulf %61, %65 : vector<8x128xf32>
    %67 = arith.index_cast %c1_i32 : i32 to index
    %c0_16 = arith.constant 0 : index
    %c0_17 = arith.constant 0 : index
    %68 = vector.load %arg3[%67, %c0_16, %c0_17] : memref<8x8x128xf32, #tpu.memory_space<vmem>>, vector<1x8x128xf32>
    %69 = vector.shape_cast %68 : vector<1x8x128xf32> to vector<8x128xf32>
    %70 = vector.shape_cast %66 : vector<8x128xf32> to vector<1x8x128xf32>
    tpu.vector_store %arg3[%67, %c0_16, %c0_17], %70 {strides = array<i32>} : memref<8x8x128xf32, #tpu.memory_space<vmem>>, vector<1x8x128xf32>,
    %c2_i32 = arith.constant 2 : i32
    %71 = arith.index_cast %c2_i32 : i32 to index
    %c0_18 = arith.constant 0 : index
    %c0_19 = arith.constant 0 : index
    %72 = vector.load %arg1[%71, %c0_18, %c0_19] : memref<8x8x512xf32, #tpu.memory_space<vmem>>, vector<1x8x512xf32>
    %73 = vector.shape_cast %72 : vector<1x8x512xf32> to vector<8x512xf32>
    %cst_20 = arith.constant dense<0.000000e+00> : vector<8x512xf32>
    %74 = tpu.matmul %66, %0, %cst_20 {dimension_numbers = #tpu.dot_dimension_numbers<[1], [0], [0], [1], [0, 0, 1, 1], [], []>} : vector<8x128xf32>, vector<128x512xf32>, vector<8x512xf32> -> vector<8x512xf32>
    %75 = arith.addf %73, %74 : vector<8x512xf32>
    %76 = vector.extract_strided_slice %75 {offsets = [0, 0], sizes = [8, 128], strides = [1, 1]} : vector<8x512xf32> to vector<8x128xf32>
    %77 = arith.negf %76 : vector<8x128xf32>
    %78 = math.exp %77 : vector<8x128xf32>
    %cst_21 = arith.constant 1.000000e+00 : f32
    %79 = vector.broadcast %cst_21 : f32 to vector<8x128xf32>
    %80 = arith.addf %79, %78 : vector<8x128xf32>
    %81 = arith.divf %79, %80 : vector<8x128xf32>
    %82 = vector.extract_strided_slice %75 {offsets = [0, 128], sizes = [8, 128], strides = [1, 1]} : vector<8x512xf32> to vector<8x128xf32>
    %83 = arith.negf %82 : vector<8x128xf32>
    %84 = math.exp %83 : vector<8x128xf32>
    %cst_22 = arith.constant 1.000000e+00 : f32
    %85 = vector.broadcast %cst_22 : f32 to vector<8x128xf32>
    %86 = arith.addf %85, %84 : vector<8x128xf32>
    %87 = arith.divf %85, %86 : vector<8x128xf32>
    %88 = vector.extract_strided_slice %75 {offsets = [0, 256], sizes = [8, 128], strides = [1, 1]} : vector<8x512xf32> to vector<8x128xf32>
    %89 = math.tanh %88 : vector<8x128xf32>
    %90 = vector.extract_strided_slice %75 {offsets = [0, 384], sizes = [8, 128], strides = [1, 1]} : vector<8x512xf32> to vector<8x128xf32>
    %91 = arith.negf %90 : vector<8x128xf32>
    %92 = math.exp %91 : vector<8x128xf32>
    %cst_23 = arith.constant 1.000000e+00 : f32
    %93 = vector.broadcast %cst_23 : f32 to vector<8x128xf32>
    %94 = arith.addf %93, %92 : vector<8x128xf32>
    %95 = arith.divf %93, %94 : vector<8x128xf32>
    %96 = arith.mulf %87, %64 : vector<8x128xf32>
    %97 = arith.mulf %81, %89 : vector<8x128xf32>
    %98 = arith.addf %96, %97 : vector<8x128xf32>
    %99 = math.tanh %98 : vector<8x128xf32>
    %100 = arith.mulf %95, %99 : vector<8x128xf32>
    %101 = arith.index_cast %c2_i32 : i32 to index
    %c0_24 = arith.constant 0 : index
    %c0_25 = arith.constant 0 : index
    %102 = vector.load %arg3[%101, %c0_24, %c0_25] : memref<8x8x128xf32, #tpu.memory_space<vmem>>, vector<1x8x128xf32>
    %103 = vector.shape_cast %102 : vector<1x8x128xf32> to vector<8x128xf32>
    %104 = vector.shape_cast %100 : vector<8x128xf32> to vector<1x8x128xf32>
    tpu.vector_store %arg3[%101, %c0_24, %c0_25], %104 {strides = array<i32>} : memref<8x8x128xf32, #tpu.memory_space<vmem>>, vector<1x8x128xf32>,
    %c3_i32 = arith.constant 3 : i32
    %105 = arith.index_cast %c3_i32 : i32 to index
    %c0_26 = arith.constant 0 : index
    %c0_27 = arith.constant 0 : index
    %106 = vector.load %arg1[%105, %c0_26, %c0_27] : memref<8x8x512xf32, #tpu.memory_space<vmem>>, vector<1x8x512xf32>
    %107 = vector.shape_cast %106 : vector<1x8x512xf32> to vector<8x512xf32>
    %cst_28 = arith.constant dense<0.000000e+00> : vector<8x512xf32>
    %108 = tpu.matmul %100, %0, %cst_28 {dimension_numbers = #tpu.dot_dimension_numbers<[1], [0], [0], [1], [0, 0, 1, 1], [], []>} : vector<8x128xf32>, vector<128x512xf32>, vector<8x512xf32> -> vector<8x512xf32>
    %109 = arith.addf %107, %108 : vector<8x512xf32>
    %110 = vector.extract_strided_slice %109 {offsets = [0, 0], sizes = [8, 128], strides = [1, 1]} : vector<8x512xf32> to vector<8x128xf32>
    %111 = arith.negf %110 : vector<8x128xf32>
    %112 = math.exp %111 : vector<8x128xf32>
    %cst_29 = arith.constant 1.000000e+00 : f32
    %113 = vector.broadcast %cst_29 : f32 to vector<8x128xf32>
    %114 = arith.addf %113, %112 : vector<8x128xf32>
    %115 = arith.divf %113, %114 : vector<8x128xf32>
    %116 = vector.extract_strided_slice %109 {offsets = [0, 128], sizes = [8, 128], strides = [1, 1]} : vector<8x512xf32> to vector<8x128xf32>
    %117 = arith.negf %116 : vector<8x128xf32>
    %118 = math.exp %117 : vector<8x128xf32>
    %cst_30 = arith.constant 1.000000e+00 : f32
    %119 = vector.broadcast %cst_30 : f32 to vector<8x128xf32>
    %120 = arith.addf %119, %118 : vector<8x128xf32>
    %121 = arith.divf %119, %120 : vector<8x128xf32>
    %122 = vector.extract_strided_slice %109 {offsets = [0, 256], sizes = [8, 128], strides = [1, 1]} : vector<8x512xf32> to vector<8x128xf32>
    %123 = math.tanh %122 : vector<8x128xf32>
    %124 = vector.extract_strided_slice %109 {offsets = [0, 384], sizes = [8, 128], strides = [1, 1]} : vector<8x512xf32> to vector<8x128xf32>
    %125 = arith.negf %124 : vector<8x128xf32>
    %126 = math.exp %125 : vector<8x128xf32>
    %cst_31 = arith.constant 1.000000e+00 : f32
    %127 = vector.broadcast %cst_31 : f32 to vector<8x128xf32>
    %128 = arith.addf %127, %126 : vector<8x128xf32>
    %129 = arith.divf %127, %128 : vector<8x128xf32>
    %130 = arith.mulf %121, %98 : vector<8x128xf32>
    %131 = arith.mulf %115, %123 : vector<8x128xf32>
    %132 = arith.addf %130, %131 : vector<8x128xf32>
    %133 = math.tanh %132 : vector<8x128xf32>
    %134 = arith.mulf %129, %133 : vector<8x128xf32>
    %135 = arith.index_cast %c3_i32 : i32 to index
    %c0_32 = arith.constant 0 : index
    %c0_33 = arith.constant 0 : index
    %136 = vector.load %arg3[%135, %c0_32, %c0_33] : memref<8x8x128xf32, #tpu.memory_space<vmem>>, vector<1x8x128xf32>
    %137 = vector.shape_cast %136 : vector<1x8x128xf32> to vector<8x128xf32>
    %138 = vector.shape_cast %134 : vector<8x128xf32> to vector<1x8x128xf32>
    tpu.vector_store %arg3[%135, %c0_32, %c0_33], %138 {strides = array<i32>} : memref<8x8x128xf32, #tpu.memory_space<vmem>>, vector<1x8x128xf32>,
    %c4_i32 = arith.constant 4 : i32
    %139 = arith.index_cast %c4_i32 : i32 to index
    %c0_34 = arith.constant 0 : index
    %c0_35 = arith.constant 0 : index
    %140 = vector.load %arg1[%139, %c0_34, %c0_35] : memref<8x8x512xf32, #tpu.memory_space<vmem>>, vector<1x8x512xf32>
    %141 = vector.shape_cast %140 : vector<1x8x512xf32> to vector<8x512xf32>
    %cst_36 = arith.constant dense<0.000000e+00> : vector<8x512xf32>
    %142 = tpu.matmul %134, %0, %cst_36 {dimension_numbers = #tpu.dot_dimension_numbers<[1], [0], [0], [1], [0, 0, 1, 1], [], []>} : vector<8x128xf32>, vector<128x512xf32>, vector<8x512xf32> -> vector<8x512xf32>
    %143 = arith.addf %141, %142 : vector<8x512xf32>
    %144 = vector.extract_strided_slice %143 {offsets = [0, 0], sizes = [8, 128], strides = [1, 1]} : vector<8x512xf32> to vector<8x128xf32>
    %145 = arith.negf %144 : vector<8x128xf32>
    %146 = math.exp %145 : vector<8x128xf32>
    %cst_37 = arith.constant 1.000000e+00 : f32
    %147 = vector.broadcast %cst_37 : f32 to vector<8x128xf32>
    %148 = arith.addf %147, %146 : vector<8x128xf32>
    %149 = arith.divf %147, %148 : vector<8x128xf32>
    %150 = vector.extract_strided_slice %143 {offsets = [0, 128], sizes = [8, 128], strides = [1, 1]} : vector<8x512xf32> to vector<8x128xf32>
    %151 = arith.negf %150 : vector<8x128xf32>
    %152 = math.exp %151 : vector<8x128xf32>
    %cst_38 = arith.constant 1.000000e+00 : f32
    %153 = vector.broadcast %cst_38 : f32 to vector<8x128xf32>
    %154 = arith.addf %153, %152 : vector<8x128xf32>
    %155 = arith.divf %153, %154 : vector<8x128xf32>
    %156 = vector.extract_strided_slice %143 {offsets = [0, 256], sizes = [8, 128], strides = [1, 1]} : vector<8x512xf32> to vector<8x128xf32>
    %157 = math.tanh %156 : vector<8x128xf32>
    %158 = vector.extract_strided_slice %143 {offsets = [0, 384], sizes = [8, 128], strides = [1, 1]} : vector<8x512xf32> to vector<8x128xf32>
    %159 = arith.negf %158 : vector<8x128xf32>
    %160 = math.exp %159 : vector<8x128xf32>
    %cst_39 = arith.constant 1.000000e+00 : f32
    %161 = vector.broadcast %cst_39 : f32 to vector<8x128xf32>
    %162 = arith.addf %161, %160 : vector<8x128xf32>
    %163 = arith.divf %161, %162 : vector<8x128xf32>
    %164 = arith.mulf %155, %132 : vector<8x128xf32>
    %165 = arith.mulf %149, %157 : vector<8x128xf32>
    %166 = arith.addf %164, %165 : vector<8x128xf32>
    %167 = math.tanh %166 : vector<8x128xf32>
    %168 = arith.mulf %163, %167 : vector<8x128xf32>
    %169 = arith.index_cast %c4_i32 : i32 to index
    %c0_40 = arith.constant 0 : index
    %c0_41 = arith.constant 0 : index
    %170 = vector.load %arg3[%169, %c0_40, %c0_41] : memref<8x8x128xf32, #tpu.memory_space<vmem>>, vector<1x8x128xf32>
    %171 = vector.shape_cast %170 : vector<1x8x128xf32> to vector<8x128xf32>
    %172 = vector.shape_cast %168 : vector<8x128xf32> to vector<1x8x128xf32>
    tpu.vector_store %arg3[%169, %c0_40, %c0_41], %172 {strides = array<i32>} : memref<8x8x128xf32, #tpu.memory_space<vmem>>, vector<1x8x128xf32>,
    %c5_i32 = arith.constant 5 : i32
    %173 = arith.index_cast %c5_i32 : i32 to index
    %c0_42 = arith.constant 0 : index
    %c0_43 = arith.constant 0 : index
    %174 = vector.load %arg1[%173, %c0_42, %c0_43] : memref<8x8x512xf32, #tpu.memory_space<vmem>>, vector<1x8x512xf32>
    %175 = vector.shape_cast %174 : vector<1x8x512xf32> to vector<8x512xf32>
    %cst_44 = arith.constant dense<0.000000e+00> : vector<8x512xf32>
    %176 = tpu.matmul %168, %0, %cst_44 {dimension_numbers = #tpu.dot_dimension_numbers<[1], [0], [0], [1], [0, 0, 1, 1], [], []>} : vector<8x128xf32>, vector<128x512xf32>, vector<8x512xf32> -> vector<8x512xf32>
    %177 = arith.addf %175, %176 : vector<8x512xf32>
    %178 = vector.extract_strided_slice %177 {offsets = [0, 0], sizes = [8, 128], strides = [1, 1]} : vector<8x512xf32> to vector<8x128xf32>
    %179 = arith.negf %178 : vector<8x128xf32>
    %180 = math.exp %179 : vector<8x128xf32>
    %cst_45 = arith.constant 1.000000e+00 : f32
    %181 = vector.broadcast %cst_45 : f32 to vector<8x128xf32>
    %182 = arith.addf %181, %180 : vector<8x128xf32>
    %183 = arith.divf %181, %182 : vector<8x128xf32>
    %184 = vector.extract_strided_slice %177 {offsets = [0, 128], sizes = [8, 128], strides = [1, 1]} : vector<8x512xf32> to vector<8x128xf32>
    %185 = arith.negf %184 : vector<8x128xf32>
    %186 = math.exp %185 : vector<8x128xf32>
    %cst_46 = arith.constant 1.000000e+00 : f32
    %187 = vector.broadcast %cst_46 : f32 to vector<8x128xf32>
    %188 = arith.addf %187, %186 : vector<8x128xf32>
    %189 = arith.divf %187, %188 : vector<8x128xf32>
    %190 = vector.extract_strided_slice %177 {offsets = [0, 256], sizes = [8, 128], strides = [1, 1]} : vector<8x512xf32> to vector<8x128xf32>
    %191 = math.tanh %190 : vector<8x128xf32>
    %192 = vector.extract_strided_slice %177 {offsets = [0, 384], sizes = [8, 128], strides = [1, 1]} : vector<8x512xf32> to vector<8x128xf32>
    %193 = arith.negf %192 : vector<8x128xf32>
    %194 = math.exp %193 : vector<8x128xf32>
    %cst_47 = arith.constant 1.000000e+00 : f32
    %195 = vector.broadcast %cst_47 : f32 to vector<8x128xf32>
    %196 = arith.addf %195, %194 : vector<8x128xf32>
    %197 = arith.divf %195, %196 : vector<8x128xf32>
    %198 = arith.mulf %189, %166 : vector<8x128xf32>
    %199 = arith.mulf %183, %191 : vector<8x128xf32>
    %200 = arith.addf %198, %199 : vector<8x128xf32>
    %201 = math.tanh %200 : vector<8x128xf32>
    %202 = arith.mulf %197, %201 : vector<8x128xf32>
    %203 = arith.index_cast %c5_i32 : i32 to index
    %c0_48 = arith.constant 0 : index
    %c0_49 = arith.constant 0 : index
    %204 = vector.load %arg3[%203, %c0_48, %c0_49] : memref<8x8x128xf32, #tpu.memory_space<vmem>>, vector<1x8x128xf32>
    %205 = vector.shape_cast %204 : vector<1x8x128xf32> to vector<8x128xf32>
    %206 = vector.shape_cast %202 : vector<8x128xf32> to vector<1x8x128xf32>
    tpu.vector_store %arg3[%203, %c0_48, %c0_49], %206 {strides = array<i32>} : memref<8x8x128xf32, #tpu.memory_space<vmem>>, vector<1x8x128xf32>,
    %c6_i32 = arith.constant 6 : i32
    %207 = arith.index_cast %c6_i32 : i32 to index
    %c0_50 = arith.constant 0 : index
    %c0_51 = arith.constant 0 : index
    %208 = vector.load %arg1[%207, %c0_50, %c0_51] : memref<8x8x512xf32, #tpu.memory_space<vmem>>, vector<1x8x512xf32>
    %209 = vector.shape_cast %208 : vector<1x8x512xf32> to vector<8x512xf32>
    %cst_52 = arith.constant dense<0.000000e+00> : vector<8x512xf32>
    %210 = tpu.matmul %202, %0, %cst_52 {dimension_numbers = #tpu.dot_dimension_numbers<[1], [0], [0], [1], [0, 0, 1, 1], [], []>} : vector<8x128xf32>, vector<128x512xf32>, vector<8x512xf32> -> vector<8x512xf32>
    %211 = arith.addf %209, %210 : vector<8x512xf32>
    %212 = vector.extract_strided_slice %211 {offsets = [0, 0], sizes = [8, 128], strides = [1, 1]} : vector<8x512xf32> to vector<8x128xf32>
    %213 = arith.negf %212 : vector<8x128xf32>
    %214 = math.exp %213 : vector<8x128xf32>
    %cst_53 = arith.constant 1.000000e+00 : f32
    %215 = vector.broadcast %cst_53 : f32 to vector<8x128xf32>
    %216 = arith.addf %215, %214 : vector<8x128xf32>
    %217 = arith.divf %215, %216 : vector<8x128xf32>
    %218 = vector.extract_strided_slice %211 {offsets = [0, 128], sizes = [8, 128], strides = [1, 1]} : vector<8x512xf32> to vector<8x128xf32>
    %219 = arith.negf %218 : vector<8x128xf32>
    %220 = math.exp %219 : vector<8x128xf32>
    %cst_54 = arith.constant 1.000000e+00 : f32
    %221 = vector.broadcast %cst_54 : f32 to vector<8x128xf32>
    %222 = arith.addf %221, %220 : vector<8x128xf32>
    %223 = arith.divf %221, %222 : vector<8x128xf32>
    %224 = vector.extract_strided_slice %211 {offsets = [0, 256], sizes = [8, 128], strides = [1, 1]} : vector<8x512xf32> to vector<8x128xf32>
    %225 = math.tanh %224 : vector<8x128xf32>
    %226 = vector.extract_strided_slice %211 {offsets = [0, 384], sizes = [8, 128], strides = [1, 1]} : vector<8x512xf32> to vector<8x128xf32>
    %227 = arith.negf %226 : vector<8x128xf32>
    %228 = math.exp %227 : vector<8x128xf32>
    %cst_55 = arith.constant 1.000000e+00 : f32
    %229 = vector.broadcast %cst_55 : f32 to vector<8x128xf32>
    %230 = arith.addf %229, %228 : vector<8x128xf32>
    %231 = arith.divf %229, %230 : vector<8x128xf32>
    %232 = arith.mulf %223, %200 : vector<8x128xf32>
    %233 = arith.mulf %217, %225 : vector<8x128xf32>
    %234 = arith.addf %232, %233 : vector<8x128xf32>
    %235 = math.tanh %234 : vector<8x128xf32>
    %236 = arith.mulf %231, %235 : vector<8x128xf32>
    %237 = arith.index_cast %c6_i32 : i32 to index
    %c0_56 = arith.constant 0 : index
    %c0_57 = arith.constant 0 : index
    %238 = vector.load %arg3[%237, %c0_56, %c0_57] : memref<8x8x128xf32, #tpu.memory_space<vmem>>, vector<1x8x128xf32>
    %239 = vector.shape_cast %238 : vector<1x8x128xf32> to vector<8x128xf32>
    %240 = vector.shape_cast %236 : vector<8x128xf32> to vector<1x8x128xf32>
    tpu.vector_store %arg3[%237, %c0_56, %c0_57], %240 {strides = array<i32>} : memref<8x8x128xf32, #tpu.memory_space<vmem>>, vector<1x8x128xf32>,
    %c7_i32 = arith.constant 7 : i32
    %241 = arith.index_cast %c7_i32 : i32 to index
    %c0_58 = arith.constant 0 : index
    %c0_59 = arith.constant 0 : index
    %242 = vector.load %arg1[%241, %c0_58, %c0_59] : memref<8x8x512xf32, #tpu.memory_space<vmem>>, vector<1x8x512xf32>
    %243 = vector.shape_cast %242 : vector<1x8x512xf32> to vector<8x512xf32>
    %cst_60 = arith.constant dense<0.000000e+00> : vector<8x512xf32>
    %244 = tpu.matmul %236, %0, %cst_60 {dimension_numbers = #tpu.dot_dimension_numbers<[1], [0], [0], [1], [0, 0, 1, 1], [], []>} : vector<8x128xf32>, vector<128x512xf32>, vector<8x512xf32> -> vector<8x512xf32>
    %245 = arith.addf %243, %244 : vector<8x512xf32>
    %246 = vector.extract_strided_slice %245 {offsets = [0, 0], sizes = [8, 128], strides = [1, 1]} : vector<8x512xf32> to vector<8x128xf32>
    %247 = arith.negf %246 : vector<8x128xf32>
    %248 = math.exp %247 : vector<8x128xf32>
    %cst_61 = arith.constant 1.000000e+00 : f32
    %249 = vector.broadcast %cst_61 : f32 to vector<8x128xf32>
    %250 = arith.addf %249, %248 : vector<8x128xf32>
    %251 = arith.divf %249, %250 : vector<8x128xf32>
    %252 = vector.extract_strided_slice %245 {offsets = [0, 128], sizes = [8, 128], strides = [1, 1]} : vector<8x512xf32> to vector<8x128xf32>
    %253 = arith.negf %252 : vector<8x128xf32>
    %254 = math.exp %253 : vector<8x128xf32>
    %cst_62 = arith.constant 1.000000e+00 : f32
    %255 = vector.broadcast %cst_62 : f32 to vector<8x128xf32>
    %256 = arith.addf %255, %254 : vector<8x128xf32>
    %257 = arith.divf %255, %256 : vector<8x128xf32>
    %258 = vector.extract_strided_slice %245 {offsets = [0, 256], sizes = [8, 128], strides = [1, 1]} : vector<8x512xf32> to vector<8x128xf32>
    %259 = math.tanh %258 : vector<8x128xf32>
    %260 = vector.extract_strided_slice %245 {offsets = [0, 384], sizes = [8, 128], strides = [1, 1]} : vector<8x512xf32> to vector<8x128xf32>
    %261 = arith.negf %260 : vector<8x128xf32>
    %262 = math.exp %261 : vector<8x128xf32>
    %cst_63 = arith.constant 1.000000e+00 : f32
    %263 = vector.broadcast %cst_63 : f32 to vector<8x128xf32>
    %264 = arith.addf %263, %262 : vector<8x128xf32>
    %265 = arith.divf %263, %264 : vector<8x128xf32>
    %266 = arith.mulf %257, %234 : vector<8x128xf32>
    %267 = arith.mulf %251, %259 : vector<8x128xf32>
    %268 = arith.addf %266, %267 : vector<8x128xf32>
    %269 = math.tanh %268 : vector<8x128xf32>
    %270 = arith.mulf %265, %269 : vector<8x128xf32>
    %271 = arith.index_cast %c7_i32 : i32 to index
    %c0_64 = arith.constant 0 : index
    %c0_65 = arith.constant 0 : index
    %272 = vector.load %arg3[%271, %c0_64, %c0_65] : memref<8x8x128xf32, #tpu.memory_space<vmem>>, vector<1x8x128xf32>
    %273 = vector.shape_cast %272 : vector<1x8x128xf32> to vector<8x128xf32>
    %274 = vector.shape_cast %270 : vector<8x128xf32> to vector<1x8x128xf32>
    tpu.vector_store %arg3[%271, %c0_64, %c0_65], %274 {strides = array<i32>} : memref<8x8x128xf32, #tpu.memory_space<vmem>>, vector<1x8x128xf32>,
    %c8_i32 = arith.constant 8 : i32
    return
  }
  func.func @transform_0(%arg0: i32) -> (i32, i32, i32) {
    %c0_i32 = arith.constant 0 : i32
    %c0_i32_0 = arith.constant 0 : i32
    %c0_i32_1 = arith.constant 0 : i32
    %c0_i32_2 = arith.constant 0 : i32
    return %c0_i32, %c0_i32_0, %c0_i32_1 : i32, i32, i32
  }
  func.func @transform_1(%arg0: i32) -> (i32, i32) {
    %c0_i32 = arith.constant 0 : i32
    %c0_i32_0 = arith.constant 0 : i32
    %c0_i32_1 = arith.constant 0 : i32
    return %c0_i32, %c0_i32_0 : i32, i32
  }
  func.func @transform_2(%arg0: i32) -> (i32, i32, i32) {
    %c0_i32 = arith.constant 0 : i32
    %c0_i32_0 = arith.constant 0 : i32
    %c0_i32_1 = arith.constant 0 : i32
    %c0_i32_2 = arith.constant 0 : i32
    return %c0_i32, %c0_i32_0, %c0_i32_1 : i32, i32, i32
  }
}

module attributes {stable_mosaic.version = 11 : i64} {
  func.func @_dense_kernel(%arg0: i32, %arg1: memref<64x128xf32, #tpu.memory_space<vmem>>, %arg2: memref<128x128xf32, #tpu.memory_space<vmem>>, %arg3: memref<1x128xf32, #tpu.memory_space<vmem>>, %arg4: memref<64x128xf32, #tpu.memory_space<vmem>>) attributes {dimension_semantics = [#tpu.dimension_semantics<arbitrary>], iteration_bounds = array<i64: 1>, scalar_prefetch = 0 : i64, scratch_operands = 0 : i64, tpu.core_type = #tpu.core_type<tc>, window_params = [{pipeline_mode = #tpu.pipeline_mode<synchronous>, transform_indices = @transform_0, window_bounds = array<i64: 64, 128>}, {pipeline_mode = #tpu.pipeline_mode<synchronous>, transform_indices = @transform_1, window_bounds = array<i64: 128, 128>}, {pipeline_mode = #tpu.pipeline_mode<synchronous>, transform_indices = @transform_2, window_bounds = array<i64: 1, 128>}, {pipeline_mode = #tpu.pipeline_mode<synchronous>, transform_indices = @transform_3, window_bounds = array<i64: 64, 128>}]} {
    %c0 = arith.constant 0 : index
    %c0_0 = arith.constant 0 : index
    %0 = vector.load %arg1[%c0, %c0_0] : memref<64x128xf32, #tpu.memory_space<vmem>>, vector<64x128xf32>
    %c0_1 = arith.constant 0 : index
    %c0_2 = arith.constant 0 : index
    %1 = vector.load %arg2[%c0_1, %c0_2] : memref<128x128xf32, #tpu.memory_space<vmem>>, vector<128x128xf32>
    %cst = arith.constant dense<0.000000e+00> : vector<64x128xf32>
    %2 = tpu.matmul %0, %1, %cst {dimension_numbers = #tpu.dot_dimension_numbers<[1], [0], [0], [1], [0, 0, 1, 1], [], []>} : vector<64x128xf32>, vector<128x128xf32>, vector<64x128xf32> -> vector<64x128xf32>
    %c0_3 = arith.constant 0 : index
    %c0_4 = arith.constant 0 : index
    %3 = vector.load %arg3[%c0_3, %c0_4] : memref<1x128xf32, #tpu.memory_space<vmem>>, vector<1x128xf32>
    %4 = vector.broadcast %3 : vector<1x128xf32> to vector<64x128xf32>
    %5 = arith.addf %2, %4 : vector<64x128xf32>
    %c0_5 = arith.constant 0 : index
    %c0_6 = arith.constant 0 : index
    %6 = vector.load %arg4[%c0_5, %c0_6] : memref<64x128xf32, #tpu.memory_space<vmem>>, vector<64x128xf32>
    tpu.vector_store %arg4[%c0_5, %c0_6], %5 {strides = array<i32>} : memref<64x128xf32, #tpu.memory_space<vmem>>, vector<64x128xf32>,
    return
  }
  func.func @transform_0(%arg0: i32) -> (i32, i32) {
    %c0_i32 = arith.constant 0 : i32
    %c0_i32_0 = arith.constant 0 : i32
    %c0_i32_1 = arith.constant 0 : i32
    return %c0_i32, %c0_i32_0 : i32, i32
  }
  func.func @transform_1(%arg0: i32) -> (i32, i32) {
    %c0_i32 = arith.constant 0 : i32
    %c0_i32_0 = arith.constant 0 : i32
    %c0_i32_1 = arith.constant 0 : i32
    return %c0_i32, %c0_i32_0 : i32, i32
  }
  func.func @transform_2(%arg0: i32) -> (i32, i32) {
    %c0_i32 = arith.constant 0 : i32
    %c0_i32_0 = arith.constant 0 : i32
    %c0_i32_1 = arith.constant 0 : i32
    return %c0_i32, %c0_i32_0 : i32, i32
  }
  func.func @transform_3(%arg0: i32) -> (i32, i32) {
    %c0_i32 = arith.constant 0 : i32
    %c0_i32_0 = arith.constant 0 : i32
    %c0_i32_1 = arith.constant 0 : i32
    return %c0_i32, %c0_i32_0 : i32, i32
  }
}

</mosaic_0001>

<bundles_post_ra>
// kernel: decoder_forward.5
= control target key start
LH: loop header
LB: loop body
LE: loop exit
PB: predicated region body
PF: predicated region fallthrough
CT: control target
= control target key end

     0   :  { %s289_s0 = inlined_call_operand.vmem [shape: f32[64,128], index: 0, kind: input, shape index: {}]   ;;  %s290_s1 = inlined_call_operand.vmem [shape: f32[128,128], index: 1, kind: input, shape index: {}]   ;;  %s291_s2 = inlined_call_operand.vmem [shape: f32[1,128], index: 2, kind: input, shape index: {}]   ;;  %s292_s3 = inlined_call_operand.hbm [shape: f32[64,128], index: 3, kind: output, shape index: {}]  }
   0x1   :  { %v38_v0 = vld [vmem:[%s290_s1 + $0x78] sm:$0xff]  ;;  %v37_v1 = vld [vmem:[%s290_s1 + $0x70] sm:$0xff]  ;;  %v36_v2 = vld [vmem:[%s290_s1 + $0x68] sm:$0xff] }
   0x2   :  { %111 = vmatpush.msra.mxu2 %v38_v0  ;;  %112 = vmatpush.msra.mxu3 %v38_v0  ;;  %v35_v3 = vld [vmem:[%s290_s1 + $0x60] sm:$0xff]  ;;  %v34_v4 = vld [vmem:[%s290_s1 + $0x58] sm:$0xff] }
   0x3   :  { %43 = vmatpush.msra.mxu0 %v38_v0  ;;  %110 = vmatpush.msra.mxu1 %v38_v0 }
   0x4   :  { %114 = vmatpush.msra.mxu2 %v37_v1  ;;  %115 = vmatpush.msra.mxu3 %v37_v1 }
   0x5   :  { %44 = vmatpush.msra.mxu0 %v37_v1  ;;  %113 = vmatpush.msra.mxu1 %v37_v1 }
   0x6   :  { %117 = vmatpush.msra.mxu2 %v36_v2  ;;  %118 = vmatpush.msra.mxu3 %v36_v2 }
   0x7   :  { %45 = vmatpush.msra.mxu0 %v36_v2  ;;  %116 = vmatpush.msra.mxu1 %v36_v2 }
   0x8   :  { %120 = vmatpush.msra.mxu2 %v35_v3  ;;  %121 = vmatpush.msra.mxu3 %v35_v3 }
   0x9   :  { %8 = vsyncpa [#allocation3], 0  ;;  %v33_v5 = vld [vmem:[%s290_s1 + $0x50] sm:$0xff]  ;;  %46 = vmatpush.msra.mxu0 %v35_v3  ;;  %119 = vmatpush.msra.mxu1 %v35_v3  ;;  %v32_v6 = vld [vmem:[%s290_s1 + $0x48] sm:$0xff]  ;;  %s98_s9 = sshll.u32 %s292_s3, 4  ;;  %s189_s10 = smov 128   ;;  %s99_s9 = int_to_ptr.hbm [resolvable:$true] %s98_s9 }
   0xa   :  { %123 = vmatpush.msra.mxu2 %v34_v4  ;;  %124 = vmatpush.msra.mxu3 %v34_v4  ;;  %v31_v7 = vld [vmem:[%s290_s1 + $0x40] sm:$0xff]  ;;  %v30_v8 = vld [vmem:[%s290_s1 + $0x38] sm:$0xff]  ;;  %v29_v9 = vld [vmem:[%s290_s1 + $0x30] sm:$0xff]  ;;  %s190_s11 = smov 8  }
   0xb   :  { %47 = vmatpush.msra.mxu0 %v34_v4  ;;  %122 = vmatpush.msra.mxu1 %v34_v4  ;;  %v28_v10 = vld [vmem:[%s290_s1 + $0x28] sm:$0xff]  ;;  %v27_v11 = vld [vmem:[%s290_s1 + $0x20] sm:$0xff]  ;;  %v26_v12 = vld [vmem:[%s290_s1 + $0x18] sm:$0xff] }
   0xc   :  { %126 = vmatpush.msra.mxu2 %v33_v5  ;;  %127 = vmatpush.msra.mxu3 %v33_v5  ;;  %v25_v13 = vld [vmem:[%s290_s1 + $0x10] sm:$0xff]  ;;  %v24_v14 = vld [vmem:[%s290_s1 + $0x8] sm:$0xff]  ;;  %v23_v15 = vld [vmem:[%s290_s1] sm:$0xff] }
   0xd   :  { %48 = vmatpush.msra.mxu0 %v33_v5  ;;  %125 = vmatpush.msra.mxu1 %v33_v5  ;;  %v19_v16 = vld [vmem:[%s289_s0 + $0x20] sm:$0xff]  ;;  %v21_v17 = vld [vmem:[%s289_s0 + $0x30] sm:$0xff]  ;;  %v20_v20 = vld [vmem:[%s289_s0 + $0x28] sm:$0xff] }
   0xe   :  { %129 = vmatpush.msra.mxu2 %v32_v6  ;;  %130 = vmatpush.msra.mxu3 %v32_v6  ;;  %v15_v18 = vld [vmem:[%s289_s0] sm:$0xff]  ;;  %v17_v19 = vld [vmem:[%s289_s0 + $0x10] sm:$0xff]  ;;  %v22_v21 = vld [vmem:[%s289_s0 + $0x38] sm:$0xff] }
   0xf   :  { %49 = vmatpush.msra.mxu0 %v32_v6  ;;  %128 = vmatpush.msra.mxu1 %v32_v6  ;;  %v16_v22 = vld [vmem:[%s289_s0 + $0x8] sm:$0xff]  ;;  %v18_v23 = vld [vmem:[%s289_s0 + $0x18] sm:$0xff]  ;;  %v161_v24 = vld [vmem:[%s291_s2] ss:$0 sm:$0xff]  ;;  %s188_s0 = smov [#allocation2]  }
  0x10   :  { %132 = vmatpush.msra.mxu2 %v31_v7  ;;  %133 = vmatpush.msra.mxu3 %v31_v7  ;;  %s96_s7 = sshll.u32 %s188_s0, 4  ;;  %s97_s7 = int_to_ptr.vmem [resolvable:$true] %s96_s7 }
  0x11   :  { %50 = vmatpush.msra.mxu0 %v31_v7  ;;  %131 = vmatpush.msra.mxu1 %v31_v7 }
  0x12   :  { %135 = vmatpush.msra.mxu2 %v30_v8  ;;  %136 = vmatpush.msra.mxu3 %v30_v8 }
  0x13   :  { %51 = vmatpush.msra.mxu0 %v30_v8  ;;  %134 = vmatpush.msra.mxu1 %v30_v8 }
  0x14   :  { %138 = vmatpush.msra.mxu2 %v29_v9  ;;  %139 = vmatpush.msra.mxu3 %v29_v9 }
  0x15   :  { %52 = vmatpush.msra.mxu0 %v29_v9  ;;  %137 = vmatpush.msra.mxu1 %v29_v9 }
  0x16   :  { %141 = vmatpush.msra.mxu2 %v28_v10  ;;  %142 = vmatpush.msra.mxu3 %v28_v10 }
  0x17   :  { %53 = vmatpush.msra.mxu0 %v28_v10  ;;  %140 = vmatpush.msra.mxu1 %v28_v10 }
  0x18   :  { %144 = vmatpush.msra.mxu2 %v27_v11  ;;  %145 = vmatpush.msra.mxu3 %v27_v11 }
  0x19   :  { %54 = vmatpush.msra.mxu0 %v27_v11  ;;  %143 = vmatpush.msra.mxu1 %v27_v11 }
  0x1a   :  { %147 = vmatpush.msra.mxu2 %v26_v12  ;;  %148 = vmatpush.msra.mxu3 %v26_v12 }
  0x1b   :  { %55 = vmatpush.msra.mxu0 %v26_v12  ;;  %146 = vmatpush.msra.mxu1 %v26_v12 }
  0x1c   :  { %150 = vmatpush.msra.mxu2 %v25_v13  ;;  %151 = vmatpush.msra.mxu3 %v25_v13 }
  0x1d   :  { %56 = vmatpush.msra.mxu0 %v25_v13  ;;  %149 = vmatpush.msra.mxu1 %v25_v13 }
  0x1e   :  { %153 = vmatpush.msra.mxu2 %v24_v14  ;;  %154 = vmatpush.msra.mxu3 %v24_v14 }
  0x1f   :  { %57 = vmatpush.msra.mxu0 %v24_v14  ;;  %152 = vmatpush.msra.mxu1 %v24_v14 }
  0x20   :  { %156 = vmatpush.msra.mxu2 %v23_v15  ;;  %157 = vmatpush.msra.mxu3 %v23_v15 }
  0x21   :  { %71 = vmatmul.f32.vlgmr.msra.gmra.mxu2 %v19_v16  ;;  %77 = vmatmul.f32.vlgmr.msra.gmra.mxu3 %v21_v17 }
  0x22   :  { %58 = vmatpush.msra.mxu0 %v23_v15  ;;  %155 = vmatpush.msra.mxu1 %v23_v15 }
  0x23   :  { %59 = vmatmul.f32.vlgmr.msra.gmra.mxu0 %v15_v18  ;;  %65 = vmatmul.f32.vlgmr.msra.gmra.mxu1 %v17_v19 }
  0x29   :  { %74 = vmatmul.f32.gmra.mxu2 %v20_v20  ;;  %80 = vmatmul.f32.gmra.mxu3 %v22_v21 }
  0x2b   :  { %62 = vmatmul.f32.gmra.mxu0 %v16_v22  ;;  %68 = vmatmul.f32.gmra.mxu1 %v18_v23 }
  0xa0   :  { %v60_v25 = vpop.f32.mrf.mxu0  ;;  %v66_v26 = vpop.f32.mrf.mxu1 }
  0xa1   :  { %v61_v27 = vadd.f32 %v161_v24, %v60_v25  ;;  %v67_v28 = vadd.f32 %v161_v24, %v66_v26 }
  0xa3   :  { %84 = vst [vmem:[#allocation2] sm:$0xff] %v61_v27 }
  0xa4   :  { %86 = vst [vmem:[#allocation2 + $0x10] sm:$0xff] %v67_v28  ;;  %v72_v29 = vpop.f32.mrf.mxu2  ;;  %v78_v30 = vpop.f32.mrf.mxu3 }
  0xa5   :  { %v73_v31 = vadd.f32 %v161_v24, %v72_v29  ;;  %v79_v32 = vadd.f32 %v161_v24, %v78_v30 }
  0xa7   :  { %88 = vst [vmem:[#allocation2 + $0x20] sm:$0xff] %v73_v31 }
  0xa8   :  { %90 = vst [vmem:[#allocation2 + $0x30] sm:$0xff] %v79_v32  ;;  %v63_v33 = vpop.f32.mrf.mxu0  ;;  %v69_v34 = vpop.f32.mrf.mxu1 }
  0xa9   :  { %v64_v35 = vadd.f32 %v161_v24, %v63_v33  ;;  %v70_v36 = vadd.f32 %v161_v24, %v69_v34 }
  0xab   :  { %85 = vst [vmem:[#allocation2 + $0x8] sm:$0xff] %v64_v35 }
  0xac   :  { %87 = vst [vmem:[#allocation2 + $0x18] sm:$0xff] %v70_v36  ;;  %v75_v37 = vpop.f32.mrf.mxu2  ;;  %v81_v38 = vpop.f32.mrf.mxu3 }
  0xad   :  { %v76_v39 = vadd.f32 %v161_v24, %v75_v37  ;;  %v82_v40 = vadd.f32 %v161_v24, %v81_v38 }
  0xaf   :  { %89 = vst [vmem:[#allocation2 + $0x28] sm:$0xff] %v76_v39 }
  0xb0   :  { %91 = vst [vmem:[#allocation2 + $0x38] sm:$0xff] %v82_v40 }
  0xb1   :  { %104 = dma.vmem_to_hbm [thread:$0]  %s97_s7, 1024, %s99_s9, [#allocation3], %s189_s10, %s189_s10, %s190_s11  }
  0xb2   :  { %186 = dma.done.wait [#allocation3], 1024  }
  0xb3   :  { %187 = vsyncadd [#allocation3], 4294966272 }
  0xb4   :  { %109 = vsyncpa [#allocation3], 1 }

// kernel: decoder_forward.3
= control target key start
LH: loop header
LB: loop body
LE: loop exit
PB: predicated region body
PF: predicated region fallthrough
CT: control target
= control target key end

     0   :  { %vm48_vm0 = vcmask 261120   ;;  %s568_s1 = inlined_call_operand.vmem [shape: f32[32,512], index: 1, kind: input, shape index: {}]   ;;  %s569_s0 = inlined_call_operand.vmem [shape: f32[64,32], index: 0, kind: input, shape index: {}]   ;;  %s570_s2 = inlined_call_operand.vmem [shape: f32[1,512], index: 2, kind: input, shape index: {}]   ;;  %s571_s3 = inlined_call_operand.vmem [shape: f32[64,512], index: 3, kind: output, shape index: {}]  }
   0x1   :  { %v36_v0 = vld [vmem:[%s568_s1 + $0x70] sm:$0xff]  ;;  %v37_v1 = vld [vmem:[%s568_s1 + $0x78] sm:$0xff]  ;;  %v34_v6 = vld [vmem:[%s568_s1 + $0x60] sm:$0xff] }
   0x2   :  { %v32_v2 = vld [vmem:[%s568_s1 + $0x50] sm:$0xff]  ;;  %167 = vmatpush.msra.mxu2 %v36_v0  ;;  %208 = vmatpush.msra.mxu3 %v37_v1  ;;  %v33_v3 = vld [vmem:[%s568_s1 + $0x58] sm:$0xff]  ;;  %v35_v7 = vld [vmem:[%s568_s1 + $0x68] sm:$0xff] }
   0x3   :  { %v28_v4 = vld [vmem:[%s568_s1 + $0x30] sm:$0xff]  ;;  %v29_v5 = vld [vmem:[%s568_s1 + $0x38] sm:$0xff]  ;;  %v30_v8 = vld [vmem:[%s568_s1 + $0x40] sm:$0xff]  ;;  %85 = vmatpush.msra.mxu0 %v34_v6  ;;  %126 = vmatpush.msra.mxu1 %v35_v7 }
   0x4   :  { %168 = vmatpush.msra.mxu2 %v32_v2  ;;  %209 = vmatpush.msra.mxu3 %v33_v3  ;;  %v24_v9 = vld [vmem:[%s568_s1 + $0x10] sm:$0xff]  ;;  %v25_v10 = vld [vmem:[%s568_s1 + $0x18] sm:$0xff]  ;;  %v31_v11 = vld [vmem:[%s568_s1 + $0x48] sm:$0xff] }
   0x5   :  { %v14_v12 = vld [vmem:[%s569_s0] sm:$0xff]  ;;  %86 = vmatpush.msra.mxu0 %v30_v8  ;;  %127 = vmatpush.msra.mxu1 %v31_v11  ;;  %v27_v14 = vld [vmem:[%s568_s1 + $0x28] sm:$0xff]  ;;  %v16_v18 = vld [vmem:[%s569_s0 + $0x10] sm:$0xff] }
   0x6   :  { %169 = vmatpush.msra.mxu2 %v28_v4  ;;  %210 = vmatpush.msra.mxu3 %v29_v5  ;;  %v26_v13 = vld [vmem:[%s568_s1 + $0x20] sm:$0xff]  ;;  %v23_v16 = vld [vmem:[%s568_s1 + $0x8] sm:$0xff]  ;;  %v17_v19 = vld [vmem:[%s569_s0 + $0x18] sm:$0xff] }
   0x7   :  { %v22_v15 = vld [vmem:[%s568_s1] sm:$0xff]  ;;  %87 = vmatpush.msra.mxu0 %v26_v13  ;;  %128 = vmatpush.msra.mxu1 %v27_v14  ;;  %v15_v17 = vld [vmem:[%s569_s0 + $0x8] sm:$0xff]  ;;  %v20_v22 = vld [vmem:[%s569_s0 + $0x30] sm:$0xff] }
   0x8   :  { %170 = vmatpush.msra.mxu2 %v24_v9  ;;  %211 = vmatpush.msra.mxu3 %v25_v10  ;;  %v18_v20 = vld [vmem:[%s569_s0 + $0x20] sm:$0xff]  ;;  %v19_v21 = vld [vmem:[%s569_s0 + $0x28] sm:$0xff]  ;;  %v21_v23 = vld [vmem:[%s569_s0 + $0x38] sm:$0xff] }
   0x9   :  { %289 = vmatmul.msk.f32.vlgmr.msra.gmra.mxu2 %vm48_vm0, %v14_v12  ;;  %297 = vmatmul.msk.f32.vlgmr.msra.gmra.mxu3 %vm48_vm0, %v14_v12  ;;  %v38_v24 = vld [vmem:[%s570_s2] sm:$0xf] }
   0xa   :  { %88 = vmatpush.msra.mxu0 %v22_v15  ;;  %129 = vmatpush.msra.mxu1 %v23_v16  ;;  %v432_v25 = vperm.slane %v38_v24, 0  ;;  %v434_v26 = vperm.slane %v38_v24, 1  ;;  %v436_v27 = vperm.slane %v38_v24, 2  ;;  %v438_v28 = vperm.slane %v38_v24, 3 }
   0xb   :  { %273 = vmatmul.msk.f32.vlgmr.msra.gmra.mxu0 %vm48_vm0, %v14_v12  ;;  %281 = vmatmul.msk.f32.vlgmr.msra.gmra.mxu1 %vm48_vm0, %v14_v12 }
  0x11   :  { %290 = vmatmul.msk.f32.gmra.mxu2 %vm48_vm0, %v15_v17  ;;  %298 = vmatmul.msk.f32.gmra.mxu3 %vm48_vm0, %v15_v17 }
  0x13   :  { %274 = vmatmul.msk.f32.gmra.mxu0 %vm48_vm0, %v15_v17  ;;  %282 = vmatmul.msk.f32.gmra.mxu1 %vm48_vm0, %v15_v17 }
  0x19   :  { %291 = vmatmul.msk.f32.gmra.mxu2 %vm48_vm0, %v16_v18  ;;  %299 = vmatmul.msk.f32.gmra.mxu3 %vm48_vm0, %v16_v18 }
  0x1b   :  { %275 = vmatmul.msk.f32.gmra.mxu0 %vm48_vm0, %v16_v18  ;;  %283 = vmatmul.msk.f32.gmra.mxu1 %vm48_vm0, %v16_v18 }
  0x21   :  { %292 = vmatmul.msk.f32.gmra.mxu2 %vm48_vm0, %v17_v19  ;;  %300 = vmatmul.msk.f32.gmra.mxu3 %vm48_vm0, %v17_v19 }
  0x23   :  { %276 = vmatmul.msk.f32.gmra.mxu0 %vm48_vm0, %v17_v19  ;;  %284 = vmatmul.msk.f32.gmra.mxu1 %vm48_vm0, %v17_v19 }
  0x29   :  { %293 = vmatmul.msk.f32.gmra.mxu2 %vm48_vm0, %v18_v20  ;;  %301 = vmatmul.msk.f32.gmra.mxu3 %vm48_vm0, %v18_v20 }
  0x2b   :  { %277 = vmatmul.msk.f32.gmra.mxu0 %vm48_vm0, %v18_v20  ;;  %285 = vmatmul.msk.f32.gmra.mxu1 %vm48_vm0, %v18_v20 }
  0x31   :  { %294 = vmatmul.msk.f32.gmra.mxu2 %vm48_vm0, %v19_v21  ;;  %302 = vmatmul.msk.f32.gmra.mxu3 %vm48_vm0, %v19_v21 }
  0x33   :  { %278 = vmatmul.msk.f32.gmra.mxu0 %vm48_vm0, %v19_v21  ;;  %286 = vmatmul.msk.f32.gmra.mxu1 %vm48_vm0, %v19_v21 }
  0x39   :  { %295 = vmatmul.msk.f32.gmra.mxu2 %vm48_vm0, %v20_v22  ;;  %303 = vmatmul.msk.f32.gmra.mxu3 %vm48_vm0, %v20_v22 }
  0x3b   :  { %279 = vmatmul.msk.f32.gmra.mxu0 %vm48_vm0, %v20_v22  ;;  %287 = vmatmul.msk.f32.gmra.mxu1 %vm48_vm0, %v20_v22 }
  0x41   :  { %296 = vmatmul.msk.f32.gmra.mxu2 %vm48_vm0, %v21_v23  ;;  %304 = vmatmul.msk.f32.gmra.mxu3 %vm48_vm0, %v21_v23 }
  0x43   :  { %280 = vmatmul.msk.f32.gmra.mxu0 %vm48_vm0, %v21_v23  ;;  %288 = vmatmul.msk.f32.gmra.mxu1 %vm48_vm0, %v21_v23 }
  0x88   :  { %v90_v29 = vpop.f32.mrf.mxu0  ;;  %v131_v30 = vpop.f32.mrf.mxu1 }
  0x89   :  { %v91_v31 = vadd.f32 %v90_v29, %v432_v25  ;;  %v132_v32 = vadd.f32 %v131_v30, %v434_v26 }
  0x8b   :  { %237 = vst [vmem:[%s571_s3] sm:$0xff] %v91_v31 }
  0x8c   :  { %v172_v33 = vpop.f32.mrf.mxu2  ;;  %v213_v34 = vpop.f32.mrf.mxu3  ;;  %238 = vst [vmem:[%s571_s3 + $0x8] sm:$0xff] %v132_v32 }
  0x8d   :  { %v173_v35 = vadd.f32 %v172_v33, %v436_v27  ;;  %v214_v36 = vadd.f32 %v213_v34, %v438_v28 }
  0x8f   :  { %239 = vst [vmem:[%s571_s3 + $0x10] sm:$0xff] %v173_v35 }
  0x90   :  { %240 = vst [vmem:[%s571_s3 + $0x18] sm:$0xff] %v214_v36  ;;  %v93_v37 = vpop.f32.mrf.mxu0  ;;  %v134_v38 = vpop.f32.mrf.mxu1 }
  0x91   :  { %v94_v39 = vadd.f32 %v93_v37, %v432_v25  ;;  %v135_v40 = vadd.f32 %v134_v38, %v434_v26 }
  0x93   :  { %241 = vst [vmem:[%s571_s3 + $0x20] sm:$0xff] %v94_v39 }
  0x94   :  { %v175_v41 = vpop.f32.mrf.mxu2  ;;  %v216_v42 = vpop.f32.mrf.mxu3  ;;  %242 = vst [vmem:[%s571_s3 + $0x28] sm:$0xff] %v135_v40 }
  0x95   :  { %v176_v43 = vadd.f32 %v175_v41, %v436_v27  ;;  %v217_v44 = vadd.f32 %v216_v42, %v438_v28 }
  0x97   :  { %243 = vst [vmem:[%s571_s3 + $0x30] sm:$0xff] %v176_v43 }
  0x98   :  { %244 = vst [vmem:[%s571_s3 + $0x38] sm:$0xff] %v217_v44  ;;  %v96_v45 = vpop.f32.mrf.mxu0  ;;  %v137_v46 = vpop.f32.mrf.mxu1 }
  0x99   :  { %v97_v47 = vadd.f32 %v96_v45, %v432_v25  ;;  %v138_v48 = vadd.f32 %v137_v46, %v434_v26 }
  0x9b   :  { %245 = vst [vmem:[%s571_s3 + $0x40] sm:$0xff] %v97_v47 }
  0x9c   :  { %v178_v49 = vpop.f32.mrf.mxu2  ;;  %v219_v50 = vpop.f32.mrf.mxu3  ;;  %246 = vst [vmem:[%s571_s3 + $0x48] sm:$0xff] %v138_v48 }
  0x9d   :  { %v179_v51 = vadd.f32 %v178_v49, %v436_v27  ;;  %v220_v52 = vadd.f32 %v219_v50, %v438_v28 }
  0x9f   :  { %247 = vst [vmem:[%s571_s3 + $0x50] sm:$0xff] %v179_v51 }
  0xa0   :  { %248 = vst [vmem:[%s571_s3 + $0x58] sm:$0xff] %v220_v52  ;;  %v99_v53 = vpop.f32.mrf.mxu0  ;;  %v140_v54 = vpop.f32.mrf.mxu1 }
  0xa1   :  { %v100_v55 = vadd.f32 %v99_v53, %v432_v25  ;;  %v141_v56 = vadd.f32 %v140_v54, %v434_v26 }
  0xa3   :  { %249 = vst [vmem:[%s571_s3 + $0x60] sm:$0xff] %v100_v55 }
  0xa4   :  { %v181_v57 = vpop.f32.mrf.mxu2  ;;  %v222_v58 = vpop.f32.mrf.mxu3  ;;  %250 = vst [vmem:[%s571_s3 + $0x68] sm:$0xff] %v141_v56 }
  0xa5   :  { %v182_v59 = vadd.f32 %v181_v57, %v436_v27  ;;  %v223_v60 = vadd.f32 %v222_v58, %v438_v28 }
  0xa7   :  { %251 = vst [vmem:[%s571_s3 + $0x70] sm:$0xff] %v182_v59 }
  0xa8   :  { %252 = vst [vmem:[%s571_s3 + $0x78] sm:$0xff] %v223_v60  ;;  %v102_v61 = vpop.f32.mrf.mxu0  ;;  %v143_v62 = vpop.f32.mrf.mxu1 }
  0xa9   :  { %v103_v63 = vadd.f32 %v102_v61, %v432_v25  ;;  %v144_v0 = vadd.f32 %v143_v62, %v434_v26 }
  0xab   :  { %253 = vst [vmem:[%s571_s3 + $0x80] sm:$0xff] %v103_v63 }
  0xac   :  { %v184_v1 = vpop.f32.mrf.mxu2  ;;  %v225_v2 = vpop.f32.mrf.mxu3  ;;  %254 = vst [vmem:[%s571_s3 + $0x88] sm:$0xff] %v144_v0 }
  0xad   :  { %v185_v3 = vadd.f32 %v184_v1, %v436_v27  ;;  %v226_v4 = vadd.f32 %v225_v2, %v438_v28 }
  0xaf   :  { %255 = vst [vmem:[%s571_s3 + $0x90] sm:$0xff] %v185_v3 }
  0xb0   :  { %256 = vst [vmem:[%s571_s3 + $0x98] sm:$0xff] %v226_v4  ;;  %v105_v5 = vpop.f32.mrf.mxu0  ;;  %v146_v6 = vpop.f32.mrf.mxu1 }
  0xb1   :  { %v106_v7 = vadd.f32 %v105_v5, %v432_v25  ;;  %v147_v8 = vadd.f32 %v146_v6, %v434_v26 }
  0xb3   :  { %257 = vst [vmem:[%s571_s3 + $0xa0] sm:$0xff] %v106_v7 }
  0xb4   :  { %v187_v9 = vpop.f32.mrf.mxu2  ;;  %v228_v10 = vpop.f32.mrf.mxu3  ;;  %258 = vst [vmem:[%s571_s3 + $0xa8] sm:$0xff] %v147_v8 }
  0xb5   :  { %v188_v11 = vadd.f32 %v187_v9, %v436_v27  ;;  %v229_v12 = vadd.f32 %v228_v10, %v438_v28 }
  0xb7   :  { %259 = vst [vmem:[%s571_s3 + $0xb0] sm:$0xff] %v188_v11 }
  0xb8   :  { %260 = vst [vmem:[%s571_s3 + $0xb8] sm:$0xff] %v229_v12  ;;  %v108_v13 = vpop.f32.mrf.mxu0  ;;  %v149_v14 = vpop.f32.mrf.mxu1 }
  0xb9   :  { %v109_v15 = vadd.f32 %v108_v13, %v432_v25  ;;  %v150_v16 = vadd.f32 %v149_v14, %v434_v26 }
  0xbb   :  { %261 = vst [vmem:[%s571_s3 + $0xc0] sm:$0xff] %v109_v15 }
  0xbc   :  { %v190_v17 = vpop.f32.mrf.mxu2  ;;  %v231_v18 = vpop.f32.mrf.mxu3  ;;  %262 = vst [vmem:[%s571_s3 + $0xc8] sm:$0xff] %v150_v16 }
  0xbd   :  { %v191_v19 = vadd.f32 %v190_v17, %v436_v27  ;;  %v232_v20 = vadd.f32 %v231_v18, %v438_v28 }
  0xbf   :  { %263 = vst [vmem:[%s571_s3 + $0xd0] sm:$0xff] %v191_v19 }
  0xc0   :  { %264 = vst [vmem:[%s571_s3 + $0xd8] sm:$0xff] %v232_v20  ;;  %v111_v21 = vpop.f32.mrf.mxu0  ;;  %v152_v22 = vpop.f32.mrf.mxu1 }
  0xc1   :  { %v112_v23 = vadd.f32 %v111_v21, %v432_v25  ;;  %v153_v24 = vadd.f32 %v152_v22, %v434_v26 }
  0xc3   :  { %265 = vst [vmem:[%s571_s3 + $0xe0] sm:$0xff] %v112_v23 }
  0xc4   :  { %v193_v29 = vpop.f32.mrf.mxu2  ;;  %v234_v30 = vpop.f32.mrf.mxu3  ;;  %266 = vst [vmem:[%s571_s3 + $0xe8] sm:$0xff] %v153_v24 }
  0xc5   :  { %v194_v31 = vadd.f32 %v193_v29, %v436_v27  ;;  %v235_v32 = vadd.f32 %v234_v30, %v438_v28 }
  0xc7   :  { %267 = vst [vmem:[%s571_s3 + $0xf0] sm:$0xff] %v194_v31 }
  0xc8   :  { %268 = vst [vmem:[%s571_s3 + $0xf8] sm:$0xff] %v235_v32 }

// kernel: decoder_forward.4
= control target key start
LH: loop header
LB: loop body
LE: loop exit
PB: predicated region body
PF: predicated region fallthrough
CT: control target
= control target key end

     0   :  { %v1561_v60 = vmov 0.0   ;;  %s2877_s1 = inlined_call_operand.vmem [shape: f32[128,512], index: 1, kind: input, shape index: {}]   ;;  %s2878_s0 = inlined_call_operand.vmem [shape: f32[8,8,512], index: 0, kind: input, shape index: {}]   ;;  %s2879_s2 = inlined_call_operand.vmem [shape: f32[8,8,128], index: 2, kind: output, shape index: {}]  }
   0x1   :  { %v1580_v0 = vld [vmem:[%s2877_s1 + $0x1e0] sm:$0xff]  ;;  %v1585_v1 = vld [vmem:[%s2877_s1 + $0x1e8] sm:$0xff]  ;;  %v1590_v2 = vld [vmem:[%s2877_s1 + $0x1f8] sm:$0xff] }
   0x2   :  { %2986 = vst [vmem:[#allocation2_spill] sm:$0xff] %v1590_v2  ;;  %79 = vmatpush.msra.mxu0 %v1580_v0  ;;  %99 = vmatpush.msra.mxu1 %v1585_v1  ;;  %v1597_v3 = vld [vmem:[%s2877_s1 + $0x1c0] sm:$0xff]  ;;  %v1602_v4 = vld [vmem:[%s2877_s1 + $0x1c8] sm:$0xff]  ;;  %v1607_v5 = vld [vmem:[%s2877_s1 + $0x1d8] sm:$0xff] }
   0x3   :  { %139 = vmatpush.msra.mxu3 %v1590_v2  ;;  %v1613_v6 = vld [vmem:[%s2877_s1 + $0x1a0] sm:$0xff]  ;;  %v1618_v7 = vld [vmem:[%s2877_s1 + $0x1a8] sm:$0xff]  ;;  %v1625_v8 = vld [vmem:[%s2877_s1 + $0x1b8] sm:$0xff] }
   0x4   :  { %80 = vmatpush.msra.mxu0 %v1597_v3  ;;  %100 = vmatpush.msra.mxu1 %v1602_v4  ;;  %v1631_v9 = vld [vmem:[%s2877_s1 + $0x180] sm:$0xff]  ;;  %v1636_v10 = vld [vmem:[%s2877_s1 + $0x188] sm:$0xff]  ;;  %v1643_v11 = vld [vmem:[%s2877_s1 + $0x198] sm:$0xff] }
   0x5   :  { %140 = vmatpush.msra.mxu3 %v1607_v5  ;;  %v1649_v12 = vld [vmem:[%s2877_s1 + $0x160] sm:$0xff]  ;;  %v1654_v13 = vld [vmem:[%s2877_s1 + $0x168] sm:$0xff]  ;;  %v1661_v14 = vld [vmem:[%s2877_s1 + $0x178] sm:$0xff] }
   0x6   :  { %81 = vmatpush.msra.mxu0 %v1613_v6  ;;  %101 = vmatpush.msra.mxu1 %v1618_v7  ;;  %v1667_v15 = vld [vmem:[%s2877_s1 + $0x140] sm:$0xff]  ;;  %v1672_v16 = vld [vmem:[%s2877_s1 + $0x148] sm:$0xff]  ;;  %v1677_v17 = vld [vmem:[%s2877_s1 + $0x1f0] sm:$0xff] }
   0x7   :  { %141 = vmatpush.msra.mxu3 %v1625_v8  ;;  %v1684_v18 = vld [vmem:[%s2877_s1 + $0x158] sm:$0xff]  ;;  %v1689_v19 = vld [vmem:[%s2877_s1 + $0x1d0] sm:$0xff]  ;;  %v1695_v20 = vld [vmem:[%s2877_s1 + $0x120] sm:$0xff]  ;;  %119 = vmatpush.msra.mxu2 %v1677_v17 }
   0x8   :  { %82 = vmatpush.msra.mxu0 %v1631_v9  ;;  %102 = vmatpush.msra.mxu1 %v1636_v10  ;;  %v1700_v21 = vld [vmem:[%s2877_s1 + $0x128] sm:$0xff]  ;;  %v1708_v22 = vld [vmem:[%s2877_s1 + $0x138] sm:$0xff]  ;;  %v1713_v23 = vld [vmem:[%s2877_s1 + $0x1b0] sm:$0xff] }
   0x9   :  { %142 = vmatpush.msra.mxu3 %v1643_v11  ;;  %v1719_v24 = vld [vmem:[%s2877_s1 + $0x100] sm:$0xff]  ;;  %v1724_v25 = vld [vmem:[%s2877_s1 + $0x108] sm:$0xff]  ;;  %120 = vmatpush.msra.mxu2 %v1689_v19  ;;  %v1732_v26 = vld [vmem:[%s2877_s1 + $0x118] sm:$0xff] }
   0xa   :  { %83 = vmatpush.msra.mxu0 %v1649_v12  ;;  %103 = vmatpush.msra.mxu1 %v1654_v13  ;;  %v1737_v27 = vld [vmem:[%s2877_s1 + $0x190] sm:$0xff]  ;;  %v1743_v28 = vld [vmem:[%s2877_s1 + $0xe0] sm:$0xff]  ;;  %v1748_v29 = vld [vmem:[%s2877_s1 + $0xe8] sm:$0xff] }
   0xb   :  { %143 = vmatpush.msra.mxu3 %v1661_v14  ;;  %121 = vmatpush.msra.mxu2 %v1713_v23  ;;  %v1756_v30 = vld [vmem:[%s2877_s1 + $0xf8] sm:$0xff]  ;;  %v1761_v31 = vld [vmem:[%s2877_s1 + $0x170] sm:$0xff]  ;;  %v1767_v32 = vld [vmem:[%s2877_s1 + $0xc0] sm:$0xff] }
   0xc   :  { %84 = vmatpush.msra.mxu0 %v1667_v15  ;;  %104 = vmatpush.msra.mxu1 %v1672_v16  ;;  %v1772_v33 = vld [vmem:[%s2877_s1 + $0xc8] sm:$0xff]  ;;  %v1780_v34 = vld [vmem:[%s2877_s1 + $0xd8] sm:$0xff]  ;;  %v1785_v35 = vld [vmem:[%s2877_s1 + $0x150] sm:$0xff] }
   0xd   :  { %144 = vmatpush.msra.mxu3 %v1684_v18  ;;  %122 = vmatpush.msra.mxu2 %v1737_v27  ;;  %2987 = vst [vmem:[#allocation3_spill] sm:$0xff] %v1780_v34  ;;  %v1791_v36 = vld [vmem:[%s2877_s1 + $0xa0] sm:$0xff]  ;;  %v1796_v37 = vld [vmem:[%s2877_s1 + $0xa8] sm:$0xff]  ;;  %v1804_v38 = vld [vmem:[%s2877_s1 + $0xb8] sm:$0xff] }
   0xe   :  { %85 = vmatpush.msra.mxu0 %v1695_v20  ;;  %105 = vmatpush.msra.mxu1 %v1700_v21  ;;  %2988 = vst [vmem:[#allocation4_spill] sm:$0xff] %v1791_v36  ;;  %v1809_v39 = vld [vmem:[%s2877_s1 + $0x130] sm:$0xff]  ;;  %v1815_v40 = vld [vmem:[%s2877_s1 + $0x80] sm:$0xff]  ;;  %v1820_v41 = vld [vmem:[%s2877_s1 + $0x88] sm:$0xff] }
   0xf   :  { %145 = vmatpush.msra.mxu3 %v1708_v22  ;;  %2989 = vst [vmem:[#allocation5_spill] sm:$0xff] %v1796_v37  ;;  %123 = vmatpush.msra.mxu2 %v1761_v31  ;;  %v1828_v42 = vld [vmem:[%s2877_s1 + $0x98] sm:$0xff]  ;;  %v1833_v43 = vld [vmem:[%s2877_s1 + $0x110] sm:$0xff]  ;;  %v1839_v44 = vld [vmem:[%s2877_s1 + $0x60] sm:$0xff] }
  0x10   :  { %86 = vmatpush.msra.mxu0 %v1719_v24  ;;  %106 = vmatpush.msra.mxu1 %v1724_v25  ;;  %2990 = vst [vmem:[#allocation6_spill] sm:$0xff] %v1804_v38  ;;  %v1844_v45 = vld [vmem:[%s2877_s1 + $0x68] sm:$0xff]  ;;  %v1852_v46 = vld [vmem:[%s2877_s1 + $0x78] sm:$0xff]  ;;  %v1857_v47 = vld [vmem:[%s2877_s1 + $0xf0] sm:$0xff] }
  0x11   :  { %146 = vmatpush.msra.mxu3 %v1732_v26  ;;  %2991 = vst [vmem:[#allocation7_spill] sm:$0xff] %v1815_v40  ;;  %124 = vmatpush.msra.mxu2 %v1785_v35  ;;  %v1863_v48 = vld [vmem:[%s2877_s1 + $0x40] sm:$0xff]  ;;  %v1868_v49 = vld [vmem:[%s2877_s1 + $0x48] sm:$0xff]  ;;  %v1876_v50 = vld [vmem:[%s2877_s1 + $0x58] sm:$0xff] }
  0x12   :  { %87 = vmatpush.msra.mxu0 %v1743_v28  ;;  %107 = vmatpush.msra.mxu1 %v1748_v29  ;;  %2992 = vst [vmem:[#allocation8_spill] sm:$0xff] %v1820_v41  ;;  %v1881_v51 = vld [vmem:[%s2877_s1 + $0xd0] sm:$0xff]  ;;  %v1887_v52 = vld [vmem:[%s2877_s1 + $0x20] sm:$0xff]  ;;  %v1892_v53 = vld [vmem:[%s2877_s1 + $0x28] sm:$0xff] }
  0x13   :  { %147 = vmatpush.msra.mxu3 %v1756_v30  ;;  %2993 = vst [vmem:[#allocation9_spill] sm:$0xff] %v1828_v42  ;;  %125 = vmatpush.msra.mxu2 %v1809_v39  ;;  %v1900_v54 = vld [vmem:[%s2877_s1 + $0x38] sm:$0xff]  ;;  %v1905_v55 = vld [vmem:[%s2877_s1 + $0xb0] sm:$0xff]  ;;  %v1911_v56 = vld [vmem:[%s2877_s1] sm:$0xff] }
  0x14   :  { %88 = vmatpush.msra.mxu0 %v1767_v32  ;;  %108 = vmatpush.msra.mxu1 %v1772_v33  ;;  %2994 = vst [vmem:[#allocation10_spill] sm:$0xff] %v1839_v44  ;;  %v1916_v57 = vld [vmem:[%s2877_s1 + $0x8] sm:$0xff]  ;;  %v1924_v58 = vld [vmem:[%s2877_s1 + $0x18] sm:$0xff]  ;;  %v1933_v59 = vld [vmem:[%s2877_s1 + $0x90] sm:$0xff] }
  0x15   :  { %148 = vmatpush.msra.mxu3 %v1780_v34  ;;  %2995 = vst [vmem:[#allocation11_spill] sm:$0xff] %v1844_v45  ;;  %126 = vmatpush.msra.mxu2 %v1833_v43  ;;  %v1939_v61 = vld [vmem:[%s2877_s1 + $0x70] sm:$0xff] }
  0x16   :  { %89 = vmatpush.msra.mxu0 %v1791_v36  ;;  %109 = vmatpush.msra.mxu1 %v1796_v37  ;;  %2996 = vst [vmem:[#allocation12_spill] sm:$0xff] %v1852_v46  ;;  %v1946_v62 = vld [vmem:[%s2877_s1 + $0x50] sm:$0xff] }
  0x17   :  { %149 = vmatpush.msra.mxu3 %v1804_v38  ;;  %2997 = vst [vmem:[#allocation13_spill] sm:$0xff] %v1863_v48  ;;  %127 = vmatpush.msra.mxu2 %v1857_v47  ;;  %v1955_v63 = vld [vmem:[%s2877_s1 + $0x30] sm:$0xff] }
  0x18   :  { %90 = vmatpush.msra.mxu0 %v1815_v40  ;;  %110 = vmatpush.msra.mxu1 %v1820_v41  ;;  %2998 = vst [vmem:[#allocation14_spill] sm:$0xff] %v1868_v49 }
  0x19   :  { %150 = vmatpush.msra.mxu3 %v1828_v42  ;;  %2999 = vst [vmem:[#allocation15_spill] sm:$0xff] %v1876_v50  ;;  %128 = vmatpush.msra.mxu2 %v1881_v51 }
  0x1a   :  { %91 = vmatpush.msra.mxu0 %v1839_v44  ;;  %111 = vmatpush.msra.mxu1 %v1844_v45  ;;  %3000 = vst [vmem:[#allocation16_spill] sm:$0xff] %v1881_v51 }
  0x1b   :  { %151 = vmatpush.msra.mxu3 %v1852_v46  ;;  %3001 = vst [vmem:[#allocation17_spill] sm:$0xff] %v1887_v52  ;;  %129 = vmatpush.msra.mxu2 %v1905_v55 }
  0x1c   :  { %3002 = vst [vmem:[#allocation18_spill] sm:$0xff] %v1892_v53  ;;  %92 = vmatpush.msra.mxu0 %v1863_v48  ;;  %112 = vmatpush.msra.mxu1 %v1868_v49 }
  0x1d   :  { %3003 = vst [vmem:[#allocation19_spill] sm:$0xff] %v1900_v54  ;;  %152 = vmatpush.msra.mxu3 %v1876_v50  ;;  %130 = vmatpush.msra.mxu2 %v1933_v59 }
  0x1e   :  { %3004 = vst [vmem:[#allocation20_spill] sm:$0xff] %v1905_v55  ;;  %93 = vmatpush.msra.mxu0 %v1887_v52  ;;  %113 = vmatpush.msra.mxu1 %v1892_v53 }
  0x1f   :  { %3005 = vst [vmem:[#allocation21_spill] sm:$0xff] %v1911_v56  ;;  %153 = vmatpush.msra.mxu3 %v1900_v54  ;;  %131 = vmatpush.msra.mxu2 %v1939_v61 }
  0x20   :  { %3006 = vst [vmem:[#allocation22_spill] sm:$0xff] %v1916_v57  ;;  %94 = vmatpush.msra.mxu0 %v1911_v56  ;;  %114 = vmatpush.msra.mxu1 %v1916_v57 }
  0x21   :  { %3007 = vst [vmem:[#allocation23_spill] sm:$0xff] %v1924_v58  ;;  %154 = vmatpush.msra.mxu3 %v1924_v58  ;;  %95 = vmatmul.f32.vlgmr.msra.gmra.mxu0 %v1561_v60 }
  0x22   :  { %3008 = vst [vmem:[#allocation24_spill] sm:$0xff] %v1933_v59  ;;  %115 = vmatmul.f32.vlgmr.msra.gmra.mxu1 %v1561_v60  ;;  %155 = vmatmul.f32.vlgmr.msra.gmra.mxu3 %v1561_v60 }
  0x23   :  { %3009 = vst [vmem:[#allocation25_spill] sm:$0xff] %v1939_v61  ;;  %232 = vmatpush.msrb.mxu0 %v1580_v0  ;;  %252 = vmatpush.msrb.mxu1 %v1585_v1 }
  0x24   :  { %3010 = vst [vmem:[#allocation26_spill] sm:$0xff] %v1946_v62  ;;  %292 = vmatpush.msrb.mxu3 %v1590_v2  ;;  %132 = vmatpush.msra.mxu2 %v1946_v62  ;;  %v1964_v2 = vld [vmem:[%s2877_s1 + $0x10] sm:$0xff] }
  0x25   :  { %233 = vmatpush.msrb.mxu0 %v1597_v3  ;;  %3011 = vst [vmem:[#allocation27_spill] sm:$0xff] %v1955_v63  ;;  %253 = vmatpush.msrb.mxu1 %v1602_v4 }
  0x26   :  { %293 = vmatpush.msrb.mxu3 %v1607_v5  ;;  %3012 = vst [vmem:[#allocation28_spill] sm:$0xff] %v1964_v2  ;;  %133 = vmatpush.msra.mxu2 %v1955_v63 }
  0x27   :  { %234 = vmatpush.msrb.mxu0 %v1613_v6  ;;  %254 = vmatpush.msrb.mxu1 %v1618_v7 }
  0x28   :  { %294 = vmatpush.msrb.mxu3 %v1625_v8  ;;  %134 = vmatpush.msra.mxu2 %v1964_v2 }
  0x29   :  { %235 = vmatpush.msrb.mxu0 %v1631_v9  ;;  %255 = vmatpush.msrb.mxu1 %v1636_v10 }
  0x2a   :  { %295 = vmatpush.msrb.mxu3 %v1643_v11  ;;  %135 = vmatmul.f32.vlgmr.msra.gmra.mxu2 %v1561_v60  ;;  %v3013_v60 = vld [vmem:[#allocation2_spill] sm:$0xff] }
  0x2b   :  { %236 = vmatpush.msrb.mxu0 %v1649_v12  ;;  %256 = vmatpush.msrb.mxu1 %v1654_v13 }
  0x2c   :  { %272 = vmatpush.msrb.mxu2 %v1677_v17  ;;  %296 = vmatpush.msrb.mxu3 %v1661_v14 }
  0x2d   :  { %237 = vmatpush.msrb.mxu0 %v1667_v15  ;;  %257 = vmatpush.msrb.mxu1 %v1672_v16 }
  0x2e   :  { %273 = vmatpush.msrb.mxu2 %v1689_v19  ;;  %297 = vmatpush.msrb.mxu3 %v1684_v18 }
  0x2f   :  { %238 = vmatpush.msrb.mxu0 %v1695_v20  ;;  %258 = vmatpush.msrb.mxu1 %v1700_v21 }
  0x30   :  { %274 = vmatpush.msrb.mxu2 %v1713_v23  ;;  %298 = vmatpush.msrb.mxu3 %v1708_v22 }
  0x31   :  { %239 = vmatpush.msrb.mxu0 %v1719_v24  ;;  %259 = vmatpush.msrb.mxu1 %v1724_v25 }
  0x32   :  { %275 = vmatpush.msrb.mxu2 %v1737_v27  ;;  %299 = vmatpush.msrb.mxu3 %v1732_v26 }
  0x33   :  { %240 = vmatpush.msrb.mxu0 %v1743_v28  ;;  %260 = vmatpush.msrb.mxu1 %v1748_v29 }
  0x34   :  { %276 = vmatpush.msrb.mxu2 %v1761_v31  ;;  %300 = vmatpush.msrb.mxu3 %v1756_v30 }
  0x35   :  { %241 = vmatpush.msrb.mxu0 %v1767_v32  ;;  %261 = vmatpush.msrb.mxu1 %v1772_v33 }
  0x36   :  { %277 = vmatpush.msrb.mxu2 %v1785_v35  ;;  %301 = vmatpush.msrb.mxu3 %v1780_v34 }
  0x37   :  { %242 = vmatpush.msrb.mxu0 %v1791_v36  ;;  %262 = vmatpush.msrb.mxu1 %v1796_v37 }
  0x38   :  { %278 = vmatpush.msrb.mxu2 %v1809_v39  ;;  %302 = vmatpush.msrb.mxu3 %v1804_v38 }
  0x39   :  { %243 = vmatpush.msrb.mxu0 %v1815_v40  ;;  %263 = vmatpush.msrb.mxu1 %v1820_v41 }
  0x3a   :  { %279 = vmatpush.msrb.mxu2 %v1833_v43  ;;  %303 = vmatpush.msrb.mxu3 %v1828_v42 }
  0x3b   :  { %244 = vmatpush.msrb.mxu0 %v1839_v44  ;;  %264 = vmatpush.msrb.mxu1 %v1844_v45 }
  0x3c   :  { %280 = vmatpush.msrb.mxu2 %v1857_v47  ;;  %304 = vmatpush.msrb.mxu3 %v1852_v46 }
  0x3d   :  { %245 = vmatpush.msrb.mxu0 %v1863_v48  ;;  %265 = vmatpush.msrb.mxu1 %v1868_v49 }
  0x3e   :  { %281 = vmatpush.msrb.mxu2 %v1881_v51  ;;  %305 = vmatpush.msrb.mxu3 %v1876_v50 }
  0x3f   :  { %246 = vmatpush.msrb.mxu0 %v1887_v52  ;;  %266 = vmatpush.msrb.mxu1 %v1892_v53 }
  0x40   :  { %282 = vmatpush.msrb.mxu2 %v1905_v55  ;;  %306 = vmatpush.msrb.mxu3 %v1900_v54 }
  0x41   :  { %247 = vmatpush.msrb.mxu0 %v1911_v56  ;;  %267 = vmatpush.msrb.mxu1 %v1916_v57 }
  0x42   :  { %283 = vmatpush.msrb.mxu2 %v1933_v59  ;;  %307 = vmatpush.msrb.mxu3 %v1924_v58 }
  0x43   :  { %386 = vmatpush.msra.mxu0 %v1580_v0  ;;  %406 = vmatpush.msra.mxu1 %v1585_v1 }
  0x44   :  { %284 = vmatpush.msrb.mxu2 %v1939_v61  ;;  %446 = vmatpush.msra.mxu3 %v3013_v60 }
  0x45   :  { %387 = vmatpush.msra.mxu0 %v1597_v3  ;;  %407 = vmatpush.msra.mxu1 %v1602_v4 }
  0x46   :  { %285 = vmatpush.msrb.mxu2 %v1946_v62  ;;  %447 = vmatpush.msra.mxu3 %v1607_v5 }
  0x47   :  { %388 = vmatpush.msra.mxu0 %v1613_v6  ;;  %408 = vmatpush.msra.mxu1 %v1618_v7 }
  0x48   :  { %286 = vmatpush.msrb.mxu2 %v1955_v63  ;;  %448 = vmatpush.msra.mxu3 %v1625_v8 }
  0x49   :  { %389 = vmatpush.msra.mxu0 %v1631_v9  ;;  %409 = vmatpush.msra.mxu1 %v1636_v10 }
  0x4a   :  { %287 = vmatpush.msrb.mxu2 %v1964_v2  ;;  %449 = vmatpush.msra.mxu3 %v1643_v11 }
  0x4b   :  { %390 = vmatpush.msra.mxu0 %v1649_v12  ;;  %410 = vmatpush.msra.mxu1 %v1654_v13 }
  0x4c   :  { %426 = vmatpush.msra.mxu2 %v1677_v17  ;;  %450 = vmatpush.msra.mxu3 %v1661_v14 }
  0x4d   :  { %391 = vmatpush.msra.mxu0 %v1667_v15  ;;  %411 = vmatpush.msra.mxu1 %v1672_v16 }
  0x4e   :  { %427 = vmatpush.msra.mxu2 %v1689_v19  ;;  %451 = vmatpush.msra.mxu3 %v1684_v18 }
  0x4f   :  { %392 = vmatpush.msra.mxu0 %v1695_v20  ;;  %412 = vmatpush.msra.mxu1 %v1700_v21 }
  0x50   :  { %428 = vmatpush.msra.mxu2 %v1713_v23  ;;  %452 = vmatpush.msra.mxu3 %v1708_v22 }
  0x51   :  { %393 = vmatpush.msra.mxu0 %v1719_v24  ;;  %413 = vmatpush.msra.mxu1 %v1724_v25 }
  0x52   :  { %429 = vmatpush.msra.mxu2 %v1737_v27  ;;  %453 = vmatpush.msra.mxu3 %v1732_v26 }
  0x53   :  { %394 = vmatpush.msra.mxu0 %v1743_v28  ;;  %414 = vmatpush.msra.mxu1 %v1748_v29 }
  0x54   :  { %430 = vmatpush.msra.mxu2 %v1761_v31  ;;  %454 = vmatpush.msra.mxu3 %v1756_v30 }
  0x55   :  { %395 = vmatpush.msra.mxu0 %v1767_v32  ;;  %415 = vmatpush.msra.mxu1 %v1772_v33 }
  0x56   :  { %431 = vmatpush.msra.mxu2 %v1785_v35  ;;  %455 = vmatpush.msra.mxu3 %v1780_v34 }
  0x57   :  { %396 = vmatpush.msra.mxu0 %v1791_v36  ;;  %416 = vmatpush.msra.mxu1 %v1796_v37 }
  0x58   :  { %432 = vmatpush.msra.mxu2 %v1809_v39  ;;  %456 = vmatpush.msra.mxu3 %v1804_v38 }
  0x59   :  { %397 = vmatpush.msra.mxu0 %v1815_v40  ;;  %417 = vmatpush.msra.mxu1 %v1820_v41 }
  0x5a   :  { %433 = vmatpush.msra.mxu2 %v1833_v43  ;;  %457 = vmatpush.msra.mxu3 %v1828_v42 }
  0x5b   :  { %398 = vmatpush.msra.mxu0 %v1839_v44  ;;  %418 = vmatpush.msra.mxu1 %v1844_v45 }
  0x5c   :  { %434 = vmatpush.msra.mxu2 %v1857_v47  ;;  %458 = vmatpush.msra.mxu3 %v1852_v46 }
  0x5d   :  { %399 = vmatpush.msra.mxu0 %v1863_v48  ;;  %419 = vmatpush.msra.mxu1 %v1868_v49 }
  0x5e   :  { %435 = vmatpush.msra.mxu2 %v1881_v51  ;;  %459 = vmatpush.msra.mxu3 %v1876_v50 }
  0x5f   :  { %400 = vmatpush.msra.mxu0 %v1887_v52  ;;  %420 = vmatpush.msra.mxu1 %v1892_v53 }
  0x60   :  { %436 = vmatpush.msra.mxu2 %v1905_v55  ;;  %460 = vmatpush.msra.mxu3 %v1900_v54  ;;  %v75_v54 = vld [vmem:[%s2878_s0] sm:$0xff] }
  0x61   :  { %401 = vmatpush.msra.mxu0 %v1911_v56  ;;  %421 = vmatpush.msra.mxu1 %v1916_v57  ;;  %v76_v56 = vld [vmem:[%s2878_s0 + $0x8] sm:$0xff] }
  0x62   :  { %437 = vmatpush.msra.mxu2 %v1933_v59  ;;  %461 = vmatpush.msra.mxu3 %v1924_v58 }
  0x64   :  { %438 = vmatpush.msra.mxu2 %v1939_v61 }
  0x66   :  { %439 = vmatpush.msra.mxu2 %v1946_v62 }
  0x68   :  { %440 = vmatpush.msra.mxu2 %v1955_v63  ;;  %v78_v63 = vld [vmem:[%s2878_s0 + $0x18] sm:$0xff] }
  0x6a   :  { %441 = vmatpush.msra.mxu2 %v1964_v2 }
  0x9e   :  { %v96_v53 = vpop.f32.mrf.mxu0 }
  0x9f   :  { %v159_v57 = vadd.f32 %v96_v53, %v75_v54  ;;  %v116_v52 = vpop.f32.mrf.mxu1 }
  0xa0   :  { %v160_v58 = vadd.f32 %v116_v52, %v76_v56  ;;  %v77_v52 = vld [vmem:[%s2878_s0 + $0x10] sm:$0xff] }
  0xa1   :  { %v1309_v50 = vmul.f32 -1.442695, %v159_v57 }
  0xa2   :  { %v1310_v49 = vmul.f32 -1.442695, %v160_v58 }
  0xa3   :  { %1369 = vpow2.f32 %v1309_v50 }
  0xa4   :  { %1371 = vpow2.f32 %v1310_v49 }
  0xa5   :  { %v156_v2 = vpop.f32.mrf.mxu3 }
  0xa6   :  { %v162_v62 = vadd.f32 %v156_v2, %v78_v63 }
  0xa8   :  { %v1311_v48 = vmul.f32 -1.442695, %v162_v62 }
  0xa9   :  { %v1370_v46 = vpop.eup %1369 }
  0xaa   :  { %v1372_v61 = vpop.eup %1371  ;;  %v166_v45 = vadd.f32 1.0, %v1370_v46  ;;  %1373 = vpow2.f32 %v1311_v48 }
  0xab   :  { %v185_v44 = vadd.f32 1.0, %v1372_v61 }
  0xac   :  { %1375 = vrcp.f32 %v166_v45  ;;  %v178_v48 = vand.u32 2147483648, %v166_v45  ;;  %v176_v42 = vand.u32 2147483647, %v166_v45  ;;  %vm172_vm2 = vweird.f32 %v166_v45 }
  0xad   :  { %1377 = vrcp.f32 %v185_v44  ;;  %v136_v50 = vpop.f32.mrf.mxu2  ;;  %v197_v61 = vand.u32 2147483648, %v185_v44  ;;  %v195_v41 = vand.u32 2147483647, %v185_v44  ;;  %vm191_vm3 = vweird.f32 %v185_v44 }
  0xae   :  { %v161_v54 = vadd.f32 %v136_v50, %v77_v52  ;;  %vm177_vm5 = vcmp.eq.f32.partialorder %v176_v42, 8.507059e+37 }
  0xaf   :  { %vm196_vm7 = vcmp.eq.f32.partialorder %v195_v41, 8.507059e+37 }
  0xb0   :  { %v1374_v53 = vpop.eup %1373 }
  0xb1   :  { %v205_v56 = vadd.f32 1.0, %v1374_v53  ;;  %v179_v53 = vor.u32 1.1754944e-38, %v178_v48  ;;  %v3021_v48 = vld [vmem:[#allocation8_spill] sm:$0xff] }
  0xb2   :  { %v1376_v57 = vpop.eup %1375 }
  0xb3   :  { %v1378_v49 = vpop.eup %1377  ;;  %v168_v58 = vmul.f32 %v1376_v57, %v166_v45  ;;  %1379 = vrcp.f32 %v205_v56  ;;  %vm173_vm0 = vweird.f32 %v1376_v57  ;;  %v217_v45 = vand.u32 2147483648, %v205_v56 }
  0xb4   :  { %v187_v2 = vmul.f32 %v1378_v49, %v185_v44  ;;  %1381 = vtanh.f32 %v161_v54  ;;  %vm192_vm1 = vweird.f32 %v1378_v49  ;;  %vm174_vm4 = vmor %vm172_vm2, %vm173_vm0  ;;  %v198_v54 = vor.u32 1.1754944e-38, %v197_v61  ;;  %v3022_v61 = vld [vmem:[#allocation24_spill] sm:$0xff] }
  0xb5   :  { %v169_v62 = vsub.f32 1.0, %v168_v58  ;;  %vm193_vm6 = vmor %vm191_vm3, %vm192_vm1  ;;  %vm211_vm9 = vweird.f32 %v205_v56  ;;  %v218_v42 = vor.u32 1.1754944e-38, %v217_v45  ;;  %v3032_v45 = vld [vmem:[#allocation17_spill] sm:$0xff] }
  0xb6   :  { %v188_v46 = vsub.f32 1.0, %v187_v2 }
  0xb7   :  { %v170_v63 = vmul.f32 %v1376_v57, %v169_v62 }
  0xb8   :  { %v189_v59 = vmul.f32 %v1378_v49, %v188_v46 }
  0xb9   :  { %v1380_v40 = vpop.eup %1379  ;;  %v171_v38 = vadd.f32 %v1376_v57, %v170_v63 }
  0xba   :  { %v1382_v52 = vpop.eup %1381  ;;  %v207_v50 = vmul.f32 %v1380_v40, %v205_v56  ;;  %v190_v55 = vadd.f32 %v1378_v49, %v189_v59  ;;  %vm212_vm8 = vweird.f32 %v1380_v40  ;;  %v215_v59 = vand.u32 2147483647, %v205_v56  ;;  %v3019_v56 = vld [vmem:[#allocation6_spill] sm:$0xff] }
  0xbb   :  { %v175_v58 = vsel %vm174_vm4, %v1376_v57, %v171_v38  ;;  %vm213_vm10 = vmor %vm211_vm9, %vm212_vm8 }
  0xbc   :  { %v208_v2 = vsub.f32 1.0, %v207_v50  ;;  %v180_v62 = vsel %vm177_vm5, %v179_v53, %v175_v58  ;;  %v194_v37 = vsel %vm193_vm6, %v1378_v49, %v190_v55  ;;  %vm216_vm11 = vcmp.eq.f32.partialorder %v215_v59, 8.507059e+37  ;;  %v3020_v49 = vld [vmem:[#allocation7_spill] sm:$0xff]  ;;  %v3024_v50 = vld [vmem:[#allocation10_spill] sm:$0xff]  ;;  %v3027_v58 = vld [vmem:[#allocation12_spill] sm:$0xff] }
  0xbd   :  { %v199_v46 = vsel %vm196_vm7, %v198_v54, %v194_v37  ;;  %v222_v36 = vmul.f32 %v1382_v52, %v180_v62  ;;  %v3016_v37 = vld [vmem:[#allocation4_spill] sm:$0xff]  ;;  %v3023_v52 = vld [vmem:[#allocation9_spill] sm:$0xff]  ;;  %v3025_v53 = vld [vmem:[#allocation11_spill] sm:$0xff] }
  0xbe   :  { %v209_v34 = vmul.f32 %v1380_v40, %v208_v2  ;;  %v221_v51 = vmul.f32 0.0, %v199_v46  ;;  %v3026_v54 = vld [vmem:[#allocation25_spill] sm:$0xff]  ;;  %v3029_v62 = vld [vmem:[#allocation14_spill] sm:$0xff] }
  0xbf   :  { %v3028_v2 = vld [vmem:[#allocation13_spill] sm:$0xff]  ;;  %v3030_v46 = vld [vmem:[#allocation26_spill] sm:$0xff] }
  0xc0   :  { %v2101_v63 = vadd.f32 %v222_v36, %v221_v51  ;;  %v210_v44 = vadd.f32 %v1380_v40, %v209_v34  ;;  %v3014_v34 = vld [vmem:[#allocation16_spill] sm:$0xff]  ;;  %v3015_v36 = vld [vmem:[#allocation3_spill] sm:$0xff]  ;;  %v3033_v59 = vld [vmem:[#allocation18_spill] sm:$0xff] }
  0xc1   :  { %v3018_v51 = vld [vmem:[#allocation20_spill] sm:$0xff] }
  0xc2   :  { %1383 = vtanh.f32 %v2101_v63  ;;  %v214_v38 = vsel %vm213_vm10, %v1380_v40, %v210_v44  ;;  %v3017_v40 = vld [vmem:[#allocation5_spill] sm:$0xff]  ;;  %v3031_v44 = vld [vmem:[#allocation15_spill] sm:$0xff] }
  0xc3   :  { %v219_v55 = vsel %vm216_vm11, %v218_v42, %v214_v38  ;;  %v3034_v38 = vld [vmem:[#allocation27_spill] sm:$0xff] }
  0xc4   :  { %v3035_v42 = vld [vmem:[#allocation19_spill] sm:$0xff] }
  0xc8   :  { %v1384_v57 = vpop.eup %1383 }
  0xc9   :  { %v225_v41 = vmul.f32 %v1384_v57, %v219_v55  ;;  %v3036_v57 = vld [vmem:[#allocation21_spill] sm:$0xff]  ;;  %v3037_v55 = vld [vmem:[#allocation22_spill] sm:$0xff] }
  0xcb   :  { %226 = vst [vmem:[%s2879_s2] sm:$0xff] %v225_v41  ;;  %248 = vmatmul.f32.vlgmr.msrb.gmra.mxu0 %v225_v41  ;;  %268 = vmatmul.f32.vlgmr.msrb.gmra.mxu1 %v225_v41 }
  0xcc   :  { %288 = vmatmul.f32.vlgmr.msrb.gmra.mxu2 %v225_v41  ;;  %308 = vmatmul.f32.vlgmr.msrb.gmra.mxu3 %v225_v41  ;;  %v3038_v41 = vld [vmem:[#allocation28_spill] sm:$0xff] }
  0xcd   :  { %540 = vmatpush.msrb.mxu0 %v1580_v0  ;;  %560 = vmatpush.msrb.mxu1 %v1585_v1 }
  0xce   :  { %580 = vmatpush.msrb.mxu2 %v1677_v17  ;;  %600 = vmatpush.msrb.mxu3 %v3013_v60 }
  0xcf   :  { %541 = vmatpush.msrb.mxu0 %v1597_v3  ;;  %561 = vmatpush.msrb.mxu1 %v1602_v4 }
  0xd0   :  { %581 = vmatpush.msrb.mxu2 %v1689_v19  ;;  %601 = vmatpush.msrb.mxu3 %v1607_v5 }
  0xd1   :  { %542 = vmatpush.msrb.mxu0 %v1613_v6  ;;  %562 = vmatpush.msrb.mxu1 %v1618_v7 }
  0xd2   :  { %582 = vmatpush.msrb.mxu2 %v1713_v23  ;;  %602 = vmatpush.msrb.mxu3 %v1625_v8 }
  0xd3   :  { %543 = vmatpush.msrb.mxu0 %v1631_v9  ;;  %563 = vmatpush.msrb.mxu1 %v1636_v10 }
  0xd4   :  { %583 = vmatpush.msrb.mxu2 %v1737_v27  ;;  %603 = vmatpush.msrb.mxu3 %v1643_v11 }
  0xd5   :  { %544 = vmatpush.msrb.mxu0 %v1649_v12  ;;  %564 = vmatpush.msrb.mxu1 %v1654_v13 }
  0xd6   :  { %584 = vmatpush.msrb.mxu2 %v1761_v31  ;;  %604 = vmatpush.msrb.mxu3 %v1661_v14 }
  0xd7   :  { %545 = vmatpush.msrb.mxu0 %v1667_v15  ;;  %565 = vmatpush.msrb.mxu1 %v1672_v16 }
  0xd8   :  { %585 = vmatpush.msrb.mxu2 %v1785_v35  ;;  %605 = vmatpush.msrb.mxu3 %v1684_v18 }
  0xd9   :  { %546 = vmatpush.msrb.mxu0 %v1695_v20  ;;  %566 = vmatpush.msrb.mxu1 %v1700_v21 }
  0xda   :  { %586 = vmatpush.msrb.mxu2 %v1809_v39  ;;  %606 = vmatpush.msrb.mxu3 %v1708_v22 }
  0xdb   :  { %547 = vmatpush.msrb.mxu0 %v1719_v24  ;;  %567 = vmatpush.msrb.mxu1 %v1724_v25 }
  0xdc   :  { %587 = vmatpush.msrb.mxu2 %v1833_v43  ;;  %607 = vmatpush.msrb.mxu3 %v1732_v26 }
  0xdd   :  { %548 = vmatpush.msrb.mxu0 %v1743_v28  ;;  %568 = vmatpush.msrb.mxu1 %v1748_v29 }
  0xde   :  { %588 = vmatpush.msrb.mxu2 %v1857_v47  ;;  %608 = vmatpush.msrb.mxu3 %v1756_v30 }
  0xdf   :  { %549 = vmatpush.msrb.mxu0 %v1767_v32  ;;  %569 = vmatpush.msrb.mxu1 %v1772_v33 }
  0xe0   :  { %589 = vmatpush.msrb.mxu2 %v3014_v34  ;;  %609 = vmatpush.msrb.mxu3 %v3015_v36 }
  0xe1   :  { %550 = vmatpush.msrb.mxu0 %v3016_v37  ;;  %570 = vmatpush.msrb.mxu1 %v3017_v40 }
  0xe2   :  { %590 = vmatpush.msrb.mxu2 %v3018_v51  ;;  %610 = vmatpush.msrb.mxu3 %v3019_v56 }
  0xe3   :  { %551 = vmatpush.msrb.mxu0 %v3020_v49  ;;  %571 = vmatpush.msrb.mxu1 %v3021_v48 }
  0xe4   :  { %591 = vmatpush.msrb.mxu2 %v3022_v61  ;;  %611 = vmatpush.msrb.mxu3 %v3023_v52 }
  0xe5   :  { %552 = vmatpush.msrb.mxu0 %v3024_v50  ;;  %572 = vmatpush.msrb.mxu1 %v3025_v53 }
  0xe6   :  { %592 = vmatpush.msrb.mxu2 %v3026_v54  ;;  %612 = vmatpush.msrb.mxu3 %v3027_v58 }
  0xe7   :  { %553 = vmatpush.msrb.mxu0 %v3028_v2  ;;  %573 = vmatpush.msrb.mxu1 %v3029_v62  ;;  %v3039_v2 = vld [vmem:[#allocation23_spill] sm:$0xff] }
  0xe8   :  { %593 = vmatpush.msrb.mxu2 %v3030_v46  ;;  %613 = vmatpush.msrb.mxu3 %v3031_v44  ;;  %v1312_v44 = vld [vmem:[%s2878_s0 + $0x20] sm:$0xff] }
  0xe9   :  { %554 = vmatpush.msrb.mxu0 %v3032_v45  ;;  %574 = vmatpush.msrb.mxu1 %v3033_v59  ;;  %v1313_v59 = vld [vmem:[%s2878_s0 + $0x28] sm:$0xff] }
  0xea   :  { %594 = vmatpush.msrb.mxu2 %v3034_v38  ;;  %614 = vmatpush.msrb.mxu3 %v3035_v42 }
  0xeb   :  { %555 = vmatpush.msrb.mxu0 %v3036_v57  ;;  %575 = vmatpush.msrb.mxu1 %v3037_v55 }
  0xec   :  { %595 = vmatpush.msrb.mxu2 %v3038_v41  ;;  %615 = vmatpush.msrb.mxu3 %v3039_v2  ;;  %v1315_v41 = vld [vmem:[%s2878_s0 + $0x38] sm:$0xff] }
 0x148   :  { %v249_v45 = vpop.f32.mrf.mxu0  ;;  %v269_v38 = vpop.f32.mrf.mxu1 }
 0x149   :  { %v312_v46 = vadd.f32 %v1312_v44, %v249_v45  ;;  %v313_v42 = vadd.f32 %v1313_v59, %v269_v38 }
 0x14b   :  { %v1316_v62 = vmul.f32 -1.442695, %v312_v46  ;;  %v1317_v57 = vmul.f32 -1.442695, %v313_v42  ;;  %v1314_v46 = vld [vmem:[%s2878_s0 + $0x30] sm:$0xff] }
 0x14d   :  { %1385 = vpow2.f32 %v1316_v62 }
 0x14e   :  { %1387 = vpow2.f32 %v1317_v57 }
 0x14f   :  { %v309_v2 = vpop.f32.mrf.mxu3  ;;  %v289_v62 = vpop.f32.mrf.mxu2 }
 0x150   :  { %v315_v55 = vadd.f32 %v1315_v41, %v309_v2  ;;  %v314_v38 = vadd.f32 %v1314_v46, %v289_v62 }
 0x152   :  { %v1318_v58 = vmul.f32 -1.442695, %v315_v55 }
 0x153   :  { %v1386_v54 = vpop.eup %1385 }
 0x154   :  { %v1388_v53 = vpop.eup %1387  ;;  %v319_v50 = vadd.f32 1.0, %v1386_v54  ;;  %1389 = vpow2.f32 %v1318_v58 }
 0x155   :  { %v338_v52 = vadd.f32 1.0, %v1388_v53 }
 0x156   :  { %1391 = vrcp.f32 %v319_v50  ;;  %v331_v54 = vand.u32 2147483648, %v319_v50  ;;  %v329_v61 = vand.u32 2147483647, %v319_v50  ;;  %vm325_vm14 = vweird.f32 %v319_v50 }
 0x157   :  { %1393 = vrcp.f32 %v338_v52  ;;  %v350_v53 = vand.u32 2147483648, %v338_v52  ;;  %v348_v49 = vand.u32 2147483647, %v338_v52  ;;  %vm344_vm15 = vweird.f32 %v338_v52 }
 0x158   :  { %v332_v46 = vor.u32 1.1754944e-38, %v331_v54  ;;  %vm330_vm2 = vcmp.eq.f32.partialorder %v329_v61, 8.507059e+37 }
 0x159   :  { %vm349_vm3 = vcmp.eq.f32.partialorder %v348_v49, 8.507059e+37 }
 0x15a   :  { %v1390_v44 = vpop.eup %1389 }
 0x15b   :  { %v358_v45 = vadd.f32 1.0, %v1390_v44 }
 0x15c   :  { %v1392_v59 = vpop.eup %1391 }
 0x15d   :  { %v1394_v42 = vpop.eup %1393  ;;  %v321_v57 = vmul.f32 %v1392_v59, %v319_v50  ;;  %1395 = vrcp.f32 %v358_v45  ;;  %vm326_vm12 = vweird.f32 %v1392_v59  ;;  %vm364_vm5 = vweird.f32 %v358_v45 }
 0x15e   :  { %v340_v2 = vmul.f32 %v1394_v42, %v338_v52  ;;  %1397 = vtanh.f32 %v314_v38  ;;  %vm345_vm13 = vweird.f32 %v1394_v42  ;;  %vm327_vm0 = vmor %vm325_vm14, %vm326_vm12 }
 0x15f   :  { %v322_v55 = vsub.f32 1.0, %v321_v57  ;;  %vm346_vm1 = vmor %vm344_vm15, %vm345_vm13  ;;  %v351_v57 = vor.u32 1.1754944e-38, %v350_v53 }
 0x160   :  { %v341_v41 = vsub.f32 1.0, %v340_v2 }
 0x161   :  { %v323_v58 = vmul.f32 %v1392_v59, %v322_v55 }
 0x162   :  { %v342_v48 = vmul.f32 %v1394_v42, %v341_v41 }
 0x163   :  { %v1396_v56 = vpop.eup %1395  ;;  %v324_v51 = vadd.f32 %v1392_v59, %v323_v58 }
 0x164   :  { %v343_v62 = vadd.f32 %v1394_v42, %v342_v48  ;;  %v360_v44 = vmul.f32 %v1396_v56, %v358_v45  ;;  %v1398_v38 = vpop.eup %1397  ;;  %vm365_vm4 = vweird.f32 %v1396_v56  ;;  %v370_v48 = vand.u32 2147483648, %v358_v45 }
 0x165   :  { %v328_v2 = vsel %vm327_vm0, %v1392_v59, %v324_v51  ;;  %v368_v51 = vand.u32 2147483647, %v358_v45  ;;  %vm366_vm6 = vmor %vm364_vm5, %vm365_vm4 }
 0x166   :  { %v333_v40 = vsel %vm330_vm2, %v332_v46, %v328_v2  ;;  %v347_v55 = vsel %vm346_vm1, %v1394_v42, %v343_v62  ;;  %v361_v37 = vsub.f32 1.0, %v360_v44  ;;  %v371_v59 = vor.u32 1.1754944e-38, %v370_v48 }
 0x167   :  { %v352_v41 = vsel %vm349_vm3, %v351_v57, %v347_v55  ;;  %v375_v36 = vmul.f32 %v1398_v38, %v333_v40  ;;  %vm369_vm7 = vcmp.eq.f32.partialorder %v368_v51, 8.507059e+37  ;;  %v1322_v40 = vld [vmem:[%s2878_s0 + $0x50] sm:$0xff] }
 0x168   :  { %v374_v34 = vmul.f32 %v352_v41, %v2101_v63  ;;  %v362_v58 = vmul.f32 %v1396_v56, %v361_v37 }
 0x16a   :  { %v2184_v50 = vadd.f32 %v375_v36, %v374_v34  ;;  %v363_v52 = vadd.f32 %v1396_v56, %v362_v58 }
 0x16c   :  { %1399 = vtanh.f32 %v2184_v50  ;;  %v367_v61 = vsel %vm366_vm6, %v1396_v56, %v363_v52 }
 0x16d   :  { %v372_v42 = vsel %vm369_vm7, %v371_v59, %v367_v61 }
 0x172   :  { %v1400_v49 = vpop.eup %1399 }
 0x173   :  { %v378_v54 = vmul.f32 %v1400_v49, %v372_v42 }
 0x175   :  { %1319 = vst [vmem:[%s2879_s2 + $0x8] sm:$0xff] %v378_v54  ;;  %402 = vmatmul.f32.vlgmr.msra.gmra.mxu0 %v378_v54  ;;  %422 = vmatmul.f32.vlgmr.msra.gmra.mxu1 %v378_v54 }
 0x176   :  { %442 = vmatmul.f32.vlgmr.msra.gmra.mxu2 %v378_v54  ;;  %462 = vmatmul.f32.vlgmr.msra.gmra.mxu3 %v378_v54 }
 0x177   :  { %694 = vmatpush.msra.mxu0 %v1580_v0  ;;  %714 = vmatpush.msra.mxu1 %v1585_v1  ;;  %v3040_v0 = vld [vmem:[#allocation16_spill] sm:$0xff]  ;;  %v3041_v1 = vld [vmem:[#allocation3_spill] sm:$0xff] }
 0x178   :  { %734 = vmatpush.msra.mxu2 %v1677_v17  ;;  %754 = vmatpush.msra.mxu3 %v3013_v60  ;;  %v3056_v17 = vld [vmem:[#allocation26_spill] sm:$0xff] }
 0x179   :  { %695 = vmatpush.msra.mxu0 %v1597_v3  ;;  %715 = vmatpush.msra.mxu1 %v1602_v4  ;;  %v3042_v3 = vld [vmem:[#allocation4_spill] sm:$0xff]  ;;  %v3043_v4 = vld [vmem:[#allocation5_spill] sm:$0xff] }
 0x17a   :  { %735 = vmatpush.msra.mxu2 %v1689_v19  ;;  %755 = vmatpush.msra.mxu3 %v1607_v5  ;;  %v3044_v5 = vld [vmem:[#allocation20_spill] sm:$0xff]  ;;  %v3058_v19 = vld [vmem:[#allocation17_spill] sm:$0xff] }
 0x17b   :  { %696 = vmatpush.msra.mxu0 %v1613_v6  ;;  %716 = vmatpush.msra.mxu1 %v1618_v7  ;;  %v3045_v6 = vld [vmem:[#allocation6_spill] sm:$0xff]  ;;  %v3046_v7 = vld [vmem:[#allocation7_spill] sm:$0xff] }
 0x17c   :  { %736 = vmatpush.msra.mxu2 %v1713_v23  ;;  %756 = vmatpush.msra.mxu3 %v1625_v8  ;;  %v3047_v8 = vld [vmem:[#allocation8_spill] sm:$0xff]  ;;  %v3062_v23 = vld [vmem:[#allocation21_spill] sm:$0xff] }
 0x17d   :  { %697 = vmatpush.msra.mxu0 %v1631_v9  ;;  %717 = vmatpush.msra.mxu1 %v1636_v10  ;;  %v3048_v9 = vld [vmem:[#allocation24_spill] sm:$0xff]  ;;  %v3049_v10 = vld [vmem:[#allocation9_spill] sm:$0xff] }
 0x17e   :  { %737 = vmatpush.msra.mxu2 %v1737_v27  ;;  %757 = vmatpush.msra.mxu3 %v1643_v11  ;;  %v3050_v11 = vld [vmem:[#allocation10_spill] sm:$0xff] }
 0x17f   :  { %698 = vmatpush.msra.mxu0 %v1649_v12  ;;  %718 = vmatpush.msra.mxu1 %v1654_v13  ;;  %v3051_v12 = vld [vmem:[#allocation11_spill] sm:$0xff]  ;;  %v3052_v13 = vld [vmem:[#allocation25_spill] sm:$0xff]  ;;  %v1320_v27 = vld [vmem:[%s2878_s0 + $0x40] sm:$0xff] }
 0x180   :  { %738 = vmatpush.msra.mxu2 %v1761_v31  ;;  %758 = vmatpush.msra.mxu3 %v1661_v14  ;;  %v3053_v14 = vld [vmem:[#allocation12_spill] sm:$0xff] }
 0x181   :  { %699 = vmatpush.msra.mxu0 %v1667_v15  ;;  %719 = vmatpush.msra.mxu1 %v1672_v16  ;;  %v3054_v15 = vld [vmem:[#allocation13_spill] sm:$0xff]  ;;  %v3055_v16 = vld [vmem:[#allocation14_spill] sm:$0xff] }
 0x182   :  { %739 = vmatpush.msra.mxu2 %v1785_v35  ;;  %759 = vmatpush.msra.mxu3 %v1684_v18  ;;  %v3057_v18 = vld [vmem:[#allocation15_spill] sm:$0xff] }
 0x183   :  { %700 = vmatpush.msra.mxu0 %v1695_v20  ;;  %720 = vmatpush.msra.mxu1 %v1700_v21  ;;  %v3059_v20 = vld [vmem:[#allocation18_spill] sm:$0xff]  ;;  %v3060_v21 = vld [vmem:[#allocation27_spill] sm:$0xff] }
 0x184   :  { %740 = vmatpush.msra.mxu2 %v1809_v39  ;;  %760 = vmatpush.msra.mxu3 %v1708_v22  ;;  %v3061_v22 = vld [vmem:[#allocation19_spill] sm:$0xff]  ;;  %v1323_v39 = vld [vmem:[%s2878_s0 + $0x58] sm:$0xff] }
 0x185   :  { %701 = vmatpush.msra.mxu0 %v1719_v24  ;;  %721 = vmatpush.msra.mxu1 %v1724_v25  ;;  %v3063_v24 = vld [vmem:[#allocation22_spill] sm:$0xff]  ;;  %v3064_v25 = vld [vmem:[#allocation28_spill] sm:$0xff] }
 0x186   :  { %741 = vmatpush.msra.mxu2 %v1833_v43  ;;  %761 = vmatpush.msra.mxu3 %v1732_v26  ;;  %v3065_v26 = vld [vmem:[#allocation23_spill] sm:$0xff] }
 0x187   :  { %702 = vmatpush.msra.mxu0 %v1743_v28  ;;  %722 = vmatpush.msra.mxu1 %v1748_v29  ;;  %v1321_v28 = vld [vmem:[%s2878_s0 + $0x48] sm:$0xff] }
 0x188   :  { %742 = vmatpush.msra.mxu2 %v1857_v47  ;;  %762 = vmatpush.msra.mxu3 %v1756_v30 }
 0x189   :  { %703 = vmatpush.msra.mxu0 %v1767_v32  ;;  %723 = vmatpush.msra.mxu1 %v1772_v33 }
 0x18a   :  { %743 = vmatpush.msra.mxu2 %v3040_v0  ;;  %763 = vmatpush.msra.mxu3 %v3041_v1 }
 0x18b   :  { %704 = vmatpush.msra.mxu0 %v3042_v3  ;;  %724 = vmatpush.msra.mxu1 %v3043_v4 }
 0x18c   :  { %744 = vmatpush.msra.mxu2 %v3044_v5  ;;  %764 = vmatpush.msra.mxu3 %v3045_v6 }
 0x18d   :  { %705 = vmatpush.msra.mxu0 %v3046_v7  ;;  %725 = vmatpush.msra.mxu1 %v3047_v8 }
 0x18e   :  { %745 = vmatpush.msra.mxu2 %v3048_v9  ;;  %765 = vmatpush.msra.mxu3 %v3049_v10 }
 0x18f   :  { %706 = vmatpush.msra.mxu0 %v3050_v11  ;;  %726 = vmatpush.msra.mxu1 %v3051_v12 }
 0x190   :  { %746 = vmatpush.msra.mxu2 %v3052_v13  ;;  %766 = vmatpush.msra.mxu3 %v3053_v14 }
 0x191   :  { %707 = vmatpush.msra.mxu0 %v3054_v15  ;;  %727 = vmatpush.msra.mxu1 %v3055_v16 }
 0x192   :  { %747 = vmatpush.msra.mxu2 %v3056_v17  ;;  %767 = vmatpush.msra.mxu3 %v3057_v18 }
 0x193   :  { %708 = vmatpush.msra.mxu0 %v3058_v19  ;;  %728 = vmatpush.msra.mxu1 %v3059_v20 }
 0x194   :  { %748 = vmatpush.msra.mxu2 %v3060_v21  ;;  %768 = vmatpush.msra.mxu3 %v3061_v22  ;;  %v2282_v21 = vld [vmem:[%s2877_s1 + $0x1e8] sm:$0xff]  ;;  %v2288_v22 = vld [vmem:[%s2877_s1 + $0x1f0] sm:$0xff] }
 0x195   :  { %709 = vmatpush.msra.mxu0 %v3062_v23  ;;  %729 = vmatpush.msra.mxu1 %v3063_v24  ;;  %v2294_v23 = vld [vmem:[%s2877_s1 + $0x1f8] sm:$0xff]  ;;  %v2300_v24 = vld [vmem:[%s2877_s1 + $0x1c0] sm:$0xff] }
 0x196   :  { %749 = vmatpush.msra.mxu2 %v3064_v25  ;;  %769 = vmatpush.msra.mxu3 %v3065_v26  ;;  %v2306_v25 = vld [vmem:[%s2877_s1 + $0x1c8] sm:$0xff]  ;;  %v2312_v26 = vld [vmem:[%s2877_s1 + $0x1d0] sm:$0xff] }
 0x1f2   :  { %v403_v29 = vpop.f32.mrf.mxu0  ;;  %v423_v30 = vpop.f32.mrf.mxu1 }
 0x1f3   :  { %v466_v31 = vadd.f32 %v1320_v27, %v403_v29  ;;  %v467_v32 = vadd.f32 %v1321_v28, %v423_v30  ;;  %v2318_v27 = vld [vmem:[%s2877_s1 + $0x1d8] sm:$0xff]  ;;  %v2324_v28 = vld [vmem:[%s2877_s1 + $0x1a0] sm:$0xff]  ;;  %v2330_v29 = vld [vmem:[%s2877_s1 + $0x1a8] sm:$0xff] }
 0x1f4   :  { %v2336_v30 = vld [vmem:[%s2877_s1 + $0x1b0] sm:$0xff] }
 0x1f5   :  { %v1324_v33 = vmul.f32 -1.442695, %v466_v31  ;;  %v1325_v35 = vmul.f32 -1.442695, %v467_v32  ;;  %v2342_v31 = vld [vmem:[%s2877_s1 + $0x1b8] sm:$0xff]  ;;  %v2348_v32 = vld [vmem:[%s2877_s1 + $0x180] sm:$0xff] }
 0x1f7   :  { %1401 = vpow2.f32 %v1324_v33  ;;  %v2354_v33 = vld [vmem:[%s2877_s1 + $0x188] sm:$0xff] }
 0x1f8   :  { %1403 = vpow2.f32 %v1325_v35  ;;  %v2360_v35 = vld [vmem:[%s2877_s1 + $0x190] sm:$0xff] }
 0x1f9   :  { %v463_v43 = vpop.f32.mrf.mxu3  ;;  %v443_v56 = vpop.f32.mrf.mxu2 }
 0x1fa   :  { %v469_v47 = vadd.f32 %v1323_v39, %v463_v43  ;;  %v468_v62 = vadd.f32 %v1322_v40, %v443_v56  ;;  %v2366_v39 = vld [vmem:[%s2877_s1 + $0x198] sm:$0xff]  ;;  %v2372_v43 = vld [vmem:[%s2877_s1 + $0x160] sm:$0xff] }
 0x1fb   :  { %v2414_v40 = vld [vmem:[%s2877_s1 + $0x158] sm:$0xff]  ;;  %v2420_v56 = vld [vmem:[%s2877_s1 + $0x120] sm:$0xff] }
 0x1fc   :  { %v1326_v60 = vmul.f32 -1.442695, %v469_v47  ;;  %v2378_v47 = vld [vmem:[%s2877_s1 + $0x168] sm:$0xff] }
 0x1fd   :  { %v1402_v63 = vpop.eup %1401 }
 0x1fe   :  { %v1404_v34 = vpop.eup %1403  ;;  %v473_v36 = vadd.f32 1.0, %v1402_v63  ;;  %1405 = vpow2.f32 %v1326_v60  ;;  %v2384_v60 = vld [vmem:[%s2877_s1 + $0x170] sm:$0xff]  ;;  %v2390_v63 = vld [vmem:[%s2877_s1 + $0x178] sm:$0xff] }
 0x1ff   :  { %v492_v37 = vadd.f32 1.0, %v1404_v34  ;;  %v2396_v34 = vld [vmem:[%s2877_s1 + $0x140] sm:$0xff] }
 0x200   :  { %1407 = vrcp.f32 %v473_v36  ;;  %v485_v41 = vand.u32 2147483648, %v473_v36  ;;  %v483_v48 = vand.u32 2147483647, %v473_v36  ;;  %vm479_vm10 = vweird.f32 %v473_v36 }
 0x201   :  { %1409 = vrcp.f32 %v492_v37  ;;  %v504_v58 = vand.u32 2147483648, %v492_v37  ;;  %v502_v61 = vand.u32 2147483647, %v492_v37  ;;  %vm498_vm11 = vweird.f32 %v492_v37 }
 0x202   :  { %v486_v42 = vor.u32 1.1754944e-38, %v485_v41  ;;  %vm484_vm14 = vcmp.eq.f32.partialorder %v483_v48, 8.507059e+37  ;;  %v2480_v41 = vld [vmem:[%s2877_s1 + $0xf0] sm:$0xff]  ;;  %v2498_v48 = vld [vmem:[%s2877_s1 + $0xc8] sm:$0xff] }
 0x203   :  { %v505_v1 = vor.u32 1.1754944e-38, %v504_v58  ;;  %vm503_vm15 = vcmp.eq.f32.partialorder %v502_v61, 8.507059e+37  ;;  %v2486_v58 = vld [vmem:[%s2877_s1 + $0xf8] sm:$0xff] }
 0x204   :  { %v1406_v45 = vpop.eup %1405  ;;  %v2510_v61 = vld [vmem:[%s2877_s1 + $0xd8] sm:$0xff] }
 0x205   :  { %v512_v53 = vadd.f32 1.0, %v1406_v45  ;;  %v2426_v45 = vld [vmem:[%s2877_s1 + $0x128] sm:$0xff]  ;;  %3067 = vst [vmem:[#allocation16_spill] sm:$0xff] %v2510_v61 }
 0x206   :  { %v1408_v46 = vpop.eup %1407 }
 0x207   :  { %v1410_v44 = vpop.eup %1409  ;;  %v475_v57 = vmul.f32 %v1408_v46, %v473_v36  ;;  %1411 = vrcp.f32 %v512_v53  ;;  %vm480_vm8 = vweird.f32 %v1408_v46  ;;  %v524_v14 = vand.u32 2147483648, %v512_v53  ;;  %v2402_v36 = vld [vmem:[%s2877_s1 + $0x148] sm:$0xff] }
 0x208   :  { %v494_v2 = vmul.f32 %v1410_v44, %v492_v37  ;;  %1413 = vtanh.f32 %v468_v62  ;;  %vm499_vm9 = vweird.f32 %v1410_v44  ;;  %vm481_vm12 = vmor %vm479_vm10, %vm480_vm8  ;;  %vm518_vm1 = vweird.f32 %v512_v53  ;;  %v2408_v37 = vld [vmem:[%s2877_s1 + $0x150] sm:$0xff]  ;;  %v2444_v62 = vld [vmem:[%s2877_s1 + $0x100] sm:$0xff] }
 0x209   :  { %v476_v38 = vsub.f32 1.0, %v475_v57  ;;  %vm500_vm13 = vmor %vm498_vm11, %vm499_vm9  ;;  %v522_v15 = vand.u32 2147483647, %v512_v53  ;;  %v525_v17 = vor.u32 1.1754944e-38, %v524_v14  ;;  %v2456_v57 = vld [vmem:[%s2877_s1 + $0x110] sm:$0xff]  ;;  %v2612_v14 = vld [vmem:[%s2877_s1 + $0x20] sm:$0xff] }
 0x20a   :  { %v495_v55 = vsub.f32 1.0, %v494_v2  ;;  %v2462_v2 = vld [vmem:[%s2877_s1 + $0x118] sm:$0xff]  ;;  %3084 = vst [vmem:[#allocation15_spill] sm:$0xff] %v2612_v14 }
 0x20b   :  { %v477_v52 = vmul.f32 %v1408_v46, %v476_v38  ;;  %vm523_vm3 = vcmp.eq.f32.partialorder %v522_v15, 8.507059e+37  ;;  %v2468_v38 = vld [vmem:[%s2877_s1 + $0xe0] sm:$0xff]  ;;  %v2618_v15 = vld [vmem:[%s2877_s1 + $0x28] sm:$0xff] }
 0x20c   :  { %v496_v51 = vmul.f32 %v1410_v44, %v495_v55  ;;  %v2474_v55 = vld [vmem:[%s2877_s1 + $0xe8] sm:$0xff]  ;;  %3085 = vst [vmem:[#allocation17_spill] sm:$0xff] %v2618_v15 }
 0x20d   :  { %v1412_v59 = vpop.eup %1411  ;;  %v478_v49 = vadd.f32 %v1408_v46, %v477_v52  ;;  %v2492_v52 = vld [vmem:[%s2877_s1 + $0xc0] sm:$0xff] }
 0x20e   :  { %v497_v54 = vadd.f32 %v1410_v44, %v496_v51  ;;  %v514_v0 = vmul.f32 %v1412_v59, %v512_v53  ;;  %v1414_v4 = vpop.eup %1413  ;;  %vm519_vm0 = vweird.f32 %v1412_v59  ;;  %v2432_v53 = vld [vmem:[%s2877_s1 + $0x130] sm:$0xff] }
 0x20f   :  { %v482_v3 = vsel %vm481_vm12, %v1408_v46, %v478_v49  ;;  %vm520_vm2 = vmor %vm518_vm1, %vm519_vm0  ;;  %v2438_v46 = vld [vmem:[%s2877_s1 + $0x138] sm:$0xff]  ;;  %v2504_v51 = vld [vmem:[%s2877_s1 + $0xd0] sm:$0xff] }
 0x210   :  { %v487_v5 = vsel %vm484_vm14, %v486_v42, %v482_v3  ;;  %v501_v6 = vsel %vm500_vm13, %v1410_v44, %v497_v54  ;;  %v515_v7 = vsub.f32 1.0, %v514_v0  ;;  %v2450_v44 = vld [vmem:[%s2877_s1 + $0x108] sm:$0xff]  ;;  %3066 = vst [vmem:[#allocation2_spill] sm:$0xff] %v2504_v51  ;;  %v2528_v42 = vld [vmem:[%s2877_s1 + $0xb0] sm:$0xff]  ;;  %v2534_v54 = vld [vmem:[%s2877_s1 + $0xb8] sm:$0xff] }
 0x211   :  { %v506_v8 = vsel %vm503_vm15, %v505_v1, %v501_v6  ;;  %v529_v9 = vmul.f32 %v1414_v4, %v487_v5  ;;  %v2522_v49 = vld [vmem:[%s2877_s1 + $0xa8] sm:$0xff]  ;;  %3070 = vst [vmem:[#allocation5_spill] sm:$0xff] %v2528_v42  ;;  %v2540_v0 = vld [vmem:[%s2877_s1 + $0x80] sm:$0xff]  ;;  %v2552_v3 = vld [vmem:[%s2877_s1 + $0x90] sm:$0xff] }
 0x212   :  { %v528_v10 = vmul.f32 %v506_v8, %v2184_v50  ;;  %v516_v11 = vmul.f32 %v1412_v59, %v515_v7  ;;  %v2276_v50 = vld [vmem:[%s2877_s1 + $0x1e0] sm:$0xff]  ;;  %3069 = vst [vmem:[#allocation4_spill] sm:$0xff] %v2522_v49  ;;  %v2546_v1 = vld [vmem:[%s2877_s1 + $0x88] sm:$0xff]  ;;  %v2558_v4 = vld [vmem:[%s2877_s1 + $0x98] sm:$0xff] }
 0x213   :  { %3071 = vst [vmem:[#allocation20_spill] sm:$0xff] %v2534_v54  ;;  %v2564_v5 = vld [vmem:[%s2877_s1 + $0x60] sm:$0xff]  ;;  %v2570_v6 = vld [vmem:[%s2877_s1 + $0x68] sm:$0xff]  ;;  %v2576_v7 = vld [vmem:[%s2877_s1 + $0x70] sm:$0xff] }
 0x214   :  { %v2267_v12 = vadd.f32 %v529_v9, %v528_v10  ;;  %v517_v13 = vadd.f32 %v1412_v59, %v516_v11  ;;  %3072 = vst [vmem:[#allocation6_spill] sm:$0xff] %v2540_v0  ;;  %v2582_v8 = vld [vmem:[%s2877_s1 + $0x78] sm:$0xff]  ;;  %v2588_v9 = vld [vmem:[%s2877_s1 + $0x40] sm:$0xff]  ;;  %v2594_v10 = vld [vmem:[%s2877_s1 + $0x48] sm:$0xff] }
 0x215   :  { %3073 = vst [vmem:[#allocation7_spill] sm:$0xff] %v2546_v1  ;;  %v2600_v11 = vld [vmem:[%s2877_s1 + $0x50] sm:$0xff] }
 0x216   :  { %1415 = vtanh.f32 %v2267_v12  ;;  %v521_v16 = vsel %vm520_vm2, %v1412_v59, %v517_v13  ;;  %v2516_v59 = vld [vmem:[%s2877_s1 + $0xa0] sm:$0xff]  ;;  %3074 = vst [vmem:[#allocation8_spill] sm:$0xff] %v2552_v3  ;;  %v2606_v13 = vld [vmem:[%s2877_s1 + $0x58] sm:$0xff] }
 0x217   :  { %v526_v19 = vsel %vm523_vm3, %v525_v17, %v521_v16  ;;  %3068 = vst [vmem:[#allocation3_spill] sm:$0xff] %v2516_v59  ;;  %v2624_v16 = vld [vmem:[%s2877_s1 + $0x30] sm:$0xff]  ;;  %v2630_v17 = vld [vmem:[%s2877_s1 + $0x38] sm:$0xff] }
 0x218   :  { %3075 = vst [vmem:[#allocation24_spill] sm:$0xff] %v2558_v4 }
 0x219   :  { %3076 = vst [vmem:[#allocation9_spill] sm:$0xff] %v2564_v5 }
 0x21a   :  { %3077 = vst [vmem:[#allocation10_spill] sm:$0xff] %v2570_v6 }
 0x21b   :  { %3078 = vst [vmem:[#allocation11_spill] sm:$0xff] %v2576_v7 }
 0x21c   :  { %v1416_v18 = vpop.eup %1415  ;;  %3079 = vst [vmem:[#allocation25_spill] sm:$0xff] %v2582_v8 }
 0x21d   :  { %v532_v20 = vmul.f32 %v1416_v18, %v526_v19  ;;  %3080 = vst [vmem:[#allocation12_spill] sm:$0xff] %v2588_v9  ;;  %v2636_v18 = vld [vmem:[%s2877_s1] sm:$0xff]  ;;  %v2642_v19 = vld [vmem:[%s2877_s1 + $0x8] sm:$0xff] }
 0x21e   :  { %3081 = vst [vmem:[#allocation13_spill] sm:$0xff] %v2594_v10 }
 0x21f   :  { %1327 = vst [vmem:[%s2879_s2 + $0x10] sm:$0xff] %v532_v20  ;;  %556 = vmatmul.f32.vlgmr.msrb.gmra.mxu0 %v532_v20  ;;  %576 = vmatmul.f32.vlgmr.msrb.gmra.mxu1 %v532_v20 }
 0x220   :  { %596 = vmatmul.f32.vlgmr.msrb.gmra.mxu2 %v532_v20  ;;  %616 = vmatmul.f32.vlgmr.msrb.gmra.mxu3 %v532_v20  ;;  %3082 = vst [vmem:[#allocation14_spill] sm:$0xff] %v2600_v11  ;;  %v2648_v20 = vld [vmem:[%s2877_s1 + $0x10] sm:$0xff] }
 0x221   :  { %848 = vmatpush.msrb.mxu0 %v2276_v50  ;;  %868 = vmatpush.msrb.mxu1 %v2282_v21  ;;  %3083 = vst [vmem:[#allocation26_spill] sm:$0xff] %v2606_v13 }
 0x222   :  { %888 = vmatpush.msrb.mxu2 %v2288_v22  ;;  %908 = vmatpush.msrb.mxu3 %v2294_v23  ;;  %3086 = vst [vmem:[#allocation18_spill] sm:$0xff] %v2624_v16 }
 0x223   :  { %849 = vmatpush.msrb.mxu0 %v2300_v24  ;;  %869 = vmatpush.msrb.mxu1 %v2306_v25  ;;  %3087 = vst [vmem:[#allocation27_spill] sm:$0xff] %v2630_v17 }
 0x224   :  { %889 = vmatpush.msrb.mxu2 %v2312_v26  ;;  %909 = vmatpush.msrb.mxu3 %v2318_v27  ;;  %3088 = vst [vmem:[#allocation19_spill] sm:$0xff] %v2636_v18 }
 0x225   :  { %850 = vmatpush.msrb.mxu0 %v2324_v28  ;;  %870 = vmatpush.msrb.mxu1 %v2330_v29  ;;  %3089 = vst [vmem:[#allocation21_spill] sm:$0xff] %v2642_v19 }
 0x226   :  { %890 = vmatpush.msrb.mxu2 %v2336_v30  ;;  %910 = vmatpush.msrb.mxu3 %v2342_v31  ;;  %3090 = vst [vmem:[#allocation22_spill] sm:$0xff] %v2648_v20 }
 0x227   :  { %851 = vmatpush.msrb.mxu0 %v2348_v32  ;;  %871 = vmatpush.msrb.mxu1 %v2354_v33 }
 0x228   :  { %891 = vmatpush.msrb.mxu2 %v2360_v35  ;;  %911 = vmatpush.msrb.mxu3 %v2366_v39 }
 0x229   :  { %852 = vmatpush.msrb.mxu0 %v2372_v43  ;;  %872 = vmatpush.msrb.mxu1 %v2378_v47 }
 0x22a   :  { %892 = vmatpush.msrb.mxu2 %v2384_v60  ;;  %912 = vmatpush.msrb.mxu3 %v2390_v63 }
 0x22b   :  { %853 = vmatpush.msrb.mxu0 %v2396_v34  ;;  %873 = vmatpush.msrb.mxu1 %v2402_v36 }
 0x22c   :  { %893 = vmatpush.msrb.mxu2 %v2408_v37  ;;  %913 = vmatpush.msrb.mxu3 %v2414_v40 }
 0x22d   :  { %854 = vmatpush.msrb.mxu0 %v2420_v56  ;;  %874 = vmatpush.msrb.mxu1 %v2426_v45 }
 0x22e   :  { %894 = vmatpush.msrb.mxu2 %v2432_v53  ;;  %914 = vmatpush.msrb.mxu3 %v2438_v46 }
 0x22f   :  { %855 = vmatpush.msrb.mxu0 %v2444_v62  ;;  %875 = vmatpush.msrb.mxu1 %v2450_v44 }
 0x230   :  { %895 = vmatpush.msrb.mxu2 %v2456_v57  ;;  %915 = vmatpush.msrb.mxu3 %v2462_v2 }
 0x231   :  { %856 = vmatpush.msrb.mxu0 %v2468_v38  ;;  %876 = vmatpush.msrb.mxu1 %v2474_v55 }
 0x232   :  { %896 = vmatpush.msrb.mxu2 %v2480_v41  ;;  %916 = vmatpush.msrb.mxu3 %v2486_v58 }
 0x233   :  { %857 = vmatpush.msrb.mxu0 %v2492_v52  ;;  %877 = vmatpush.msrb.mxu1 %v2498_v48 }
 0x234   :  { %897 = vmatpush.msrb.mxu2 %v2504_v51  ;;  %917 = vmatpush.msrb.mxu3 %v2510_v61 }
 0x235   :  { %858 = vmatpush.msrb.mxu0 %v2516_v59  ;;  %878 = vmatpush.msrb.mxu1 %v2522_v49 }
 0x236   :  { %898 = vmatpush.msrb.mxu2 %v2528_v42  ;;  %918 = vmatpush.msrb.mxu3 %v2534_v54 }
 0x237   :  { %859 = vmatpush.msrb.mxu0 %v2540_v0  ;;  %879 = vmatpush.msrb.mxu1 %v2546_v1 }
 0x238   :  { %899 = vmatpush.msrb.mxu2 %v2552_v3  ;;  %919 = vmatpush.msrb.mxu3 %v2558_v4 }
 0x239   :  { %860 = vmatpush.msrb.mxu0 %v2564_v5  ;;  %880 = vmatpush.msrb.mxu1 %v2570_v6 }
 0x23a   :  { %900 = vmatpush.msrb.mxu2 %v2576_v7  ;;  %920 = vmatpush.msrb.mxu3 %v2582_v8 }
 0x23b   :  { %861 = vmatpush.msrb.mxu0 %v2588_v9  ;;  %881 = vmatpush.msrb.mxu1 %v2594_v10  ;;  %v1331_v10 = vld [vmem:[%s2878_s0 + $0x78] sm:$0xff] }
 0x23c   :  { %901 = vmatpush.msrb.mxu2 %v2600_v11  ;;  %921 = vmatpush.msrb.mxu3 %v2606_v13 }
 0x23d   :  { %862 = vmatpush.msrb.mxu0 %v2612_v14  ;;  %882 = vmatpush.msrb.mxu1 %v2618_v15 }
 0x23e   :  { %902 = vmatpush.msrb.mxu2 %v2624_v16  ;;  %922 = vmatpush.msrb.mxu3 %v2630_v17  ;;  %v2654_v17 = vld [vmem:[%s2877_s1 + $0x18] sm:$0xff] }
 0x23f   :  { %863 = vmatpush.msrb.mxu0 %v2636_v18  ;;  %883 = vmatpush.msrb.mxu1 %v2642_v19  ;;  %3091 = vst [vmem:[#allocation28_spill] sm:$0xff] %v2654_v17  ;;  %v1328_v18 = vld [vmem:[%s2878_s0 + $0x60] sm:$0xff]  ;;  %v1329_v19 = vld [vmem:[%s2878_s0 + $0x68] sm:$0xff] }
 0x240   :  { %903 = vmatpush.msrb.mxu2 %v2648_v20  ;;  %923 = vmatpush.msrb.mxu3 %v2654_v17 }
 0x29c   :  { %v557_v16 = vpop.f32.mrf.mxu0  ;;  %v577_v15 = vpop.f32.mrf.mxu1 }
 0x29d   :  { %v620_v14 = vadd.f32 %v1328_v18, %v557_v16  ;;  %v621_v13 = vadd.f32 %v1329_v19, %v577_v15 }
 0x29f   :  { %v1332_v20 = vmul.f32 -1.442695, %v620_v14  ;;  %v1333_v11 = vmul.f32 -1.442695, %v621_v13  ;;  %v1330_v13 = vld [vmem:[%s2878_s0 + $0x70] sm:$0xff] }
 0x2a1   :  { %1417 = vpow2.f32 %v1332_v20 }
 0x2a2   :  { %1419 = vpow2.f32 %v1333_v11 }
 0x2a3   :  { %v617_v17 = vpop.f32.mrf.mxu3  ;;  %v597_v14 = vpop.f32.mrf.mxu2 }
 0x2a4   :  { %v623_v9 = vadd.f32 %v1331_v10, %v617_v17  ;;  %v622_v19 = vadd.f32 %v1330_v13, %v597_v14 }
 0x2a6   :  { %v1334_v8 = vmul.f32 -1.442695, %v623_v9 }
 0x2a7   :  { %v1418_v7 = vpop.eup %1417 }
 0x2a8   :  { %v1420_v6 = vpop.eup %1419  ;;  %v627_v5 = vadd.f32 1.0, %v1418_v7  ;;  %1421 = vpow2.f32 %v1334_v8 }
 0x2a9   :  { %v646_v4 = vadd.f32 1.0, %v1420_v6 }
 0x2aa   :  { %1423 = vrcp.f32 %v627_v5  ;;  %v639_v7 = vand.u32 2147483648, %v627_v5  ;;  %v637_v3 = vand.u32 2147483647, %v627_v5  ;;  %vm633_vm6 = vweird.f32 %v627_v5 }
 0x2ab   :  { %1425 = vrcp.f32 %v646_v4  ;;  %v658_v6 = vand.u32 2147483648, %v646_v4  ;;  %v656_v0 = vand.u32 2147483647, %v646_v4  ;;  %vm652_vm7 = vweird.f32 %v646_v4 }
 0x2ac   :  { %v640_v13 = vor.u32 1.1754944e-38, %v639_v7  ;;  %vm638_vm10 = vcmp.eq.f32.partialorder %v637_v3, 8.507059e+37 }
 0x2ad   :  { %vm657_vm11 = vcmp.eq.f32.partialorder %v656_v0, 8.507059e+37 }
 0x2ae   :  { %v1422_v15 = vpop.eup %1421 }
 0x2af   :  { %v666_v16 = vadd.f32 1.0, %v1422_v15 }
 0x2b0   :  { %v1424_v18 = vpop.eup %1423 }
 0x2b1   :  { %v1426_v11 = vpop.eup %1425  ;;  %v629_v20 = vmul.f32 %v1424_v18, %v627_v5  ;;  %1427 = vrcp.f32 %v666_v16  ;;  %vm634_vm4 = vweird.f32 %v1424_v18  ;;  %vm672_vm13 = vweird.f32 %v666_v16 }
 0x2b2   :  { %v648_v9 = vmul.f32 %v1426_v11, %v646_v4  ;;  %1429 = vtanh.f32 %v622_v19  ;;  %vm653_vm5 = vweird.f32 %v1426_v11  ;;  %vm635_vm8 = vmor %vm633_vm6, %vm634_vm4 }
 0x2b3   :  { %v630_v10 = vsub.f32 1.0, %v629_v20  ;;  %vm654_vm9 = vmor %vm652_vm7, %vm653_vm5  ;;  %v659_v20 = vor.u32 1.1754944e-38, %v658_v6  ;;  %v3099_v6 = vld [vmem:[#allocation7_spill] sm:$0xff] }
 0x2b4   :  { %v649_v17 = vsub.f32 1.0, %v648_v9 }
 0x2b5   :  { %v631_v8 = vmul.f32 %v1424_v18, %v630_v10 }
 0x2b6   :  { %v650_v1 = vmul.f32 %v1426_v11, %v649_v17 }
 0x2b7   :  { %v1428_v54 = vpop.eup %1427  ;;  %v632_v42 = vadd.f32 %v1424_v18, %v631_v8 }
 0x2b8   :  { %v651_v14 = vadd.f32 %v1426_v11, %v650_v1  ;;  %v668_v15 = vmul.f32 %v1428_v54, %v666_v16  ;;  %v1430_v19 = vpop.eup %1429  ;;  %vm673_vm12 = vweird.f32 %v1428_v54  ;;  %v678_v1 = vand.u32 2147483648, %v666_v16 }
 0x2b9   :  { %v636_v9 = vsel %vm635_vm8, %v1424_v18, %v632_v42  ;;  %v676_v42 = vand.u32 2147483647, %v666_v16  ;;  %vm674_vm14 = vmor %vm672_vm13, %vm673_vm12  ;;  %v3098_v16 = vld [vmem:[#allocation6_spill] sm:$0xff] }
 0x2ba   :  { %v641_v49 = vsel %vm638_vm10, %v640_v13, %v636_v9  ;;  %v655_v10 = vsel %vm654_vm9, %v1426_v11, %v651_v14  ;;  %v669_v59 = vsub.f32 1.0, %v668_v15  ;;  %v679_v18 = vor.u32 1.1754944e-38, %v678_v1  ;;  %v3100_v13 = vld [vmem:[#allocation8_spill] sm:$0xff]  ;;  %v3102_v15 = vld [vmem:[#allocation9_spill] sm:$0xff]  ;;  %v3104_v9 = vld [vmem:[#allocation11_spill] sm:$0xff] }
 0x2bb   :  { %v660_v17 = vsel %vm657_vm11, %v659_v20, %v655_v10  ;;  %v683_v61 = vmul.f32 %v1430_v19, %v641_v49  ;;  %vm677_vm15 = vcmp.eq.f32.partialorder %v676_v42, 8.507059e+37  ;;  %v3096_v49 = vld [vmem:[#allocation5_spill] sm:$0xff]  ;;  %v3101_v14 = vld [vmem:[#allocation24_spill] sm:$0xff]  ;;  %v3103_v20 = vld [vmem:[#allocation10_spill] sm:$0xff] }
 0x2bc   :  { %v682_v51 = vmul.f32 %v660_v17, %v2267_v12  ;;  %v670_v8 = vmul.f32 %v1428_v54, %v669_v59  ;;  %v3092_v12 = vld [vmem:[#allocation2_spill] sm:$0xff]  ;;  %v3095_v59 = vld [vmem:[#allocation4_spill] sm:$0xff]  ;;  %v3105_v19 = vld [vmem:[#allocation25_spill] sm:$0xff] }
 0x2bd   :  { %v3106_v10 = vld [vmem:[#allocation12_spill] sm:$0xff]  ;;  %v3107_v17 = vld [vmem:[#allocation13_spill] sm:$0xff]  ;;  %v3110_v1 = vld [vmem:[#allocation15_spill] sm:$0xff] }
 0x2be   :  { %v2670_v5 = vadd.f32 %v683_v61, %v682_v51  ;;  %v671_v4 = vadd.f32 %v1428_v54, %v670_v8  ;;  %v3093_v51 = vld [vmem:[#allocation16_spill] sm:$0xff]  ;;  %v3094_v61 = vld [vmem:[#allocation3_spill] sm:$0xff]  ;;  %v3108_v8 = vld [vmem:[#allocation14_spill] sm:$0xff] }
 0x2bf   :  { %v3111_v42 = vld [vmem:[#allocation17_spill] sm:$0xff] }
 0x2c0   :  { %1431 = vtanh.f32 %v2670_v5  ;;  %v675_v3 = vsel %vm674_vm14, %v1428_v54, %v671_v4  ;;  %v3097_v54 = vld [vmem:[#allocation20_spill] sm:$0xff]  ;;  %v3109_v4 = vld [vmem:[#allocation26_spill] sm:$0xff] }
 0x2c1   :  { %v680_v11 = vsel %vm677_vm15, %v679_v18, %v675_v3  ;;  %v3112_v3 = vld [vmem:[#allocation18_spill] sm:$0xff]  ;;  %v3113_v18 = vld [vmem:[#allocation27_spill] sm:$0xff] }
 0x2c6   :  { %v1432_v0 = vpop.eup %1431 }
 0x2c7   :  { %v686_v7 = vmul.f32 %v1432_v0, %v680_v11  ;;  %v3114_v0 = vld [vmem:[#allocation19_spill] sm:$0xff]  ;;  %v3115_v11 = vld [vmem:[#allocation21_spill] sm:$0xff] }
 0x2c9   :  { %1335 = vst [vmem:[%s2879_s2 + $0x18] sm:$0xff] %v686_v7  ;;  %710 = vmatmul.f32.vlgmr.msra.gmra.mxu0 %v686_v7  ;;  %730 = vmatmul.f32.vlgmr.msra.gmra.mxu1 %v686_v7 }
 0x2ca   :  { %750 = vmatmul.f32.vlgmr.msra.gmra.mxu2 %v686_v7  ;;  %770 = vmatmul.f32.vlgmr.msra.gmra.mxu3 %v686_v7  ;;  %v3116_v7 = vld [vmem:[#allocation22_spill] sm:$0xff] }
 0x2cb   :  { %1002 = vmatpush.msra.mxu0 %v2276_v50  ;;  %1022 = vmatpush.msra.mxu1 %v2282_v21 }
 0x2cc   :  { %1042 = vmatpush.msra.mxu2 %v2288_v22  ;;  %1062 = vmatpush.msra.mxu3 %v2294_v23 }
 0x2cd   :  { %1003 = vmatpush.msra.mxu0 %v2300_v24  ;;  %1023 = vmatpush.msra.mxu1 %v2306_v25 }
 0x2ce   :  { %1043 = vmatpush.msra.mxu2 %v2312_v26  ;;  %1063 = vmatpush.msra.mxu3 %v2318_v27 }
 0x2cf   :  { %1004 = vmatpush.msra.mxu0 %v2324_v28  ;;  %1024 = vmatpush.msra.mxu1 %v2330_v29 }
 0x2d0   :  { %1044 = vmatpush.msra.mxu2 %v2336_v30  ;;  %1064 = vmatpush.msra.mxu3 %v2342_v31 }
 0x2d1   :  { %1005 = vmatpush.msra.mxu0 %v2348_v32  ;;  %1025 = vmatpush.msra.mxu1 %v2354_v33 }
 0x2d2   :  { %1045 = vmatpush.msra.mxu2 %v2360_v35  ;;  %1065 = vmatpush.msra.mxu3 %v2366_v39 }
 0x2d3   :  { %1006 = vmatpush.msra.mxu0 %v2372_v43  ;;  %1026 = vmatpush.msra.mxu1 %v2378_v47 }
 0x2d4   :  { %1046 = vmatpush.msra.mxu2 %v2384_v60  ;;  %1066 = vmatpush.msra.mxu3 %v2390_v63 }
 0x2d5   :  { %1007 = vmatpush.msra.mxu0 %v2396_v34  ;;  %1027 = vmatpush.msra.mxu1 %v2402_v36 }
 0x2d6   :  { %1047 = vmatpush.msra.mxu2 %v2408_v37  ;;  %1067 = vmatpush.msra.mxu3 %v2414_v40 }
 0x2d7   :  { %1008 = vmatpush.msra.mxu0 %v2420_v56  ;;  %1028 = vmatpush.msra.mxu1 %v2426_v45 }
 0x2d8   :  { %1048 = vmatpush.msra.mxu2 %v2432_v53  ;;  %1068 = vmatpush.msra.mxu3 %v2438_v46 }
 0x2d9   :  { %1009 = vmatpush.msra.mxu0 %v2444_v62  ;;  %1029 = vmatpush.msra.mxu1 %v2450_v44 }
 0x2da   :  { %1049 = vmatpush.msra.mxu2 %v2456_v57  ;;  %1069 = vmatpush.msra.mxu3 %v2462_v2 }
 0x2db   :  { %1010 = vmatpush.msra.mxu0 %v2468_v38  ;;  %1030 = vmatpush.msra.mxu1 %v2474_v55 }
 0x2dc   :  { %1050 = vmatpush.msra.mxu2 %v2480_v41  ;;  %1070 = vmatpush.msra.mxu3 %v2486_v58 }
 0x2dd   :  { %1011 = vmatpush.msra.mxu0 %v2492_v52  ;;  %1031 = vmatpush.msra.mxu1 %v2498_v48 }
 0x2de   :  { %1051 = vmatpush.msra.mxu2 %v3092_v12  ;;  %1071 = vmatpush.msra.mxu3 %v3093_v51 }
 0x2df   :  { %1012 = vmatpush.msra.mxu0 %v3094_v61  ;;  %1032 = vmatpush.msra.mxu1 %v3095_v59 }
 0x2e0   :  { %1052 = vmatpush.msra.mxu2 %v3096_v49  ;;  %1072 = vmatpush.msra.mxu3 %v3097_v54 }
 0x2e1   :  { %1013 = vmatpush.msra.mxu0 %v3098_v16  ;;  %1033 = vmatpush.msra.mxu1 %v3099_v6 }
 0x2e2   :  { %1053 = vmatpush.msra.mxu2 %v3100_v13  ;;  %1073 = vmatpush.msra.mxu3 %v3101_v14 }
 0x2e3   :  { %1014 = vmatpush.msra.mxu0 %v3102_v15  ;;  %1034 = vmatpush.msra.mxu1 %v3103_v20 }
 0x2e4   :  { %1054 = vmatpush.msra.mxu2 %v3104_v9  ;;  %1074 = vmatpush.msra.mxu3 %v3105_v19 }
 0x2e5   :  { %1015 = vmatpush.msra.mxu0 %v3106_v10  ;;  %1035 = vmatpush.msra.mxu1 %v3107_v17  ;;  %v3117_v10 = vld [vmem:[#allocation28_spill] sm:$0xff] }
 0x2e6   :  { %1055 = vmatpush.msra.mxu2 %v3108_v8  ;;  %1075 = vmatpush.msra.mxu3 %v3109_v4  ;;  %v1336_v4 = vld [vmem:[%s2878_s0 + $0x80] sm:$0xff] }
 0x2e7   :  { %1016 = vmatpush.msra.mxu0 %v3110_v1  ;;  %1036 = vmatpush.msra.mxu1 %v3111_v42  ;;  %v1337_v42 = vld [vmem:[%s2878_s0 + $0x88] sm:$0xff] }
 0x2e8   :  { %1056 = vmatpush.msra.mxu2 %v3112_v3  ;;  %1076 = vmatpush.msra.mxu3 %v3113_v18 }
 0x2e9   :  { %1017 = vmatpush.msra.mxu0 %v3114_v0  ;;  %1037 = vmatpush.msra.mxu1 %v3115_v11 }
 0x2ea   :  { %1057 = vmatpush.msra.mxu2 %v3116_v7  ;;  %1077 = vmatpush.msra.mxu3 %v3117_v10  ;;  %v1339_v7 = vld [vmem:[%s2878_s0 + $0x98] sm:$0xff] }
 0x346   :  { %v711_v1 = vpop.f32.mrf.mxu0  ;;  %v731_v3 = vpop.f32.mrf.mxu1 }
 0x347   :  { %v774_v8 = vadd.f32 %v1336_v4, %v711_v1  ;;  %v775_v18 = vadd.f32 %v1337_v42, %v731_v3 }
 0x349   :  { %v1340_v17 = vmul.f32 -1.442695, %v774_v8  ;;  %v1341_v0 = vmul.f32 -1.442695, %v775_v18  ;;  %v1338_v8 = vld [vmem:[%s2878_s0 + $0x90] sm:$0xff] }
 0x34b   :  { %1433 = vpow2.f32 %v1340_v17 }
 0x34c   :  { %1435 = vpow2.f32 %v1341_v0 }
 0x34d   :  { %v771_v10 = vpop.f32.mrf.mxu3  ;;  %v751_v17 = vpop.f32.mrf.mxu2 }
 0x34e   :  { %v777_v11 = vadd.f32 %v1339_v7, %v771_v10  ;;  %v776_v3 = vadd.f32 %v1338_v8, %v751_v17 }
 0x350   :  { %v1342_v19 = vmul.f32 -1.442695, %v777_v11 }
 0x351   :  { %v1434_v9 = vpop.eup %1433 }
 0x352   :  { %v1436_v20 = vpop.eup %1435  ;;  %v781_v15 = vadd.f32 1.0, %v1434_v9  ;;  %1437 = vpow2.f32 %v1342_v19 }
 0x353   :  { %v800_v14 = vadd.f32 1.0, %v1436_v20 }
 0x354   :  { %1439 = vrcp.f32 %v781_v15  ;;  %v793_v9 = vand.u32 2147483648, %v781_v15  ;;  %v791_v13 = vand.u32 2147483647, %v781_v15  ;;  %vm787_vm2 = vweird.f32 %v781_v15 }
 0x355   :  { %1441 = vrcp.f32 %v800_v14  ;;  %v812_v20 = vand.u32 2147483648, %v800_v14  ;;  %v810_v16 = vand.u32 2147483647, %v800_v14  ;;  %vm806_vm3 = vweird.f32 %v800_v14 }
 0x356   :  { %v794_v8 = vor.u32 1.1754944e-38, %v793_v9  ;;  %vm792_vm6 = vcmp.eq.f32.partialorder %v791_v13, 8.507059e+37 }
 0x357   :  { %vm811_vm7 = vcmp.eq.f32.partialorder %v810_v16, 8.507059e+37 }
 0x358   :  { %v1438_v4 = vpop.eup %1437 }
 0x359   :  { %v820_v1 = vadd.f32 1.0, %v1438_v4 }
 0x35a   :  { %v1440_v42 = vpop.eup %1439 }
 0x35b   :  { %v1442_v18 = vpop.eup %1441  ;;  %v783_v0 = vmul.f32 %v1440_v42, %v781_v15  ;;  %1443 = vrcp.f32 %v820_v1  ;;  %vm788_vm0 = vweird.f32 %v1440_v42  ;;  %vm826_vm9 = vweird.f32 %v820_v1 }
 0x35c   :  { %v802_v10 = vmul.f32 %v1442_v18, %v800_v14  ;;  %1445 = vtanh.f32 %v776_v3  ;;  %vm807_vm1 = vweird.f32 %v1442_v18  ;;  %vm789_vm4 = vmor %vm787_vm2, %vm788_vm0 }
 0x35d   :  { %v784_v11 = vsub.f32 1.0, %v783_v0  ;;  %vm808_vm5 = vmor %vm806_vm3, %vm807_vm1  ;;  %v813_v0 = vor.u32 1.1754944e-38, %v812_v20 }
 0x35e   :  { %v803_v7 = vsub.f32 1.0, %v802_v10 }
 0x35f   :  { %v785_v19 = vmul.f32 %v1440_v42, %v784_v11 }
 0x360   :  { %v804_v6 = vmul.f32 %v1442_v18, %v803_v7 }
 0x361   :  { %v1444_v54 = vpop.eup %1443  ;;  %v786_v49 = vadd.f32 %v1440_v42, %v785_v19 }
 0x362   :  { %v805_v17 = vadd.f32 %v1442_v18, %v804_v6  ;;  %v822_v4 = vmul.f32 %v1444_v54, %v820_v1  ;;  %v1446_v3 = vpop.eup %1445  ;;  %vm827_vm8 = vweird.f32 %v1444_v54  ;;  %v832_v6 = vand.u32 2147483648, %v820_v1 }
 0x363   :  { %v790_v10 = vsel %vm789_vm4, %v1440_v42, %v786_v49  ;;  %v830_v49 = vand.u32 2147483647, %v820_v1  ;;  %vm828_vm10 = vmor %vm826_vm9, %vm827_vm8 }
 0x364   :  { %v795_v59 = vsel %vm792_vm6, %v794_v8, %v790_v10  ;;  %v809_v11 = vsel %vm808_vm5, %v1442_v18, %v805_v17  ;;  %v823_v61 = vsub.f32 1.0, %v822_v4  ;;  %v833_v42 = vor.u32 1.1754944e-38, %v832_v6 }
 0x365   :  { %v814_v7 = vsel %vm811_vm7, %v813_v0, %v809_v11  ;;  %v837_v51 = vmul.f32 %v1446_v3, %v795_v59  ;;  %vm831_vm11 = vcmp.eq.f32.partialorder %v830_v49, 8.507059e+37  ;;  %v1346_v59 = vld [vmem:[%s2878_s0 + $0xb0] sm:$0xff] }
 0x366   :  { %v836_v12 = vmul.f32 %v814_v7, %v2670_v5  ;;  %v824_v19 = vmul.f32 %v1444_v54, %v823_v61 }
 0x368   :  { %v2753_v15 = vadd.f32 %v837_v51, %v836_v12  ;;  %v825_v14 = vadd.f32 %v1444_v54, %v824_v19 }
 0x36a   :  { %1447 = vtanh.f32 %v2753_v15  ;;  %v829_v13 = vsel %vm828_vm10, %v1444_v54, %v825_v14 }
 0x36b   :  { %v834_v18 = vsel %vm831_vm11, %v833_v42, %v829_v13 }
 0x370   :  { %v1448_v16 = vpop.eup %1447 }
 0x371   :  { %v840_v9 = vmul.f32 %v1448_v16, %v834_v18 }
 0x373   :  { %1343 = vst [vmem:[%s2879_s2 + $0x20] sm:$0xff] %v840_v9  ;;  %864 = vmatmul.f32.vlgmr.msrb.gmra.mxu0 %v840_v9  ;;  %884 = vmatmul.f32.vlgmr.msrb.gmra.mxu1 %v840_v9 }
 0x374   :  { %904 = vmatmul.f32.vlgmr.msrb.gmra.mxu2 %v840_v9  ;;  %924 = vmatmul.f32.vlgmr.msrb.gmra.mxu3 %v840_v9 }
 0x375   :  { %1156 = vmatpush.msrb.mxu0 %v2276_v50  ;;  %1176 = vmatpush.msrb.mxu1 %v2282_v21  ;;  %v3118_v50 = vld [vmem:[#allocation2_spill] sm:$0xff]  ;;  %v3119_v21 = vld [vmem:[#allocation16_spill] sm:$0xff] }
 0x376   :  { %1196 = vmatpush.msrb.mxu2 %v2288_v22  ;;  %1216 = vmatpush.msrb.mxu3 %v2294_v23  ;;  %v3120_v22 = vld [vmem:[#allocation3_spill] sm:$0xff]  ;;  %v3121_v23 = vld [vmem:[#allocation4_spill] sm:$0xff] }
 0x377   :  { %1157 = vmatpush.msrb.mxu0 %v2300_v24  ;;  %1177 = vmatpush.msrb.mxu1 %v2306_v25  ;;  %v3122_v24 = vld [vmem:[#allocation5_spill] sm:$0xff]  ;;  %v3123_v25 = vld [vmem:[#allocation20_spill] sm:$0xff] }
 0x378   :  { %1197 = vmatpush.msrb.mxu2 %v2312_v26  ;;  %1217 = vmatpush.msrb.mxu3 %v2318_v27  ;;  %v3124_v26 = vld [vmem:[#allocation6_spill] sm:$0xff]  ;;  %v3125_v27 = vld [vmem:[#allocation7_spill] sm:$0xff] }
 0x379   :  { %1158 = vmatpush.msrb.mxu0 %v2324_v28  ;;  %1178 = vmatpush.msrb.mxu1 %v2330_v29  ;;  %v3126_v28 = vld [vmem:[#allocation8_spill] sm:$0xff] }
 0x37a   :  { %1198 = vmatpush.msrb.mxu2 %v2336_v30  ;;  %1218 = vmatpush.msrb.mxu3 %v2342_v31  ;;  %v3127_v29 = vld [vmem:[#allocation24_spill] sm:$0xff]  ;;  %v3128_v30 = vld [vmem:[#allocation9_spill] sm:$0xff]  ;;  %v3129_v31 = vld [vmem:[#allocation10_spill] sm:$0xff] }
 0x37b   :  { %1159 = vmatpush.msrb.mxu0 %v2348_v32  ;;  %1179 = vmatpush.msrb.mxu1 %v2354_v33  ;;  %v3130_v32 = vld [vmem:[#allocation11_spill] sm:$0xff]  ;;  %v3131_v33 = vld [vmem:[#allocation25_spill] sm:$0xff] }
 0x37c   :  { %1199 = vmatpush.msrb.mxu2 %v2360_v35  ;;  %1219 = vmatpush.msrb.mxu3 %v2366_v39  ;;  %v3132_v35 = vld [vmem:[#allocation12_spill] sm:$0xff]  ;;  %v3133_v39 = vld [vmem:[#allocation13_spill] sm:$0xff] }
 0x37d   :  { %1160 = vmatpush.msrb.mxu0 %v2372_v43  ;;  %1180 = vmatpush.msrb.mxu1 %v2378_v47  ;;  %v3134_v43 = vld [vmem:[#allocation14_spill] sm:$0xff] }
 0x37e   :  { %1200 = vmatpush.msrb.mxu2 %v2384_v60  ;;  %1220 = vmatpush.msrb.mxu3 %v2390_v63  ;;  %v3135_v47 = vld [vmem:[#allocation26_spill] sm:$0xff]  ;;  %v3136_v60 = vld [vmem:[#allocation15_spill] sm:$0xff]  ;;  %v3137_v63 = vld [vmem:[#allocation17_spill] sm:$0xff] }
 0x37f   :  { %1161 = vmatpush.msrb.mxu0 %v2396_v34  ;;  %1181 = vmatpush.msrb.mxu1 %v2402_v36  ;;  %v3138_v34 = vld [vmem:[#allocation18_spill] sm:$0xff]  ;;  %v3139_v36 = vld [vmem:[#allocation27_spill] sm:$0xff] }
 0x380   :  { %1201 = vmatpush.msrb.mxu2 %v2408_v37  ;;  %1221 = vmatpush.msrb.mxu3 %v2414_v40  ;;  %v3140_v37 = vld [vmem:[#allocation19_spill] sm:$0xff]  ;;  %v3141_v40 = vld [vmem:[#allocation21_spill] sm:$0xff] }
 0x381   :  { %1162 = vmatpush.msrb.mxu0 %v2420_v56  ;;  %1182 = vmatpush.msrb.mxu1 %v2426_v45  ;;  %v3142_v56 = vld [vmem:[#allocation22_spill] sm:$0xff]  ;;  %v3143_v45 = vld [vmem:[#allocation28_spill] sm:$0xff] }
 0x382   :  { %1202 = vmatpush.msrb.mxu2 %v2432_v53  ;;  %1222 = vmatpush.msrb.mxu3 %v2438_v46  ;;  %v1344_v53 = vld [vmem:[%s2878_s0 + $0xa0] sm:$0xff]  ;;  %v1345_v46 = vld [vmem:[%s2878_s0 + $0xa8] sm:$0xff] }
 0x383   :  { %1163 = vmatpush.msrb.mxu0 %v2444_v62  ;;  %1183 = vmatpush.msrb.mxu1 %v2450_v44 }
 0x384   :  { %1203 = vmatpush.msrb.mxu2 %v2456_v57  ;;  %1223 = vmatpush.msrb.mxu3 %v2462_v2 }
 0x385   :  { %1164 = vmatpush.msrb.mxu0 %v2468_v38  ;;  %1184 = vmatpush.msrb.mxu1 %v2474_v55 }
 0x386   :  { %1204 = vmatpush.msrb.mxu2 %v2480_v41  ;;  %1224 = vmatpush.msrb.mxu3 %v2486_v58  ;;  %v1347_v41 = vld [vmem:[%s2878_s0 + $0xb8] sm:$0xff] }
 0x387   :  { %1165 = vmatpush.msrb.mxu0 %v2492_v52  ;;  %1185 = vmatpush.msrb.mxu1 %v2498_v48 }
 0x388   :  { %1205 = vmatpush.msrb.mxu2 %v3118_v50  ;;  %1225 = vmatpush.msrb.mxu3 %v3119_v21 }
 0x389   :  { %1166 = vmatpush.msrb.mxu0 %v3120_v22  ;;  %1186 = vmatpush.msrb.mxu1 %v3121_v23 }
 0x38a   :  { %1206 = vmatpush.msrb.mxu2 %v3122_v24  ;;  %1226 = vmatpush.msrb.mxu3 %v3123_v25 }
 0x38b   :  { %1167 = vmatpush.msrb.mxu0 %v3124_v26  ;;  %1187 = vmatpush.msrb.mxu1 %v3125_v27 }
 0x38c   :  { %1207 = vmatpush.msrb.mxu2 %v3126_v28  ;;  %1227 = vmatpush.msrb.mxu3 %v3127_v29 }
 0x38d   :  { %1168 = vmatpush.msrb.mxu0 %v3128_v30  ;;  %1188 = vmatpush.msrb.mxu1 %v3129_v31 }
 0x38e   :  { %1208 = vmatpush.msrb.mxu2 %v3130_v32  ;;  %1228 = vmatpush.msrb.mxu3 %v3131_v33 }
 0x38f   :  { %1169 = vmatpush.msrb.mxu0 %v3132_v35  ;;  %1189 = vmatpush.msrb.mxu1 %v3133_v39 }
 0x390   :  { %1209 = vmatpush.msrb.mxu2 %v3134_v43  ;;  %1229 = vmatpush.msrb.mxu3 %v3135_v47 }
 0x391   :  { %1170 = vmatpush.msrb.mxu0 %v3136_v60  ;;  %1190 = vmatpush.msrb.mxu1 %v3137_v63 }
 0x392   :  { %1210 = vmatpush.msrb.mxu2 %v3138_v34  ;;  %1230 = vmatpush.msrb.mxu3 %v3139_v36  ;;  %v1353_v34 = vld [vmem:[%s2878_s0 + $0xc8] sm:$0xff] }
 0x393   :  { %1171 = vmatpush.msrb.mxu0 %v3140_v37  ;;  %1191 = vmatpush.msrb.mxu1 %v3141_v40 }
 0x394   :  { %1211 = vmatpush.msrb.mxu2 %v3142_v56  ;;  %1231 = vmatpush.msrb.mxu3 %v3143_v45 }
 0x3f0   :  { %v865_v62 = vpop.f32.mrf.mxu0  ;;  %v885_v44 = vpop.f32.mrf.mxu1 }
 0x3f1   :  { %v928_v57 = vadd.f32 %v1344_v53, %v865_v62  ;;  %v929_v2 = vadd.f32 %v1345_v46, %v885_v44  ;;  %v1355_v46 = vld [vmem:[%s2878_s0 + $0xd8] sm:$0xff] }
 0x3f3   :  { %v1348_v38 = vmul.f32 -1.442695, %v928_v57  ;;  %v1349_v55 = vmul.f32 -1.442695, %v929_v2 }
 0x3f5   :  { %1449 = vpow2.f32 %v1348_v38 }
 0x3f6   :  { %1451 = vpow2.f32 %v1349_v55 }
 0x3f7   :  { %v925_v58 = vpop.f32.mrf.mxu3  ;;  %v905_v54 = vpop.f32.mrf.mxu2 }
 0x3f8   :  { %v931_v52 = vadd.f32 %v1347_v41, %v925_v58  ;;  %v930_v17 = vadd.f32 %v1346_v59, %v905_v54  ;;  %v1354_v58 = vld [vmem:[%s2878_s0 + $0xd0] sm:$0xff] }
 0x3fa   :  { %v1350_v48 = vmul.f32 -1.442695, %v931_v52 }
 0x3fb   :  { %v1450_v5 = vpop.eup %1449 }
 0x3fc   :  { %v1452_v12 = vpop.eup %1451  ;;  %v935_v51 = vadd.f32 1.0, %v1450_v5  ;;  %1453 = vpow2.f32 %v1350_v48 }
 0x3fd   :  { %v954_v61 = vadd.f32 1.0, %v1452_v12 }
 0x3fe   :  { %1455 = vrcp.f32 %v935_v51  ;;  %v947_v7 = vand.u32 2147483648, %v935_v51  ;;  %v945_v6 = vand.u32 2147483647, %v935_v51  ;;  %vm941_vm14 = vweird.f32 %v935_v51 }
 0x3ff   :  { %1457 = vrcp.f32 %v954_v61  ;;  %v966_v19 = vand.u32 2147483648, %v954_v61  ;;  %v964_v13 = vand.u32 2147483647, %v954_v61  ;;  %vm960_vm15 = vweird.f32 %v954_v61 }
 0x400   :  { %v948_v18 = vor.u32 1.1754944e-38, %v947_v7  ;;  %vm946_vm2 = vcmp.eq.f32.partialorder %v945_v6, 8.507059e+37 }
 0x401   :  { %v967_v21 = vor.u32 1.1754944e-38, %v966_v19  ;;  %vm965_vm3 = vcmp.eq.f32.partialorder %v964_v13, 8.507059e+37 }
 0x402   :  { %v1454_v1 = vpop.eup %1453 }
 0x403   :  { %v974_v20 = vadd.f32 1.0, %v1454_v1 }
 0x404   :  { %v1456_v8 = vpop.eup %1455 }
 0x405   :  { %v1458_v4 = vpop.eup %1457  ;;  %v937_v0 = vmul.f32 %v1456_v8, %v935_v51  ;;  %1459 = vrcp.f32 %v974_v20  ;;  %vm942_vm12 = vweird.f32 %v1456_v8  ;;  %v986_v33 = vand.u32 2147483648, %v974_v20 }
 0x406   :  { %v956_v10 = vmul.f32 %v1458_v4, %v954_v61  ;;  %1461 = vtanh.f32 %v930_v17  ;;  %vm961_vm13 = vweird.f32 %v1458_v4  ;;  %vm943_vm0 = vmor %vm941_vm14, %vm942_vm12  ;;  %vm980_vm5 = vweird.f32 %v974_v20 }
 0x407   :  { %v938_v3 = vsub.f32 1.0, %v937_v0  ;;  %vm962_vm1 = vmor %vm960_vm15, %vm961_vm13  ;;  %v984_v35 = vand.u32 2147483647, %v974_v20  ;;  %v987_v43 = vor.u32 1.1754944e-38, %v986_v33 }
 0x408   :  { %v957_v11 = vsub.f32 1.0, %v956_v10 }
 0x409   :  { %v939_v14 = vmul.f32 %v1456_v8, %v938_v3  ;;  %vm985_vm7 = vcmp.eq.f32.partialorder %v984_v35, 8.507059e+37  ;;  %v1361_v35 = vld [vmem:[%s2878_s0 + $0xe8] sm:$0xff] }
 0x40a   :  { %v958_v49 = vmul.f32 %v1458_v4, %v957_v11 }
 0x40b   :  { %v1460_v42 = vpop.eup %1459  ;;  %v940_v16 = vadd.f32 %v1456_v8, %v939_v14 }
 0x40c   :  { %v959_v9 = vadd.f32 %v1458_v4, %v958_v49  ;;  %v976_v50 = vmul.f32 %v1460_v42, %v974_v20  ;;  %v1462_v23 = vpop.eup %1461  ;;  %vm981_vm4 = vweird.f32 %v1460_v42 }
 0x40d   :  { %v944_v22 = vsel %vm943_vm0, %v1456_v8, %v940_v16  ;;  %vm982_vm6 = vmor %vm980_vm5, %vm981_vm4 }
 0x40e   :  { %v949_v24 = vsel %vm946_vm2, %v948_v18, %v944_v22  ;;  %v963_v25 = vsel %vm962_vm1, %v1458_v4, %v959_v9  ;;  %v977_v26 = vsub.f32 1.0, %v976_v50 }
 0x40f   :  { %v968_v27 = vsel %vm965_vm3, %v967_v21, %v963_v25  ;;  %v991_v28 = vmul.f32 %v1462_v23, %v949_v24 }
 0x410   :  { %v990_v29 = vmul.f32 %v968_v27, %v2753_v15  ;;  %v978_v30 = vmul.f32 %v1460_v42, %v977_v26  ;;  %v1352_v15 = vld [vmem:[%s2878_s0 + $0xc0] sm:$0xff] }
 0x412   :  { %v2836_v31 = vadd.f32 %v991_v28, %v990_v29  ;;  %v979_v32 = vadd.f32 %v1460_v42, %v978_v30 }
 0x414   :  { %1463 = vtanh.f32 %v2836_v31  ;;  %v983_v39 = vsel %vm982_vm6, %v1460_v42, %v979_v32 }
 0x415   :  { %v988_v60 = vsel %vm985_vm7, %v987_v43, %v983_v39 }
 0x41a   :  { %v1464_v47 = vpop.eup %1463 }
 0x41b   :  { %v994_v63 = vmul.f32 %v1464_v47, %v988_v60 }
 0x41d   :  { %1351 = vst [vmem:[%s2879_s2 + $0x28] sm:$0xff] %v994_v63  ;;  %1018 = vmatmul.f32.vlgmr.msra.gmra.mxu0 %v994_v63  ;;  %1038 = vmatmul.f32.vlgmr.msra.gmra.mxu1 %v994_v63 }
 0x41e   :  { %1058 = vmatmul.f32.vlgmr.msra.gmra.mxu2 %v994_v63  ;;  %1078 = vmatmul.f32.vlgmr.msra.gmra.mxu3 %v994_v63 }
 0x49a   :  { %v1019_v36 = vpop.f32.mrf.mxu0  ;;  %v1039_v37 = vpop.f32.mrf.mxu1 }
 0x49b   :  { %v1082_v40 = vadd.f32 %v1352_v15, %v1019_v36  ;;  %v1083_v56 = vadd.f32 %v1353_v34, %v1039_v37  ;;  %v1363_v34 = vld [vmem:[%s2878_s0 + $0xf8] sm:$0xff] }
 0x49d   :  { %v1356_v45 = vmul.f32 -1.442695, %v1082_v40  ;;  %v1357_v53 = vmul.f32 -1.442695, %v1083_v56 }
 0x49f   :  { %1465 = vpow2.f32 %v1356_v45 }
 0x4a0   :  { %1467 = vpow2.f32 %v1357_v53 }
 0x4a1   :  { %v1079_v62 = vpop.f32.mrf.mxu3  ;;  %v1059_v52 = vpop.f32.mrf.mxu2 }
 0x4a2   :  { %v1085_v44 = vadd.f32 %v1355_v46, %v1079_v62  ;;  %v1084_v51 = vadd.f32 %v1354_v58, %v1059_v52  ;;  %v1362_v62 = vld [vmem:[%s2878_s0 + $0xf0] sm:$0xff] }
 0x4a4   :  { %v1358_v57 = vmul.f32 -1.442695, %v1085_v44 }
 0x4a5   :  { %v1466_v2 = vpop.eup %1465 }
 0x4a6   :  { %v1468_v38 = vpop.eup %1467  ;;  %v1089_v55 = vadd.f32 1.0, %v1466_v2  ;;  %1469 = vpow2.f32 %v1358_v57 }
 0x4a7   :  { %v1108_v41 = vadd.f32 1.0, %v1468_v38 }
 0x4a8   :  { %1471 = vrcp.f32 %v1089_v55  ;;  %v1101_v8 = vand.u32 2147483648, %v1089_v55  ;;  %v1099_v0 = vand.u32 2147483647, %v1089_v55  ;;  %vm1095_vm10 = vweird.f32 %v1089_v55 }
 0x4a9   :  { %1473 = vrcp.f32 %v1108_v41  ;;  %v1120_v17 = vand.u32 2147483648, %v1108_v41  ;;  %v1118_v3 = vand.u32 2147483647, %v1108_v41  ;;  %vm1114_vm11 = vweird.f32 %v1108_v41 }
 0x4aa   :  { %v1102_v19 = vor.u32 1.1754944e-38, %v1101_v8  ;;  %vm1100_vm14 = vcmp.eq.f32.partialorder %v1099_v0, 8.507059e+37 }
 0x4ab   :  { %v1121_v49 = vor.u32 1.1754944e-38, %v1120_v17  ;;  %vm1119_vm15 = vcmp.eq.f32.partialorder %v1118_v3, 8.507059e+37 }
 0x4ac   :  { %v1470_v48 = vpop.eup %1469 }
 0x4ad   :  { %v1128_v5 = vadd.f32 1.0, %v1470_v48 }
 0x4ae   :  { %v1472_v12 = vpop.eup %1471 }
 0x4af   :  { %v1474_v61 = vpop.eup %1473  ;;  %v1091_v59 = vmul.f32 %v1472_v12, %v1089_v55  ;;  %1475 = vrcp.f32 %v1128_v5  ;;  %vm1096_vm8 = vweird.f32 %v1472_v12  ;;  %v1140_v26 = vand.u32 2147483648, %v1128_v5 }
 0x4b0   :  { %v1110_v54 = vmul.f32 %v1474_v61, %v1108_v41  ;;  %1477 = vtanh.f32 %v1084_v51  ;;  %vm1115_vm9 = vweird.f32 %v1474_v61  ;;  %vm1097_vm12 = vmor %vm1095_vm10, %vm1096_vm8  ;;  %vm1134_vm1 = vweird.f32 %v1128_v5 }
 0x4b1   :  { %v1092_v1 = vsub.f32 1.0, %v1091_v59  ;;  %vm1116_vm13 = vmor %vm1114_vm11, %vm1115_vm9  ;;  %v1138_v27 = vand.u32 2147483647, %v1128_v5  ;;  %v1141_v29 = vor.u32 1.1754944e-38, %v1140_v26 }
 0x4b2   :  { %v1111_v20 = vsub.f32 1.0, %v1110_v54 }
 0x4b3   :  { %v1093_v4 = vmul.f32 %v1472_v12, %v1092_v1  ;;  %vm1139_vm3 = vcmp.eq.f32.partialorder %v1138_v27, 8.507059e+37 }
 0x4b4   :  { %v1112_v10 = vmul.f32 %v1474_v61, %v1111_v20 }
 0x4b5   :  { %v1476_v11 = vpop.eup %1475  ;;  %v1094_v7 = vadd.f32 %v1472_v12, %v1093_v4 }
 0x4b6   :  { %v1113_v14 = vadd.f32 %v1474_v61, %v1112_v10  ;;  %v1130_v6 = vmul.f32 %v1476_v11, %v1128_v5  ;;  %v1478_v42 = vpop.eup %1477  ;;  %vm1135_vm0 = vweird.f32 %v1476_v11 }
 0x4b7   :  { %v1098_v13 = vsel %vm1097_vm12, %v1472_v12, %v1094_v7  ;;  %vm1136_vm2 = vmor %vm1134_vm1, %vm1135_vm0 }
 0x4b8   :  { %v1103_v16 = vsel %vm1100_vm14, %v1102_v19, %v1098_v13  ;;  %v1117_v18 = vsel %vm1116_vm13, %v1474_v61, %v1113_v14  ;;  %v1131_v9 = vsub.f32 1.0, %v1130_v6 }
 0x4b9   :  { %v1122_v50 = vsel %vm1119_vm15, %v1121_v49, %v1117_v18  ;;  %v1145_v21 = vmul.f32 %v1478_v42, %v1103_v16 }
 0x4ba   :  { %v1144_v22 = vmul.f32 %v1122_v50, %v2836_v31  ;;  %v1132_v23 = vmul.f32 %v1476_v11, %v1131_v9  ;;  %v1360_v31 = vld [vmem:[%s2878_s0 + $0xe0] sm:$0xff] }
 0x4bc   :  { %v2855_v24 = vadd.f32 %v1145_v21, %v1144_v22  ;;  %v1133_v25 = vadd.f32 %v1476_v11, %v1132_v23 }
 0x4be   :  { %1479 = vtanh.f32 %v2855_v24  ;;  %v1137_v28 = vsel %vm1136_vm2, %v1476_v11, %v1133_v25 }
 0x4bf   :  { %v1142_v32 = vsel %vm1139_vm3, %v1141_v29, %v1137_v28 }
 0x4c4   :  { %v1480_v30 = vpop.eup %1479 }
 0x4c5   :  { %v1148_v33 = vmul.f32 %v1480_v30, %v1142_v32 }
 0x4c7   :  { %1359 = vst [vmem:[%s2879_s2 + $0x30] sm:$0xff] %v1148_v33  ;;  %1172 = vmatmul.f32.vlgmr.msrb.gmra.mxu0 %v1148_v33  ;;  %1192 = vmatmul.f32.vlgmr.msrb.gmra.mxu1 %v1148_v33 }
 0x4c8   :  { %1212 = vmatmul.f32.vlgmr.msrb.gmra.mxu2 %v1148_v33  ;;  %1232 = vmatmul.f32.vlgmr.msrb.gmra.mxu3 %v1148_v33 }
 0x544   :  { %v1173_v39 = vpop.f32.mrf.mxu0  ;;  %v1193_v43 = vpop.f32.mrf.mxu1 }
 0x545   :  { %v1236_v47 = vadd.f32 %v1360_v31, %v1173_v39  ;;  %v1237_v60 = vadd.f32 %v1361_v35, %v1193_v43 }
 0x547   :  { %v1364_v63 = vmul.f32 -1.442695, %v1236_v47  ;;  %v1365_v15 = vmul.f32 -1.442695, %v1237_v60 }
 0x549   :  { %1481 = vpow2.f32 %v1364_v63 }
 0x54a   :  { %1483 = vpow2.f32 %v1365_v15 }
 0x54b   :  { %v1233_v36 = vpop.f32.mrf.mxu3  ;;  %v1213_v44 = vpop.f32.mrf.mxu2 }
 0x54c   :  { %v1239_v37 = vadd.f32 %v1363_v34, %v1233_v36  ;;  %v1238_v55 = vadd.f32 %v1362_v62, %v1213_v44 }
 0x54e   :  { %v1366_v40 = vmul.f32 -1.442695, %v1239_v37 }
 0x54f   :  { %v1482_v56 = vpop.eup %1481 }
 0x550   :  { %v1484_v45 = vpop.eup %1483  ;;  %v1243_v53 = vadd.f32 1.0, %v1482_v56  ;;  %1485 = vpow2.f32 %v1366_v40 }
 0x551   :  { %v1262_v46 = vadd.f32 1.0, %v1484_v45 }
 0x552   :  { %1487 = vrcp.f32 %v1243_v53  ;;  %v1255_v12 = vand.u32 2147483648, %v1243_v53  ;;  %v1253_v59 = vand.u32 2147483647, %v1243_v53  ;;  %vm1249_vm6 = vweird.f32 %v1243_v53 }
 0x553   :  { %1489 = vrcp.f32 %v1262_v46  ;;  %v1274_v51 = vand.u32 2147483648, %v1262_v46  ;;  %v1272_v1 = vand.u32 2147483647, %v1262_v46  ;;  %vm1268_vm7 = vweird.f32 %v1262_v46 }
 0x554   :  { %v1256_v17 = vor.u32 1.1754944e-38, %v1255_v12  ;;  %vm1254_vm10 = vcmp.eq.f32.partialorder %v1253_v59, 8.507059e+37 }
 0x555   :  { %v1275_v10 = vor.u32 1.1754944e-38, %v1274_v51  ;;  %vm1273_vm11 = vcmp.eq.f32.partialorder %v1272_v1, 8.507059e+37 }
 0x556   :  { %v1486_v57 = vpop.eup %1485 }
 0x557   :  { %v1282_v2 = vadd.f32 1.0, %v1486_v57 }
 0x558   :  { %v1488_v38 = vpop.eup %1487 }
 0x559   :  { %v1490_v41 = vpop.eup %1489  ;;  %v1245_v58 = vmul.f32 %v1488_v38, %v1243_v53  ;;  %1491 = vrcp.f32 %v1282_v2  ;;  %vm1250_vm4 = vweird.f32 %v1488_v38  ;;  %v1294_v9 = vand.u32 2147483648, %v1282_v2 }
 0x55a   :  { %v1264_v52 = vmul.f32 %v1490_v41, %v1262_v46  ;;  %1493 = vtanh.f32 %v1238_v55  ;;  %vm1269_vm5 = vweird.f32 %v1490_v41  ;;  %vm1251_vm8 = vmor %vm1249_vm6, %vm1250_vm4  ;;  %vm1288_vm13 = vweird.f32 %v1282_v2 }
 0x55b   :  { %v1246_v48 = vsub.f32 1.0, %v1245_v58  ;;  %vm1270_vm9 = vmor %vm1268_vm7, %vm1269_vm5  ;;  %v1292_v50 = vand.u32 2147483647, %v1282_v2  ;;  %v1295_v22 = vor.u32 1.1754944e-38, %v1294_v9 }
 0x55c   :  { %v1265_v5 = vsub.f32 1.0, %v1264_v52 }
 0x55d   :  { %v1247_v61 = vmul.f32 %v1488_v38, %v1246_v48  ;;  %vm1293_vm15 = vcmp.eq.f32.partialorder %v1292_v50, 8.507059e+37 }
 0x55e   :  { %v1266_v54 = vmul.f32 %v1490_v41, %v1265_v5 }
 0x55f   :  { %v1492_v20 = vpop.eup %1491  ;;  %v1248_v8 = vadd.f32 %v1488_v38, %v1247_v61 }
 0x560   :  { %v1267_v4 = vadd.f32 %v1490_v41, %v1266_v54  ;;  %v1284_v0 = vmul.f32 %v1492_v20, %v1282_v2  ;;  %v1494_v11 = vpop.eup %1493  ;;  %vm1289_vm12 = vweird.f32 %v1492_v20 }
 0x561   :  { %v1252_v3 = vsel %vm1251_vm8, %v1488_v38, %v1248_v8  ;;  %vm1290_vm14 = vmor %vm1288_vm13, %vm1289_vm12 }
 0x562   :  { %v1257_v7 = vsel %vm1254_vm10, %v1256_v17, %v1252_v3  ;;  %v1271_v19 = vsel %vm1270_vm9, %v1490_v41, %v1267_v4  ;;  %v1285_v14 = vsub.f32 1.0, %v1284_v0 }
 0x563   :  { %v1276_v6 = vsel %vm1273_vm11, %v1275_v10, %v1271_v19  ;;  %v1299_v49 = vmul.f32 %v1494_v11, %v1257_v7 }
 0x564   :  { %v1298_v13 = vmul.f32 %v1276_v6, %v2855_v24  ;;  %v1286_v42 = vmul.f32 %v1492_v20, %v1285_v14 }
 0x566   :  { %v1300_v16 = vadd.f32 %v1299_v49, %v1298_v13  ;;  %v1287_v18 = vadd.f32 %v1492_v20, %v1286_v42 }
 0x568   :  { %1495 = vtanh.f32 %v1300_v16  ;;  %v1291_v21 = vsel %vm1290_vm14, %v1492_v20, %v1287_v18 }
 0x569   :  { %v1296_v25 = vsel %vm1293_vm15, %v1295_v22, %v1291_v21 }
 0x56e   :  { %v1496_v23 = vpop.eup %1495 }
 0x56f   :  { %v1302_v26 = vmul.f32 %v1496_v23, %v1296_v25 }
 0x571   :  { %1367 = vst [vmem:[%s2879_s2 + $0x38] sm:$0xff] %v1302_v26 }

</bundles_post_ra>
